<compile_context>
chip_gen: v5e
topology: v5e:2x2
jax: 0.10.0
libtpu: 0.0.40
codegen_flags: <defaults>
</compile_context>

<pallas_src>
import math

import jax
import jax.numpy as jnp
from jax import lax
from jax.experimental import pallas as pl
from jax.experimental.pallas import tpu as pltpu


def _round_up(x, m):
    return (x + m - 1) // m * m


def _pick_t_chunk(t, max_chunk=32):
    """Largest divisor of t that is <= max_chunk (keeps the unrolled body small)."""
    for c in range(min(t, max_chunk), 0, -1):
        if t % c == 0:
            return c
    return t


# ----------------------------- Pallas kernel -------------------------------- #

def gru_forward_kernel(gx0_ref, h0_ref,
                       wh0_ref, bh0_ref,
                       wi1_ref, bi1_ref, wh1_ref, bh1_ref,
                       wlin_ref, blin_ref,
                       out_ref, lasth_ref,
                       h_scr):
    """One grid step processes T_CHUNK timesteps.

    gx0_ref : (T_CHUNK, Bp, 3*Hp)  precomputed layer-0 input gates (b_ih included)
    h0_ref  : (2, Bp, Hp)          initial hidden state (both layers)
    wh0/wh1 : (Hp, 3*Hp)           hidden weights, gate-stacked [r|z|n]
    wi1     : (Hp, 3*Hp)           layer-1 input weights (fed by layer-0 hidden)
    b*      : (1, 3*Hp)            gate-stacked biases
    wlin    : (Hp, Cp), blin : (1, Cp)
    out_ref : (Bp, Cp), lasth_ref : (2, Bp, Hp)
    h_scr   : VMEM scratch (2, Bp, Hp) carrying the hidden state across chunks
    """
    t_chunk, b_p, g = gx0_ref.shape
    h_p = g // 3
    tc = pl.program_id(0)

    @pl.when(tc == 0)
    def _():
        h_scr[...] = h0_ref[...]

    # Hoist weight loads and bias broadcasts out of the (unrolled) time loop.
    wh0 = wh0_ref[...]
    wi1 = wi1_ref[...]
    wh1 = wh1_ref[...]
    bh0 = jnp.broadcast_to(bh0_ref[...], (b_p, g))
    bi1 = jnp.broadcast_to(bi1_ref[...], (b_p, g))
    bh1 = jnp.broadcast_to(bh1_ref[...], (b_p, g))

    def cell(gi, h, wh, bh):
        # gi already contains the input projection plus b_ih (all three gates).
        gh = jnp.dot(h, wh, preferred_element_type=jnp.float32) + bh
        r = jax.nn.sigmoid(gi[:, :h_p] + gh[:, :h_p])
        z = jax.nn.sigmoid(gi[:, h_p:2 * h_p] + gh[:, h_p:2 * h_p])
        n = jnp.tanh(gi[:, 2 * h_p:] + r * gh[:, 2 * h_p:])   # b_hh_n stays inside r*(...)
        return (1.0 - z) * n + z * h

    def step(t, carry):
        h_l0, h_l1 = carry
        gi0 = gx0_ref[t]                                               # (Bp, 3Hp)
        h_l0 = cell(gi0, h_l0, wh0, bh0)                               # layer 0
        gi1 = jnp.dot(h_l0, wi1, preferred_element_type=jnp.float32) + bi1
        h_l1 = cell(gi1, h_l1, wh1, bh1)                               # layer 1
        return (h_l0, h_l1)

    h_l0, h_l1 = lax.fori_loop(0, t_chunk, step, (h_scr[0], h_scr[1]),
                               unroll=True)
    h_scr[0] = h_l0
    h_scr[1] = h_l1

    @pl.when(tc == pl.num_programs(0) - 1)
    def _():
        lasth_ref[0] = h_l0
        lasth_ref[1] = h_l1
        # Linear head on last_h[0] (layer-0 final hidden), exactly as the reference
        # module does (the classic hidden[0]-vs-hidden[-1] choice is preserved).
        out_ref[...] = (jnp.dot(h_l0, wlin_ref[...],
                                preferred_element_type=jnp.float32)
                        + blin_ref[...])


# ------------------------------ JAX wrapper --------------------------------- #

def _stack_pad_w(w, h, h_pad, in_pad):
    """(3H, in) torch-layout weight -> (in_pad, 3*h_pad), gate-stacked [r|z|n]."""
    in_dim = w.shape[1]
    w3 = jnp.transpose(w.reshape(3, h, in_dim), (0, 2, 1))        # (3, in, H)
    w3 = jnp.pad(w3, ((0, 0), (0, in_pad - in_dim), (0, h_pad - h)))
    return jnp.transpose(w3, (1, 0, 2)).reshape(in_pad, 3 * h_pad)


def _pad_bias(b, h, h_pad):
    """(3H,) -> (1, 3*h_pad), gate-stacked."""
    return jnp.pad(b.reshape(3, h), ((0, 0), (0, h_pad - h))).reshape(1, 3 * h_pad)


def gru_forward(ids, h0, params):
    """ids: (B, T) int32 token ids; h0: (2, B, H) float32."""
    B, T = ids.shape
    H = h0.shape[2]
    C = params["w_lin"].shape[0]

    Bp = _round_up(B, 8)       # sublane-aligned batch
    Hp = _round_up(H, 128)     # lane-aligned hidden
    Cp = _round_up(C, 128)     # lane-aligned classifier output
    t_chunk = _pick_t_chunk(T)
    n_chunks = T // t_chunk

    # --- XLA glue: embedding gather + hoisted layer-0 input projection ------ #
    x = jnp.take(params["embedding"], ids, axis=0).astype(jnp.float32)    # (B, T, E)
    gx0 = jnp.einsum("bte,ge->btg", x, params["w_ih_l0"]) + params["b_ih_l0"]   # (B, T, 3H)
    gx0 = gx0.reshape(B, T, 3, H)
    gx0 = jnp.pad(gx0, ((0, Bp - B), (0, 0), (0, 0), (0, Hp - H)))
    gx0 = jnp.transpose(gx0, (1, 0, 2, 3)).reshape(T, Bp, 3 * Hp)         # time-major

    h0_p = jnp.pad(h0.astype(jnp.float32), ((0, 0), (0, Bp - B), (0, Hp - H)))

    args = (
        gx0,
        h0_p,
        _stack_pad_w(params["w_hh_l0"], H, Hp, Hp),
        _pad_bias(params["b_hh_l0"], H, Hp),
        _stack_pad_w(params["w_ih_l1"], H, Hp, Hp),
        _pad_bias(params["b_ih_l1"], H, Hp),
        _stack_pad_w(params["w_hh_l1"], H, Hp, Hp),
        _pad_bias(params["b_hh_l1"], H, Hp),
        jnp.pad(params["w_lin"].T, ((0, Hp - H), (0, Cp - C))),           # (Hp, Cp)
        jnp.pad(params["b_lin"].reshape(1, -1), ((0, 0), (0, Cp - C))),   # (1, Cp)
    )

    in_specs = [
        pl.BlockSpec((t_chunk, Bp, 3 * Hp), lambda t: (t, 0, 0)),   # streamed per chunk
        pl.BlockSpec((2, Bp, Hp), lambda t: (0, 0, 0)),
        pl.BlockSpec((Hp, 3 * Hp), lambda t: (0, 0)),
        pl.BlockSpec((1, 3 * Hp), lambda t: (0, 0)),
        pl.BlockSpec((Hp, 3 * Hp), lambda t: (0, 0)),
        pl.BlockSpec((1, 3 * Hp), lambda t: (0, 0)),
        pl.BlockSpec((Hp, 3 * Hp), lambda t: (0, 0)),
        pl.BlockSpec((1, 3 * Hp), lambda t: (0, 0)),
        pl.BlockSpec((Hp, Cp), lambda t: (0, 0)),
        pl.BlockSpec((1, Cp), lambda t: (0, 0)),
    ]
    out_specs = [
        pl.BlockSpec((Bp, Cp), lambda t: (0, 0)),
        pl.BlockSpec((2, Bp, Hp), lambda t: (0, 0, 0)),
    ]

    out_p, lasth_p = pl.pallas_call(
        gru_forward_kernel,
        out_shape=(jax.ShapeDtypeStruct((Bp, Cp), jnp.float32),
                   jax.ShapeDtypeStruct((2, Bp, Hp), jnp.float32)),
        grid_spec=pltpu.PrefetchScalarGridSpec(
            num_scalar_prefetch=0,
            grid=(n_chunks,),
            in_specs=in_specs,
            out_specs=out_specs,
            scratch_shapes=[pltpu.VMEM((2, Bp, Hp), jnp.float32)]),
        compiler_params=pltpu.CompilerParams(
            dimension_semantics=("arbitrary",)),   # T is a sequential recurrence
    )(*args)

    return out_p[:B, :C], lasth_p[:, :B, :H]


# --------------------------- Params / reference ----------------------------- #

def init_params(key, vocab, emb_dim, hidden, num_classes):
    ks = jax.random.split(key, 12)
    bound = 1.0 / math.sqrt(hidden)
    u = lambda k, shape: jax.random.uniform(k, shape, jnp.float32, -bound, bound)
    return {
        "embedding": jax.random.normal(ks[0], (vocab, emb_dim), jnp.float32),
        "w_ih_l0": u(ks[1], (3 * hidden, emb_dim)),
        "w_hh_l0": u(ks[2], (3 * hidden, hidden)),
        "b_ih_l0": u(ks[3], (3 * hidden,)),
        "b_hh_l0": u(ks[4], (3 * hidden,)),
        "w_ih_l1": u(ks[5], (3 * hidden, hidden)),
        "w_hh_l1": u(ks[6], (3 * hidden, hidden)),
        "b_ih_l1": u(ks[7], (3 * hidden,)),
        "b_hh_l1": u(ks[8], (3 * hidden,)),
        "w_lin": u(ks[9], (num_classes, hidden)),
        "b_lin": u(ks[10], (num_classes,)),
    }


def gru_ref(ids, h0, p):
    """Pure-JAX reference mirroring torch.nn.GRU(num_layers=2, batch_first=True)."""
    x = jnp.take(p["embedding"], ids, axis=0)
    H = h0.shape[2]

    def cell(x_t, h, w_ih, w_hh, b_ih, b_hh):
        gx = x_t @ w_ih.T + b_ih
        gh = h @ w_hh.T + b_hh
        r = jax.nn.sigmoid(gx[:, :H] + gh[:, :H])
        z = jax.nn.sigmoid(gx[:, H:2 * H] + gh[:, H:2 * H])
        n = jnp.tanh(gx[:, 2 * H:] + r * gh[:, 2 * H:])
        return (1.0 - z) * n + z * h

    h_l0, h_l1 = h0[0], h0[1]
    for t in range(x.shape[1]):
        h_l0 = cell(x[:, t], h_l0, p["w_ih_l0"], p["w_hh_l0"], p["b_ih_l0"], p["b_hh_l0"])
        h_l1 = cell(h_l0, h_l1, p["w_ih_l1"], p["w_hh_l1"], p["b_ih_l1"], p["b_hh_l1"])
    out = h_l0 @ p["w_lin"].T + p["b_lin"]
    return out, jnp.stack([h_l0, h_l1])


# ---------------------------------- main ------------------------------------ #

if __name__ == "__main__":
    # Small shapes consistent with the module (vocab / emb / hidden scaled down).
    VOCAB, EMB, HIDDEN, NUM_CLASSES = 1000, 32, 32, 2
    BATCH, SEQ = 2, 8

    key = jax.random.PRNGKey(0)
    pkey, ikey = jax.random.split(key)
    params = init_params(pkey, VOCAB, EMB, HIDDEN, NUM_CLASSES)

    ids = jax.random.randint(ikey, (BATCH, SEQ), 0, VOCAB, dtype=jnp.int32)
    h0 = jnp.zeros((2, BATCH, HIDDEN), jnp.float32)   # == init_hidden(batch_size)

    fwd = jax.jit(gru_forward)
    out, last_h = fwd(ids, h0, params)
    jax.block_until_ready((out, last_h))

    ref_out, ref_h = gru_ref(ids, h0, params)
    assert out.shape == (BATCH, NUM_CLASSES) and last_h.shape == (2, BATCH, HIDDEN)
    assert jnp.allclose(out, ref_out, atol=1e-4, rtol=1e-4), "output mismatch vs reference"
    assert jnp.allclose(last_h, ref_h, atol=1e-4, rtol=1e-4), "hidden mismatch vs reference"

    print("KERNEL_OK")
</pallas_src>

<mosaic_0001>
module attributes {stable_mosaic.version = 11 : i64} {
  func.func @gru_forward_kernel(%arg0: i32, %arg1: memref<8x8x384xf32, #tpu.memory_space<vmem>>, %arg2: memref<2x8x128xf32, #tpu.memory_space<vmem>>, %arg3: memref<128x384xf32, #tpu.memory_space<vmem>>, %arg4: memref<1x384xf32, #tpu.memory_space<vmem>>, %arg5: memref<128x384xf32, #tpu.memory_space<vmem>>, %arg6: memref<1x384xf32, #tpu.memory_space<vmem>>, %arg7: memref<128x384xf32, #tpu.memory_space<vmem>>, %arg8: memref<1x384xf32, #tpu.memory_space<vmem>>, %arg9: memref<128x128xf32, #tpu.memory_space<vmem>>, %arg10: memref<1x128xf32, #tpu.memory_space<vmem>>, %arg11: memref<8x128xf32, #tpu.memory_space<vmem>>, %arg12: memref<2x8x128xf32, #tpu.memory_space<vmem>>, %arg13: memref<2x8x128xf32, #tpu.memory_space<vmem>>) attributes {dimension_semantics = [#tpu.dimension_semantics<arbitrary>], iteration_bounds = array<i64: 1>, scalar_prefetch = 0 : i64, scratch_operands = 1 : i64, tpu.core_type = #tpu.core_type<tc>, window_params = [{transform_indices = @transform_0, window_bounds = array<i64: 8, 8, 384>}, {pipeline_mode = #tpu.pipeline_mode<synchronous>, transform_indices = @transform_1, window_bounds = array<i64: 2, 8, 128>}, {pipeline_mode = #tpu.pipeline_mode<synchronous>, transform_indices = @transform_2, window_bounds = array<i64: 128, 384>}, {pipeline_mode = #tpu.pipeline_mode<synchronous>, transform_indices = @transform_3, window_bounds = array<i64: 1, 384>}, {pipeline_mode = #tpu.pipeline_mode<synchronous>, transform_indices = @transform_4, window_bounds = array<i64: 128, 384>}, {pipeline_mode = #tpu.pipeline_mode<synchronous>, transform_indices = @transform_5, window_bounds = array<i64: 1, 384>}, {pipeline_mode = #tpu.pipeline_mode<synchronous>, transform_indices = @transform_6, window_bounds = array<i64: 128, 384>}, {pipeline_mode = #tpu.pipeline_mode<synchronous>, transform_indices = @transform_7, window_bounds = array<i64: 1, 384>}, {pipeline_mode = #tpu.pipeline_mode<synchronous>, transform_indices = @transform_8, window_bounds = array<i64: 128, 128>}, {pipeline_mode = #tpu.pipeline_mode<synchronous>, transform_indices = @transform_9, window_bounds = array<i64: 1, 128>}, {pipeline_mode = #tpu.pipeline_mode<synchronous>, transform_indices = @transform_10, window_bounds = array<i64: 8, 128>}, {pipeline_mode = #tpu.pipeline_mode<synchronous>, transform_indices = @transform_11, window_bounds = array<i64: 2, 8, 128>}]} {
    %c0_i32 = arith.constant 0 : i32
    %0 = arith.cmpi eq, %arg0, %c0_i32 : i32
    %1 = arith.extui %0 : i1 to i32
    %c0_i32_0 = arith.constant 0 : i32
    %2 = arith.cmpi ne, %1, %c0_i32_0 : i32
    scf.if %2 {
      %c0_113 = arith.constant 0 : index
      %c0_114 = arith.constant 0 : index
      %c0_115 = arith.constant 0 : index
      %516 = vector.load %arg2[%c0_113, %c0_114, %c0_115] : memref<2x8x128xf32, #tpu.memory_space<vmem>>, vector<2x8x128xf32>
      %c0_116 = arith.constant 0 : index
      %c0_117 = arith.constant 0 : index
      %c0_118 = arith.constant 0 : index
      %517 = vector.load %arg13[%c0_116, %c0_117, %c0_118] : memref<2x8x128xf32, #tpu.memory_space<vmem>>, vector<2x8x128xf32>
      tpu.vector_store %arg13[%c0_116, %c0_117, %c0_118], %516 {strides = array<i32>} : memref<2x8x128xf32, #tpu.memory_space<vmem>>, vector<2x8x128xf32>,
    } else {
    }
    %c0 = arith.constant 0 : index
    %c0_1 = arith.constant 0 : index
    %3 = vector.load %arg3[%c0, %c0_1] : memref<128x384xf32, #tpu.memory_space<vmem>>, vector<128x384xf32>
    %c0_2 = arith.constant 0 : index
    %c0_3 = arith.constant 0 : index
    %4 = vector.load %arg5[%c0_2, %c0_3] : memref<128x384xf32, #tpu.memory_space<vmem>>, vector<128x384xf32>
    %c0_4 = arith.constant 0 : index
    %c0_5 = arith.constant 0 : index
    %5 = vector.load %arg7[%c0_4, %c0_5] : memref<128x384xf32, #tpu.memory_space<vmem>>, vector<128x384xf32>
    %c0_6 = arith.constant 0 : index
    %c0_7 = arith.constant 0 : index
    %6 = vector.load %arg4[%c0_6, %c0_7] : memref<1x384xf32, #tpu.memory_space<vmem>>, vector<1x384xf32>
    %7 = vector.shape_cast %6 : vector<1x384xf32> to vector<1x384xf32>
    %8 = vector.broadcast %7 : vector<1x384xf32> to vector<8x384xf32>
    %c0_8 = arith.constant 0 : index
    %c0_9 = arith.constant 0 : index
    %9 = vector.load %arg6[%c0_8, %c0_9] : memref<1x384xf32, #tpu.memory_space<vmem>>, vector<1x384xf32>
    %10 = vector.shape_cast %9 : vector<1x384xf32> to vector<1x384xf32>
    %11 = vector.broadcast %10 : vector<1x384xf32> to vector<8x384xf32>
    %c0_10 = arith.constant 0 : index
    %c0_11 = arith.constant 0 : index
    %12 = vector.load %arg8[%c0_10, %c0_11] : memref<1x384xf32, #tpu.memory_space<vmem>>, vector<1x384xf32>
    %13 = vector.shape_cast %12 : vector<1x384xf32> to vector<1x384xf32>
    %14 = vector.broadcast %13 : vector<1x384xf32> to vector<8x384xf32>
    %c0_12 = arith.constant 0 : index
    %c0_13 = arith.constant 0 : index
    %c0_14 = arith.constant 0 : index
    %15 = vector.load %arg13[%c0_12, %c0_13, %c0_14] : memref<2x8x128xf32, #tpu.memory_space<vmem>>, vector<1x8x128xf32>
    %16 = vector.shape_cast %15 : vector<1x8x128xf32> to vector<8x128xf32>
    %c1 = arith.constant 1 : index
    %c0_15 = arith.constant 0 : index
    %c0_16 = arith.constant 0 : index
    %17 = vector.load %arg13[%c1, %c0_15, %c0_16] : memref<2x8x128xf32, #tpu.memory_space<vmem>>, vector<1x8x128xf32>
    %18 = vector.shape_cast %17 : vector<1x8x128xf32> to vector<8x128xf32>
    %c0_i32_17 = arith.constant 0 : i32
    %19 = arith.index_cast %c0_i32_17 : i32 to index
    %c0_18 = arith.constant 0 : index
    %c0_19 = arith.constant 0 : index
    %20 = vector.load %arg1[%19, %c0_18, %c0_19] : memref<8x8x384xf32, #tpu.memory_space<vmem>>, vector<1x8x384xf32>
    %21 = vector.shape_cast %20 : vector<1x8x384xf32> to vector<8x384xf32>
    %cst = arith.constant dense<0.000000e+00> : vector<8x384xf32>
    %22 = tpu.matmul %16, %3, %cst {dimension_numbers = #tpu.dot_dimension_numbers<[1], [0], [0], [1], [0, 0, 1, 1], [], []>} : vector<8x128xf32>, vector<128x384xf32>, vector<8x384xf32> -> vector<8x384xf32>
    %23 = arith.addf %22, %8 : vector<8x384xf32>
    %24 = vector.extract_strided_slice %21 {offsets = [0, 0], sizes = [8, 128], strides = [1, 1]} : vector<8x384xf32> to vector<8x128xf32>
    %25 = vector.extract_strided_slice %23 {offsets = [0, 0], sizes = [8, 128], strides = [1, 1]} : vector<8x384xf32> to vector<8x128xf32>
    %26 = arith.addf %24, %25 : vector<8x128xf32>
    %27 = arith.negf %26 : vector<8x128xf32>
    %28 = math.exp %27 : vector<8x128xf32>
    %cst_20 = arith.constant 1.000000e+00 : f32
    %29 = vector.broadcast %cst_20 : f32 to vector<8x128xf32>
    %30 = arith.addf %29, %28 : vector<8x128xf32>
    %31 = arith.divf %29, %30 : vector<8x128xf32>
    %32 = vector.extract_strided_slice %21 {offsets = [0, 128], sizes = [8, 128], strides = [1, 1]} : vector<8x384xf32> to vector<8x128xf32>
    %33 = vector.extract_strided_slice %23 {offsets = [0, 128], sizes = [8, 128], strides = [1, 1]} : vector<8x384xf32> to vector<8x128xf32>
    %34 = arith.addf %32, %33 : vector<8x128xf32>
    %35 = arith.negf %34 : vector<8x128xf32>
    %36 = math.exp %35 : vector<8x128xf32>
    %cst_21 = arith.constant 1.000000e+00 : f32
    %37 = vector.broadcast %cst_21 : f32 to vector<8x128xf32>
    %38 = arith.addf %37, %36 : vector<8x128xf32>
    %39 = arith.divf %37, %38 : vector<8x128xf32>
    %40 = vector.extract_strided_slice %21 {offsets = [0, 256], sizes = [8, 128], strides = [1, 1]} : vector<8x384xf32> to vector<8x128xf32>
    %41 = vector.extract_strided_slice %23 {offsets = [0, 256], sizes = [8, 128], strides = [1, 1]} : vector<8x384xf32> to vector<8x128xf32>
    %42 = arith.mulf %31, %41 : vector<8x128xf32>
    %43 = arith.addf %40, %42 : vector<8x128xf32>
    %44 = math.tanh %43 : vector<8x128xf32>
    %cst_22 = arith.constant 1.000000e+00 : f32
    %45 = vector.broadcast %cst_22 : f32 to vector<8x128xf32>
    %46 = arith.subf %45, %39 : vector<8x128xf32>
    %47 = arith.mulf %46, %44 : vector<8x128xf32>
    %48 = arith.mulf %39, %16 : vector<8x128xf32>
    %49 = arith.addf %47, %48 : vector<8x128xf32>
    %cst_23 = arith.constant dense<0.000000e+00> : vector<8x384xf32>
    %50 = tpu.matmul %49, %4, %cst_23 {dimension_numbers = #tpu.dot_dimension_numbers<[1], [0], [0], [1], [0, 0, 1, 1], [], []>} : vector<8x128xf32>, vector<128x384xf32>, vector<8x384xf32> -> vector<8x384xf32>
    %51 = arith.addf %50, %11 : vector<8x384xf32>
    %cst_24 = arith.constant dense<0.000000e+00> : vector<8x384xf32>
    %52 = tpu.matmul %18, %5, %cst_24 {dimension_numbers = #tpu.dot_dimension_numbers<[1], [0], [0], [1], [0, 0, 1, 1], [], []>} : vector<8x128xf32>, vector<128x384xf32>, vector<8x384xf32> -> vector<8x384xf32>
    %53 = arith.addf %52, %14 : vector<8x384xf32>
    %54 = vector.extract_strided_slice %51 {offsets = [0, 0], sizes = [8, 128], strides = [1, 1]} : vector<8x384xf32> to vector<8x128xf32>
    %55 = vector.extract_strided_slice %53 {offsets = [0, 0], sizes = [8, 128], strides = [1, 1]} : vector<8x384xf32> to vector<8x128xf32>
    %56 = arith.addf %54, %55 : vector<8x128xf32>
    %57 = arith.negf %56 : vector<8x128xf32>
    %58 = math.exp %57 : vector<8x128xf32>
    %cst_25 = arith.constant 1.000000e+00 : f32
    %59 = vector.broadcast %cst_25 : f32 to vector<8x128xf32>
    %60 = arith.addf %59, %58 : vector<8x128xf32>
    %61 = arith.divf %59, %60 : vector<8x128xf32>
    %62 = vector.extract_strided_slice %51 {offsets = [0, 128], sizes = [8, 128], strides = [1, 1]} : vector<8x384xf32> to vector<8x128xf32>
    %63 = vector.extract_strided_slice %53 {offsets = [0, 128], sizes = [8, 128], strides = [1, 1]} : vector<8x384xf32> to vector<8x128xf32>
    %64 = arith.addf %62, %63 : vector<8x128xf32>
    %65 = arith.negf %64 : vector<8x128xf32>
    %66 = math.exp %65 : vector<8x128xf32>
    %cst_26 = arith.constant 1.000000e+00 : f32
    %67 = vector.broadcast %cst_26 : f32 to vector<8x128xf32>
    %68 = arith.addf %67, %66 : vector<8x128xf32>
    %69 = arith.divf %67, %68 : vector<8x128xf32>
    %70 = vector.extract_strided_slice %51 {offsets = [0, 256], sizes = [8, 128], strides = [1, 1]} : vector<8x384xf32> to vector<8x128xf32>
    %71 = vector.extract_strided_slice %53 {offsets = [0, 256], sizes = [8, 128], strides = [1, 1]} : vector<8x384xf32> to vector<8x128xf32>
    %72 = arith.mulf %61, %71 : vector<8x128xf32>
    %73 = arith.addf %70, %72 : vector<8x128xf32>
    %74 = math.tanh %73 : vector<8x128xf32>
    %cst_27 = arith.constant 1.000000e+00 : f32
    %75 = vector.broadcast %cst_27 : f32 to vector<8x128xf32>
    %76 = arith.subf %75, %69 : vector<8x128xf32>
    %77 = arith.mulf %76, %74 : vector<8x128xf32>
    %78 = arith.mulf %69, %18 : vector<8x128xf32>
    %79 = arith.addf %77, %78 : vector<8x128xf32>
    %c1_i32 = arith.constant 1 : i32
    %80 = arith.index_cast %c1_i32 : i32 to index
    %c0_28 = arith.constant 0 : index
    %c0_29 = arith.constant 0 : index
    %81 = vector.load %arg1[%80, %c0_28, %c0_29] : memref<8x8x384xf32, #tpu.memory_space<vmem>>, vector<1x8x384xf32>
    %82 = vector.shape_cast %81 : vector<1x8x384xf32> to vector<8x384xf32>
    %cst_30 = arith.constant dense<0.000000e+00> : vector<8x384xf32>
    %83 = tpu.matmul %49, %3, %cst_30 {dimension_numbers = #tpu.dot_dimension_numbers<[1], [0], [0], [1], [0, 0, 1, 1], [], []>} : vector<8x128xf32>, vector<128x384xf32>, vector<8x384xf32> -> vector<8x384xf32>
    %84 = arith.addf %83, %8 : vector<8x384xf32>
    %85 = vector.extract_strided_slice %82 {offsets = [0, 0], sizes = [8, 128], strides = [1, 1]} : vector<8x384xf32> to vector<8x128xf32>
    %86 = vector.extract_strided_slice %84 {offsets = [0, 0], sizes = [8, 128], strides = [1, 1]} : vector<8x384xf32> to vector<8x128xf32>
    %87 = arith.addf %85, %86 : vector<8x128xf32>
    %88 = arith.negf %87 : vector<8x128xf32>
    %89 = math.exp %88 : vector<8x128xf32>
    %cst_31 = arith.constant 1.000000e+00 : f32
    %90 = vector.broadcast %cst_31 : f32 to vector<8x128xf32>
    %91 = arith.addf %90, %89 : vector<8x128xf32>
    %92 = arith.divf %90, %91 : vector<8x128xf32>
    %93 = vector.extract_strided_slice %82 {offsets = [0, 128], sizes = [8, 128], strides = [1, 1]} : vector<8x384xf32> to vector<8x128xf32>
    %94 = vector.extract_strided_slice %84 {offsets = [0, 128], sizes = [8, 128], strides = [1, 1]} : vector<8x384xf32> to vector<8x128xf32>
    %95 = arith.addf %93, %94 : vector<8x128xf32>
    %96 = arith.negf %95 : vector<8x128xf32>
    %97 = math.exp %96 : vector<8x128xf32>
    %cst_32 = arith.constant 1.000000e+00 : f32
    %98 = vector.broadcast %cst_32 : f32 to vector<8x128xf32>
    %99 = arith.addf %98, %97 : vector<8x128xf32>
    %100 = arith.divf %98, %99 : vector<8x128xf32>
    %101 = vector.extract_strided_slice %82 {offsets = [0, 256], sizes = [8, 128], strides = [1, 1]} : vector<8x384xf32> to vector<8x128xf32>
    %102 = vector.extract_strided_slice %84 {offsets = [0, 256], sizes = [8, 128], strides = [1, 1]} : vector<8x384xf32> to vector<8x128xf32>
    %103 = arith.mulf %92, %102 : vector<8x128xf32>
    %104 = arith.addf %101, %103 : vector<8x128xf32>
    %105 = math.tanh %104 : vector<8x128xf32>
    %cst_33 = arith.constant 1.000000e+00 : f32
    %106 = vector.broadcast %cst_33 : f32 to vector<8x128xf32>
    %107 = arith.subf %106, %100 : vector<8x128xf32>
    %108 = arith.mulf %107, %105 : vector<8x128xf32>
    %109 = arith.mulf %100, %49 : vector<8x128xf32>
    %110 = arith.addf %108, %109 : vector<8x128xf32>
    %cst_34 = arith.constant dense<0.000000e+00> : vector<8x384xf32>
    %111 = tpu.matmul %110, %4, %cst_34 {dimension_numbers = #tpu.dot_dimension_numbers<[1], [0], [0], [1], [0, 0, 1, 1], [], []>} : vector<8x128xf32>, vector<128x384xf32>, vector<8x384xf32> -> vector<8x384xf32>
    %112 = arith.addf %111, %11 : vector<8x384xf32>
    %cst_35 = arith.constant dense<0.000000e+00> : vector<8x384xf32>
    %113 = tpu.matmul %79, %5, %cst_35 {dimension_numbers = #tpu.dot_dimension_numbers<[1], [0], [0], [1], [0, 0, 1, 1], [], []>} : vector<8x128xf32>, vector<128x384xf32>, vector<8x384xf32> -> vector<8x384xf32>
    %114 = arith.addf %113, %14 : vector<8x384xf32>
    %115 = vector.extract_strided_slice %112 {offsets = [0, 0], sizes = [8, 128], strides = [1, 1]} : vector<8x384xf32> to vector<8x128xf32>
    %116 = vector.extract_strided_slice %114 {offsets = [0, 0], sizes = [8, 128], strides = [1, 1]} : vector<8x384xf32> to vector<8x128xf32>
    %117 = arith.addf %115, %116 : vector<8x128xf32>
    %118 = arith.negf %117 : vector<8x128xf32>
    %119 = math.exp %118 : vector<8x128xf32>
    %cst_36 = arith.constant 1.000000e+00 : f32
    %120 = vector.broadcast %cst_36 : f32 to vector<8x128xf32>
    %121 = arith.addf %120, %119 : vector<8x128xf32>
    %122 = arith.divf %120, %121 : vector<8x128xf32>
    %123 = vector.extract_strided_slice %112 {offsets = [0, 128], sizes = [8, 128], strides = [1, 1]} : vector<8x384xf32> to vector<8x128xf32>
    %124 = vector.extract_strided_slice %114 {offsets = [0, 128], sizes = [8, 128], strides = [1, 1]} : vector<8x384xf32> to vector<8x128xf32>
    %125 = arith.addf %123, %124 : vector<8x128xf32>
    %126 = arith.negf %125 : vector<8x128xf32>
    %127 = math.exp %126 : vector<8x128xf32>
    %cst_37 = arith.constant 1.000000e+00 : f32
    %128 = vector.broadcast %cst_37 : f32 to vector<8x128xf32>
    %129 = arith.addf %128, %127 : vector<8x128xf32>
    %130 = arith.divf %128, %129 : vector<8x128xf32>
    %131 = vector.extract_strided_slice %112 {offsets = [0, 256], sizes = [8, 128], strides = [1, 1]} : vector<8x384xf32> to vector<8x128xf32>
    %132 = vector.extract_strided_slice %114 {offsets = [0, 256], sizes = [8, 128], strides = [1, 1]} : vector<8x384xf32> to vector<8x128xf32>
    %133 = arith.mulf %122, %132 : vector<8x128xf32>
    %134 = arith.addf %131, %133 : vector<8x128xf32>
    %135 = math.tanh %134 : vector<8x128xf32>
    %cst_38 = arith.constant 1.000000e+00 : f32
    %136 = vector.broadcast %cst_38 : f32 to vector<8x128xf32>
    %137 = arith.subf %136, %130 : vector<8x128xf32>
    %138 = arith.mulf %137, %135 : vector<8x128xf32>
    %139 = arith.mulf %130, %79 : vector<8x128xf32>
    %140 = arith.addf %138, %139 : vector<8x128xf32>
    %c2_i32 = arith.constant 2 : i32
    %141 = arith.index_cast %c2_i32 : i32 to index
    %c0_39 = arith.constant 0 : index
    %c0_40 = arith.constant 0 : index
    %142 = vector.load %arg1[%141, %c0_39, %c0_40] : memref<8x8x384xf32, #tpu.memory_space<vmem>>, vector<1x8x384xf32>
    %143 = vector.shape_cast %142 : vector<1x8x384xf32> to vector<8x384xf32>
    %cst_41 = arith.constant dense<0.000000e+00> : vector<8x384xf32>
    %144 = tpu.matmul %110, %3, %cst_41 {dimension_numbers = #tpu.dot_dimension_numbers<[1], [0], [0], [1], [0, 0, 1, 1], [], []>} : vector<8x128xf32>, vector<128x384xf32>, vector<8x384xf32> -> vector<8x384xf32>
    %145 = arith.addf %144, %8 : vector<8x384xf32>
    %146 = vector.extract_strided_slice %143 {offsets = [0, 0], sizes = [8, 128], strides = [1, 1]} : vector<8x384xf32> to vector<8x128xf32>
    %147 = vector.extract_strided_slice %145 {offsets = [0, 0], sizes = [8, 128], strides = [1, 1]} : vector<8x384xf32> to vector<8x128xf32>
    %148 = arith.addf %146, %147 : vector<8x128xf32>
    %149 = arith.negf %148 : vector<8x128xf32>
    %150 = math.exp %149 : vector<8x128xf32>
    %cst_42 = arith.constant 1.000000e+00 : f32
    %151 = vector.broadcast %cst_42 : f32 to vector<8x128xf32>
    %152 = arith.addf %151, %150 : vector<8x128xf32>
    %153 = arith.divf %151, %152 : vector<8x128xf32>
    %154 = vector.extract_strided_slice %143 {offsets = [0, 128], sizes = [8, 128], strides = [1, 1]} : vector<8x384xf32> to vector<8x128xf32>
    %155 = vector.extract_strided_slice %145 {offsets = [0, 128], sizes = [8, 128], strides = [1, 1]} : vector<8x384xf32> to vector<8x128xf32>
    %156 = arith.addf %154, %155 : vector<8x128xf32>
    %157 = arith.negf %156 : vector<8x128xf32>
    %158 = math.exp %157 : vector<8x128xf32>
    %cst_43 = arith.constant 1.000000e+00 : f32
    %159 = vector.broadcast %cst_43 : f32 to vector<8x128xf32>
    %160 = arith.addf %159, %158 : vector<8x128xf32>
    %161 = arith.divf %159, %160 : vector<8x128xf32>
    %162 = vector.extract_strided_slice %143 {offsets = [0, 256], sizes = [8, 128], strides = [1, 1]} : vector<8x384xf32> to vector<8x128xf32>
    %163 = vector.extract_strided_slice %145 {offsets = [0, 256], sizes = [8, 128], strides = [1, 1]} : vector<8x384xf32> to vector<8x128xf32>
    %164 = arith.mulf %153, %163 : vector<8x128xf32>
    %165 = arith.addf %162, %164 : vector<8x128xf32>
    %166 = math.tanh %165 : vector<8x128xf32>
    %cst_44 = arith.constant 1.000000e+00 : f32
    %167 = vector.broadcast %cst_44 : f32 to vector<8x128xf32>
    %168 = arith.subf %167, %161 : vector<8x128xf32>
    %169 = arith.mulf %168, %166 : vector<8x128xf32>
    %170 = arith.mulf %161, %110 : vector<8x128xf32>
    %171 = arith.addf %169, %170 : vector<8x128xf32>
    %cst_45 = arith.constant dense<0.000000e+00> : vector<8x384xf32>
    %172 = tpu.matmul %171, %4, %cst_45 {dimension_numbers = #tpu.dot_dimension_numbers<[1], [0], [0], [1], [0, 0, 1, 1], [], []>} : vector<8x128xf32>, vector<128x384xf32>, vector<8x384xf32> -> vector<8x384xf32>
    %173 = arith.addf %172, %11 : vector<8x384xf32>
    %cst_46 = arith.constant dense<0.000000e+00> : vector<8x384xf32>
    %174 = tpu.matmul %140, %5, %cst_46 {dimension_numbers = #tpu.dot_dimension_numbers<[1], [0], [0], [1], [0, 0, 1, 1], [], []>} : vector<8x128xf32>, vector<128x384xf32>, vector<8x384xf32> -> vector<8x384xf32>
    %175 = arith.addf %174, %14 : vector<8x384xf32>
    %176 = vector.extract_strided_slice %173 {offsets = [0, 0], sizes = [8, 128], strides = [1, 1]} : vector<8x384xf32> to vector<8x128xf32>
    %177 = vector.extract_strided_slice %175 {offsets = [0, 0], sizes = [8, 128], strides = [1, 1]} : vector<8x384xf32> to vector<8x128xf32>
    %178 = arith.addf %176, %177 : vector<8x128xf32>
    %179 = arith.negf %178 : vector<8x128xf32>
    %180 = math.exp %179 : vector<8x128xf32>
    %cst_47 = arith.constant 1.000000e+00 : f32
    %181 = vector.broadcast %cst_47 : f32 to vector<8x128xf32>
    %182 = arith.addf %181, %180 : vector<8x128xf32>
    %183 = arith.divf %181, %182 : vector<8x128xf32>
    %184 = vector.extract_strided_slice %173 {offsets = [0, 128], sizes = [8, 128], strides = [1, 1]} : vector<8x384xf32> to vector<8x128xf32>
    %185 = vector.extract_strided_slice %175 {offsets = [0, 128], sizes = [8, 128], strides = [1, 1]} : vector<8x384xf32> to vector<8x128xf32>
    %186 = arith.addf %184, %185 : vector<8x128xf32>
    %187 = arith.negf %186 : vector<8x128xf32>
    %188 = math.exp %187 : vector<8x128xf32>
    %cst_48 = arith.constant 1.000000e+00 : f32
    %189 = vector.broadcast %cst_48 : f32 to vector<8x128xf32>
    %190 = arith.addf %189, %188 : vector<8x128xf32>
    %191 = arith.divf %189, %190 : vector<8x128xf32>
    %192 = vector.extract_strided_slice %173 {offsets = [0, 256], sizes = [8, 128], strides = [1, 1]} : vector<8x384xf32> to vector<8x128xf32>
    %193 = vector.extract_strided_slice %175 {offsets = [0, 256], sizes = [8, 128], strides = [1, 1]} : vector<8x384xf32> to vector<8x128xf32>
    %194 = arith.mulf %183, %193 : vector<8x128xf32>
    %195 = arith.addf %192, %194 : vector<8x128xf32>
    %196 = math.tanh %195 : vector<8x128xf32>
    %cst_49 = arith.constant 1.000000e+00 : f32
    %197 = vector.broadcast %cst_49 : f32 to vector<8x128xf32>
    %198 = arith.subf %197, %191 : vector<8x128xf32>
    %199 = arith.mulf %198, %196 : vector<8x128xf32>
    %200 = arith.mulf %191, %140 : vector<8x128xf32>
    %201 = arith.addf %199, %200 : vector<8x128xf32>
    %c3_i32 = arith.constant 3 : i32
    %202 = arith.index_cast %c3_i32 : i32 to index
    %c0_50 = arith.constant 0 : index
    %c0_51 = arith.constant 0 : index
    %203 = vector.load %arg1[%202, %c0_50, %c0_51] : memref<8x8x384xf32, #tpu.memory_space<vmem>>, vector<1x8x384xf32>
    %204 = vector.shape_cast %203 : vector<1x8x384xf32> to vector<8x384xf32>
    %cst_52 = arith.constant dense<0.000000e+00> : vector<8x384xf32>
    %205 = tpu.matmul %171, %3, %cst_52 {dimension_numbers = #tpu.dot_dimension_numbers<[1], [0], [0], [1], [0, 0, 1, 1], [], []>} : vector<8x128xf32>, vector<128x384xf32>, vector<8x384xf32> -> vector<8x384xf32>
    %206 = arith.addf %205, %8 : vector<8x384xf32>
    %207 = vector.extract_strided_slice %204 {offsets = [0, 0], sizes = [8, 128], strides = [1, 1]} : vector<8x384xf32> to vector<8x128xf32>
    %208 = vector.extract_strided_slice %206 {offsets = [0, 0], sizes = [8, 128], strides = [1, 1]} : vector<8x384xf32> to vector<8x128xf32>
    %209 = arith.addf %207, %208 : vector<8x128xf32>
    %210 = arith.negf %209 : vector<8x128xf32>
    %211 = math.exp %210 : vector<8x128xf32>
    %cst_53 = arith.constant 1.000000e+00 : f32
    %212 = vector.broadcast %cst_53 : f32 to vector<8x128xf32>
    %213 = arith.addf %212, %211 : vector<8x128xf32>
    %214 = arith.divf %212, %213 : vector<8x128xf32>
    %215 = vector.extract_strided_slice %204 {offsets = [0, 128], sizes = [8, 128], strides = [1, 1]} : vector<8x384xf32> to vector<8x128xf32>
    %216 = vector.extract_strided_slice %206 {offsets = [0, 128], sizes = [8, 128], strides = [1, 1]} : vector<8x384xf32> to vector<8x128xf32>
    %217 = arith.addf %215, %216 : vector<8x128xf32>
    %218 = arith.negf %217 : vector<8x128xf32>
    %219 = math.exp %218 : vector<8x128xf32>
    %cst_54 = arith.constant 1.000000e+00 : f32
    %220 = vector.broadcast %cst_54 : f32 to vector<8x128xf32>
    %221 = arith.addf %220, %219 : vector<8x128xf32>
    %222 = arith.divf %220, %221 : vector<8x128xf32>
    %223 = vector.extract_strided_slice %204 {offsets = [0, 256], sizes = [8, 128], strides = [1, 1]} : vector<8x384xf32> to vector<8x128xf32>
    %224 = vector.extract_strided_slice %206 {offsets = [0, 256], sizes = [8, 128], strides = [1, 1]} : vector<8x384xf32> to vector<8x128xf32>
    %225 = arith.mulf %214, %224 : vector<8x128xf32>
    %226 = arith.addf %223, %225 : vector<8x128xf32>
    %227 = math.tanh %226 : vector<8x128xf32>
    %cst_55 = arith.constant 1.000000e+00 : f32
    %228 = vector.broadcast %cst_55 : f32 to vector<8x128xf32>
    %229 = arith.subf %228, %222 : vector<8x128xf32>
    %230 = arith.mulf %229, %227 : vector<8x128xf32>
    %231 = arith.mulf %222, %171 : vector<8x128xf32>
    %232 = arith.addf %230, %231 : vector<8x128xf32>
    %cst_56 = arith.constant dense<0.000000e+00> : vector<8x384xf32>
    %233 = tpu.matmul %232, %4, %cst_56 {dimension_numbers = #tpu.dot_dimension_numbers<[1], [0], [0], [1], [0, 0, 1, 1], [], []>} : vector<8x128xf32>, vector<128x384xf32>, vector<8x384xf32> -> vector<8x384xf32>
    %234 = arith.addf %233, %11 : vector<8x384xf32>
    %cst_57 = arith.constant dense<0.000000e+00> : vector<8x384xf32>
    %235 = tpu.matmul %201, %5, %cst_57 {dimension_numbers = #tpu.dot_dimension_numbers<[1], [0], [0], [1], [0, 0, 1, 1], [], []>} : vector<8x128xf32>, vector<128x384xf32>, vector<8x384xf32> -> vector<8x384xf32>
    %236 = arith.addf %235, %14 : vector<8x384xf32>
    %237 = vector.extract_strided_slice %234 {offsets = [0, 0], sizes = [8, 128], strides = [1, 1]} : vector<8x384xf32> to vector<8x128xf32>
    %238 = vector.extract_strided_slice %236 {offsets = [0, 0], sizes = [8, 128], strides = [1, 1]} : vector<8x384xf32> to vector<8x128xf32>
    %239 = arith.addf %237, %238 : vector<8x128xf32>
    %240 = arith.negf %239 : vector<8x128xf32>
    %241 = math.exp %240 : vector<8x128xf32>
    %cst_58 = arith.constant 1.000000e+00 : f32
    %242 = vector.broadcast %cst_58 : f32 to vector<8x128xf32>
    %243 = arith.addf %242, %241 : vector<8x128xf32>
    %244 = arith.divf %242, %243 : vector<8x128xf32>
    %245 = vector.extract_strided_slice %234 {offsets = [0, 128], sizes = [8, 128], strides = [1, 1]} : vector<8x384xf32> to vector<8x128xf32>
    %246 = vector.extract_strided_slice %236 {offsets = [0, 128], sizes = [8, 128], strides = [1, 1]} : vector<8x384xf32> to vector<8x128xf32>
    %247 = arith.addf %245, %246 : vector<8x128xf32>
    %248 = arith.negf %247 : vector<8x128xf32>
    %249 = math.exp %248 : vector<8x128xf32>
    %cst_59 = arith.constant 1.000000e+00 : f32
    %250 = vector.broadcast %cst_59 : f32 to vector<8x128xf32>
    %251 = arith.addf %250, %249 : vector<8x128xf32>
    %252 = arith.divf %250, %251 : vector<8x128xf32>
    %253 = vector.extract_strided_slice %234 {offsets = [0, 256], sizes = [8, 128], strides = [1, 1]} : vector<8x384xf32> to vector<8x128xf32>
    %254 = vector.extract_strided_slice %236 {offsets = [0, 256], sizes = [8, 128], strides = [1, 1]} : vector<8x384xf32> to vector<8x128xf32>
    %255 = arith.mulf %244, %254 : vector<8x128xf32>
    %256 = arith.addf %253, %255 : vector<8x128xf32>
    %257 = math.tanh %256 : vector<8x128xf32>
    %cst_60 = arith.constant 1.000000e+00 : f32
    %258 = vector.broadcast %cst_60 : f32 to vector<8x128xf32>
    %259 = arith.subf %258, %252 : vector<8x128xf32>
    %260 = arith.mulf %259, %257 : vector<8x128xf32>
    %261 = arith.mulf %252, %201 : vector<8x128xf32>
    %262 = arith.addf %260, %261 : vector<8x128xf32>
    %c4_i32 = arith.constant 4 : i32
    %263 = arith.index_cast %c4_i32 : i32 to index
    %c0_61 = arith.constant 0 : index
    %c0_62 = arith.constant 0 : index
    %264 = vector.load %arg1[%263, %c0_61, %c0_62] : memref<8x8x384xf32, #tpu.memory_space<vmem>>, vector<1x8x384xf32>
    %265 = vector.shape_cast %264 : vector<1x8x384xf32> to vector<8x384xf32>
    %cst_63 = arith.constant dense<0.000000e+00> : vector<8x384xf32>
    %266 = tpu.matmul %232, %3, %cst_63 {dimension_numbers = #tpu.dot_dimension_numbers<[1], [0], [0], [1], [0, 0, 1, 1], [], []>} : vector<8x128xf32>, vector<128x384xf32>, vector<8x384xf32> -> vector<8x384xf32>
    %267 = arith.addf %266, %8 : vector<8x384xf32>
    %268 = vector.extract_strided_slice %265 {offsets = [0, 0], sizes = [8, 128], strides = [1, 1]} : vector<8x384xf32> to vector<8x128xf32>
    %269 = vector.extract_strided_slice %267 {offsets = [0, 0], sizes = [8, 128], strides = [1, 1]} : vector<8x384xf32> to vector<8x128xf32>
    %270 = arith.addf %268, %269 : vector<8x128xf32>
    %271 = arith.negf %270 : vector<8x128xf32>
    %272 = math.exp %271 : vector<8x128xf32>
    %cst_64 = arith.constant 1.000000e+00 : f32
    %273 = vector.broadcast %cst_64 : f32 to vector<8x128xf32>
    %274 = arith.addf %273, %272 : vector<8x128xf32>
    %275 = arith.divf %273, %274 : vector<8x128xf32>
    %276 = vector.extract_strided_slice %265 {offsets = [0, 128], sizes = [8, 128], strides = [1, 1]} : vector<8x384xf32> to vector<8x128xf32>
    %277 = vector.extract_strided_slice %267 {offsets = [0, 128], sizes = [8, 128], strides = [1, 1]} : vector<8x384xf32> to vector<8x128xf32>
    %278 = arith.addf %276, %277 : vector<8x128xf32>
    %279 = arith.negf %278 : vector<8x128xf32>
    %280 = math.exp %279 : vector<8x128xf32>
    %cst_65 = arith.constant 1.000000e+00 : f32
    %281 = vector.broadcast %cst_65 : f32 to vector<8x128xf32>
    %282 = arith.addf %281, %280 : vector<8x128xf32>
    %283 = arith.divf %281, %282 : vector<8x128xf32>
    %284 = vector.extract_strided_slice %265 {offsets = [0, 256], sizes = [8, 128], strides = [1, 1]} : vector<8x384xf32> to vector<8x128xf32>
    %285 = vector.extract_strided_slice %267 {offsets = [0, 256], sizes = [8, 128], strides = [1, 1]} : vector<8x384xf32> to vector<8x128xf32>
    %286 = arith.mulf %275, %285 : vector<8x128xf32>
    %287 = arith.addf %284, %286 : vector<8x128xf32>
    %288 = math.tanh %287 : vector<8x128xf32>
    %cst_66 = arith.constant 1.000000e+00 : f32
    %289 = vector.broadcast %cst_66 : f32 to vector<8x128xf32>
    %290 = arith.subf %289, %283 : vector<8x128xf32>
    %291 = arith.mulf %290, %288 : vector<8x128xf32>
    %292 = arith.mulf %283, %232 : vector<8x128xf32>
    %293 = arith.addf %291, %292 : vector<8x128xf32>
    %cst_67 = arith.constant dense<0.000000e+00> : vector<8x384xf32>
    %294 = tpu.matmul %293, %4, %cst_67 {dimension_numbers = #tpu.dot_dimension_numbers<[1], [0], [0], [1], [0, 0, 1, 1], [], []>} : vector<8x128xf32>, vector<128x384xf32>, vector<8x384xf32> -> vector<8x384xf32>
    %295 = arith.addf %294, %11 : vector<8x384xf32>
    %cst_68 = arith.constant dense<0.000000e+00> : vector<8x384xf32>
    %296 = tpu.matmul %262, %5, %cst_68 {dimension_numbers = #tpu.dot_dimension_numbers<[1], [0], [0], [1], [0, 0, 1, 1], [], []>} : vector<8x128xf32>, vector<128x384xf32>, vector<8x384xf32> -> vector<8x384xf32>
    %297 = arith.addf %296, %14 : vector<8x384xf32>
    %298 = vector.extract_strided_slice %295 {offsets = [0, 0], sizes = [8, 128], strides = [1, 1]} : vector<8x384xf32> to vector<8x128xf32>
    %299 = vector.extract_strided_slice %297 {offsets = [0, 0], sizes = [8, 128], strides = [1, 1]} : vector<8x384xf32> to vector<8x128xf32>
    %300 = arith.addf %298, %299 : vector<8x128xf32>
    %301 = arith.negf %300 : vector<8x128xf32>
    %302 = math.exp %301 : vector<8x128xf32>
    %cst_69 = arith.constant 1.000000e+00 : f32
    %303 = vector.broadcast %cst_69 : f32 to vector<8x128xf32>
    %304 = arith.addf %303, %302 : vector<8x128xf32>
    %305 = arith.divf %303, %304 : vector<8x128xf32>
    %306 = vector.extract_strided_slice %295 {offsets = [0, 128], sizes = [8, 128], strides = [1, 1]} : vector<8x384xf32> to vector<8x128xf32>
    %307 = vector.extract_strided_slice %297 {offsets = [0, 128], sizes = [8, 128], strides = [1, 1]} : vector<8x384xf32> to vector<8x128xf32>
    %308 = arith.addf %306, %307 : vector<8x128xf32>
    %309 = arith.negf %308 : vector<8x128xf32>
    %310 = math.exp %309 : vector<8x128xf32>
    %cst_70 = arith.constant 1.000000e+00 : f32
    %311 = vector.broadcast %cst_70 : f32 to vector<8x128xf32>
    %312 = arith.addf %311, %310 : vector<8x128xf32>
    %313 = arith.divf %311, %312 : vector<8x128xf32>
    %314 = vector.extract_strided_slice %295 {offsets = [0, 256], sizes = [8, 128], strides = [1, 1]} : vector<8x384xf32> to vector<8x128xf32>
    %315 = vector.extract_strided_slice %297 {offsets = [0, 256], sizes = [8, 128], strides = [1, 1]} : vector<8x384xf32> to vector<8x128xf32>
    %316 = arith.mulf %305, %315 : vector<8x128xf32>
    %317 = arith.addf %314, %316 : vector<8x128xf32>
    %318 = math.tanh %317 : vector<8x128xf32>
    %cst_71 = arith.constant 1.000000e+00 : f32
    %319 = vector.broadcast %cst_71 : f32 to vector<8x128xf32>
    %320 = arith.subf %319, %313 : vector<8x128xf32>
    %321 = arith.mulf %320, %318 : vector<8x128xf32>
    %322 = arith.mulf %313, %262 : vector<8x128xf32>
    %323 = arith.addf %321, %322 : vector<8x128xf32>
    %c5_i32 = arith.constant 5 : i32
    %324 = arith.index_cast %c5_i32 : i32 to index
    %c0_72 = arith.constant 0 : index
    %c0_73 = arith.constant 0 : index
    %325 = vector.load %arg1[%324, %c0_72, %c0_73] : memref<8x8x384xf32, #tpu.memory_space<vmem>>, vector<1x8x384xf32>
    %326 = vector.shape_cast %325 : vector<1x8x384xf32> to vector<8x384xf32>
    %cst_74 = arith.constant dense<0.000000e+00> : vector<8x384xf32>
    %327 = tpu.matmul %293, %3, %cst_74 {dimension_numbers = #tpu.dot_dimension_numbers<[1], [0], [0], [1], [0, 0, 1, 1], [], []>} : vector<8x128xf32>, vector<128x384xf32>, vector<8x384xf32> -> vector<8x384xf32>
    %328 = arith.addf %327, %8 : vector<8x384xf32>
    %329 = vector.extract_strided_slice %326 {offsets = [0, 0], sizes = [8, 128], strides = [1, 1]} : vector<8x384xf32> to vector<8x128xf32>
    %330 = vector.extract_strided_slice %328 {offsets = [0, 0], sizes = [8, 128], strides = [1, 1]} : vector<8x384xf32> to vector<8x128xf32>
    %331 = arith.addf %329, %330 : vector<8x128xf32>
    %332 = arith.negf %331 : vector<8x128xf32>
    %333 = math.exp %332 : vector<8x128xf32>
    %cst_75 = arith.constant 1.000000e+00 : f32
    %334 = vector.broadcast %cst_75 : f32 to vector<8x128xf32>
    %335 = arith.addf %334, %333 : vector<8x128xf32>
    %336 = arith.divf %334, %335 : vector<8x128xf32>
    %337 = vector.extract_strided_slice %326 {offsets = [0, 128], sizes = [8, 128], strides = [1, 1]} : vector<8x384xf32> to vector<8x128xf32>
    %338 = vector.extract_strided_slice %328 {offsets = [0, 128], sizes = [8, 128], strides = [1, 1]} : vector<8x384xf32> to vector<8x128xf32>
    %339 = arith.addf %337, %338 : vector<8x128xf32>
    %340 = arith.negf %339 : vector<8x128xf32>
    %341 = math.exp %340 : vector<8x128xf32>
    %cst_76 = arith.constant 1.000000e+00 : f32
    %342 = vector.broadcast %cst_76 : f32 to vector<8x128xf32>
    %343 = arith.addf %342, %341 : vector<8x128xf32>
    %344 = arith.divf %342, %343 : vector<8x128xf32>
    %345 = vector.extract_strided_slice %326 {offsets = [0, 256], sizes = [8, 128], strides = [1, 1]} : vector<8x384xf32> to vector<8x128xf32>
    %346 = vector.extract_strided_slice %328 {offsets = [0, 256], sizes = [8, 128], strides = [1, 1]} : vector<8x384xf32> to vector<8x128xf32>
    %347 = arith.mulf %336, %346 : vector<8x128xf32>
    %348 = arith.addf %345, %347 : vector<8x128xf32>
    %349 = math.tanh %348 : vector<8x128xf32>
    %cst_77 = arith.constant 1.000000e+00 : f32
    %350 = vector.broadcast %cst_77 : f32 to vector<8x128xf32>
    %351 = arith.subf %350, %344 : vector<8x128xf32>
    %352 = arith.mulf %351, %349 : vector<8x128xf32>
    %353 = arith.mulf %344, %293 : vector<8x128xf32>
    %354 = arith.addf %352, %353 : vector<8x128xf32>
    %cst_78 = arith.constant dense<0.000000e+00> : vector<8x384xf32>
    %355 = tpu.matmul %354, %4, %cst_78 {dimension_numbers = #tpu.dot_dimension_numbers<[1], [0], [0], [1], [0, 0, 1, 1], [], []>} : vector<8x128xf32>, vector<128x384xf32>, vector<8x384xf32> -> vector<8x384xf32>
    %356 = arith.addf %355, %11 : vector<8x384xf32>
    %cst_79 = arith.constant dense<0.000000e+00> : vector<8x384xf32>
    %357 = tpu.matmul %323, %5, %cst_79 {dimension_numbers = #tpu.dot_dimension_numbers<[1], [0], [0], [1], [0, 0, 1, 1], [], []>} : vector<8x128xf32>, vector<128x384xf32>, vector<8x384xf32> -> vector<8x384xf32>
    %358 = arith.addf %357, %14 : vector<8x384xf32>
    %359 = vector.extract_strided_slice %356 {offsets = [0, 0], sizes = [8, 128], strides = [1, 1]} : vector<8x384xf32> to vector<8x128xf32>
    %360 = vector.extract_strided_slice %358 {offsets = [0, 0], sizes = [8, 128], strides = [1, 1]} : vector<8x384xf32> to vector<8x128xf32>
    %361 = arith.addf %359, %360 : vector<8x128xf32>
    %362 = arith.negf %361 : vector<8x128xf32>
    %363 = math.exp %362 : vector<8x128xf32>
    %cst_80 = arith.constant 1.000000e+00 : f32
    %364 = vector.broadcast %cst_80 : f32 to vector<8x128xf32>
    %365 = arith.addf %364, %363 : vector<8x128xf32>
    %366 = arith.divf %364, %365 : vector<8x128xf32>
    %367 = vector.extract_strided_slice %356 {offsets = [0, 128], sizes = [8, 128], strides = [1, 1]} : vector<8x384xf32> to vector<8x128xf32>
    %368 = vector.extract_strided_slice %358 {offsets = [0, 128], sizes = [8, 128], strides = [1, 1]} : vector<8x384xf32> to vector<8x128xf32>
    %369 = arith.addf %367, %368 : vector<8x128xf32>
    %370 = arith.negf %369 : vector<8x128xf32>
    %371 = math.exp %370 : vector<8x128xf32>
    %cst_81 = arith.constant 1.000000e+00 : f32
    %372 = vector.broadcast %cst_81 : f32 to vector<8x128xf32>
    %373 = arith.addf %372, %371 : vector<8x128xf32>
    %374 = arith.divf %372, %373 : vector<8x128xf32>
    %375 = vector.extract_strided_slice %356 {offsets = [0, 256], sizes = [8, 128], strides = [1, 1]} : vector<8x384xf32> to vector<8x128xf32>
    %376 = vector.extract_strided_slice %358 {offsets = [0, 256], sizes = [8, 128], strides = [1, 1]} : vector<8x384xf32> to vector<8x128xf32>
    %377 = arith.mulf %366, %376 : vector<8x128xf32>
    %378 = arith.addf %375, %377 : vector<8x128xf32>
    %379 = math.tanh %378 : vector<8x128xf32>
    %cst_82 = arith.constant 1.000000e+00 : f32
    %380 = vector.broadcast %cst_82 : f32 to vector<8x128xf32>
    %381 = arith.subf %380, %374 : vector<8x128xf32>
    %382 = arith.mulf %381, %379 : vector<8x128xf32>
    %383 = arith.mulf %374, %323 : vector<8x128xf32>
    %384 = arith.addf %382, %383 : vector<8x128xf32>
    %c6_i32 = arith.constant 6 : i32
    %385 = arith.index_cast %c6_i32 : i32 to index
    %c0_83 = arith.constant 0 : index
    %c0_84 = arith.constant 0 : index
    %386 = vector.load %arg1[%385, %c0_83, %c0_84] : memref<8x8x384xf32, #tpu.memory_space<vmem>>, vector<1x8x384xf32>
    %387 = vector.shape_cast %386 : vector<1x8x384xf32> to vector<8x384xf32>
    %cst_85 = arith.constant dense<0.000000e+00> : vector<8x384xf32>
    %388 = tpu.matmul %354, %3, %cst_85 {dimension_numbers = #tpu.dot_dimension_numbers<[1], [0], [0], [1], [0, 0, 1, 1], [], []>} : vector<8x128xf32>, vector<128x384xf32>, vector<8x384xf32> -> vector<8x384xf32>
    %389 = arith.addf %388, %8 : vector<8x384xf32>
    %390 = vector.extract_strided_slice %387 {offsets = [0, 0], sizes = [8, 128], strides = [1, 1]} : vector<8x384xf32> to vector<8x128xf32>
    %391 = vector.extract_strided_slice %389 {offsets = [0, 0], sizes = [8, 128], strides = [1, 1]} : vector<8x384xf32> to vector<8x128xf32>
    %392 = arith.addf %390, %391 : vector<8x128xf32>
    %393 = arith.negf %392 : vector<8x128xf32>
    %394 = math.exp %393 : vector<8x128xf32>
    %cst_86 = arith.constant 1.000000e+00 : f32
    %395 = vector.broadcast %cst_86 : f32 to vector<8x128xf32>
    %396 = arith.addf %395, %394 : vector<8x128xf32>
    %397 = arith.divf %395, %396 : vector<8x128xf32>
    %398 = vector.extract_strided_slice %387 {offsets = [0, 128], sizes = [8, 128], strides = [1, 1]} : vector<8x384xf32> to vector<8x128xf32>
    %399 = vector.extract_strided_slice %389 {offsets = [0, 128], sizes = [8, 128], strides = [1, 1]} : vector<8x384xf32> to vector<8x128xf32>
    %400 = arith.addf %398, %399 : vector<8x128xf32>
    %401 = arith.negf %400 : vector<8x128xf32>
    %402 = math.exp %401 : vector<8x128xf32>
    %cst_87 = arith.constant 1.000000e+00 : f32
    %403 = vector.broadcast %cst_87 : f32 to vector<8x128xf32>
    %404 = arith.addf %403, %402 : vector<8x128xf32>
    %405 = arith.divf %403, %404 : vector<8x128xf32>
    %406 = vector.extract_strided_slice %387 {offsets = [0, 256], sizes = [8, 128], strides = [1, 1]} : vector<8x384xf32> to vector<8x128xf32>
    %407 = vector.extract_strided_slice %389 {offsets = [0, 256], sizes = [8, 128], strides = [1, 1]} : vector<8x384xf32> to vector<8x128xf32>
    %408 = arith.mulf %397, %407 : vector<8x128xf32>
    %409 = arith.addf %406, %408 : vector<8x128xf32>
    %410 = math.tanh %409 : vector<8x128xf32>
    %cst_88 = arith.constant 1.000000e+00 : f32
    %411 = vector.broadcast %cst_88 : f32 to vector<8x128xf32>
    %412 = arith.subf %411, %405 : vector<8x128xf32>
    %413 = arith.mulf %412, %410 : vector<8x128xf32>
    %414 = arith.mulf %405, %354 : vector<8x128xf32>
    %415 = arith.addf %413, %414 : vector<8x128xf32>
    %cst_89 = arith.constant dense<0.000000e+00> : vector<8x384xf32>
    %416 = tpu.matmul %415, %4, %cst_89 {dimension_numbers = #tpu.dot_dimension_numbers<[1], [0], [0], [1], [0, 0, 1, 1], [], []>} : vector<8x128xf32>, vector<128x384xf32>, vector<8x384xf32> -> vector<8x384xf32>
    %417 = arith.addf %416, %11 : vector<8x384xf32>
    %cst_90 = arith.constant dense<0.000000e+00> : vector<8x384xf32>
    %418 = tpu.matmul %384, %5, %cst_90 {dimension_numbers = #tpu.dot_dimension_numbers<[1], [0], [0], [1], [0, 0, 1, 1], [], []>} : vector<8x128xf32>, vector<128x384xf32>, vector<8x384xf32> -> vector<8x384xf32>
    %419 = arith.addf %418, %14 : vector<8x384xf32>
    %420 = vector.extract_strided_slice %417 {offsets = [0, 0], sizes = [8, 128], strides = [1, 1]} : vector<8x384xf32> to vector<8x128xf32>
    %421 = vector.extract_strided_slice %419 {offsets = [0, 0], sizes = [8, 128], strides = [1, 1]} : vector<8x384xf32> to vector<8x128xf32>
    %422 = arith.addf %420, %421 : vector<8x128xf32>
    %423 = arith.negf %422 : vector<8x128xf32>
    %424 = math.exp %423 : vector<8x128xf32>
    %cst_91 = arith.constant 1.000000e+00 : f32
    %425 = vector.broadcast %cst_91 : f32 to vector<8x128xf32>
    %426 = arith.addf %425, %424 : vector<8x128xf32>
    %427 = arith.divf %425, %426 : vector<8x128xf32>
    %428 = vector.extract_strided_slice %417 {offsets = [0, 128], sizes = [8, 128], strides = [1, 1]} : vector<8x384xf32> to vector<8x128xf32>
    %429 = vector.extract_strided_slice %419 {offsets = [0, 128], sizes = [8, 128], strides = [1, 1]} : vector<8x384xf32> to vector<8x128xf32>
    %430 = arith.addf %428, %429 : vector<8x128xf32>
    %431 = arith.negf %430 : vector<8x128xf32>
    %432 = math.exp %431 : vector<8x128xf32>
    %cst_92 = arith.constant 1.000000e+00 : f32
    %433 = vector.broadcast %cst_92 : f32 to vector<8x128xf32>
    %434 = arith.addf %433, %432 : vector<8x128xf32>
    %435 = arith.divf %433, %434 : vector<8x128xf32>
    %436 = vector.extract_strided_slice %417 {offsets = [0, 256], sizes = [8, 128], strides = [1, 1]} : vector<8x384xf32> to vector<8x128xf32>
    %437 = vector.extract_strided_slice %419 {offsets = [0, 256], sizes = [8, 128], strides = [1, 1]} : vector<8x384xf32> to vector<8x128xf32>
    %438 = arith.mulf %427, %437 : vector<8x128xf32>
    %439 = arith.addf %436, %438 : vector<8x128xf32>
    %440 = math.tanh %439 : vector<8x128xf32>
    %cst_93 = arith.constant 1.000000e+00 : f32
    %441 = vector.broadcast %cst_93 : f32 to vector<8x128xf32>
    %442 = arith.subf %441, %435 : vector<8x128xf32>
    %443 = arith.mulf %442, %440 : vector<8x128xf32>
    %444 = arith.mulf %435, %384 : vector<8x128xf32>
    %445 = arith.addf %443, %444 : vector<8x128xf32>
    %c7_i32 = arith.constant 7 : i32
    %446 = arith.index_cast %c7_i32 : i32 to index
    %c0_94 = arith.constant 0 : index
    %c0_95 = arith.constant 0 : index
    %447 = vector.load %arg1[%446, %c0_94, %c0_95] : memref<8x8x384xf32, #tpu.memory_space<vmem>>, vector<1x8x384xf32>
    %448 = vector.shape_cast %447 : vector<1x8x384xf32> to vector<8x384xf32>
    %cst_96 = arith.constant dense<0.000000e+00> : vector<8x384xf32>
    %449 = tpu.matmul %415, %3, %cst_96 {dimension_numbers = #tpu.dot_dimension_numbers<[1], [0], [0], [1], [0, 0, 1, 1], [], []>} : vector<8x128xf32>, vector<128x384xf32>, vector<8x384xf32> -> vector<8x384xf32>
    %450 = arith.addf %449, %8 : vector<8x384xf32>
    %451 = vector.extract_strided_slice %448 {offsets = [0, 0], sizes = [8, 128], strides = [1, 1]} : vector<8x384xf32> to vector<8x128xf32>
    %452 = vector.extract_strided_slice %450 {offsets = [0, 0], sizes = [8, 128], strides = [1, 1]} : vector<8x384xf32> to vector<8x128xf32>
    %453 = arith.addf %451, %452 : vector<8x128xf32>
    %454 = arith.negf %453 : vector<8x128xf32>
    %455 = math.exp %454 : vector<8x128xf32>
    %cst_97 = arith.constant 1.000000e+00 : f32
    %456 = vector.broadcast %cst_97 : f32 to vector<8x128xf32>
    %457 = arith.addf %456, %455 : vector<8x128xf32>
    %458 = arith.divf %456, %457 : vector<8x128xf32>
    %459 = vector.extract_strided_slice %448 {offsets = [0, 128], sizes = [8, 128], strides = [1, 1]} : vector<8x384xf32> to vector<8x128xf32>
    %460 = vector.extract_strided_slice %450 {offsets = [0, 128], sizes = [8, 128], strides = [1, 1]} : vector<8x384xf32> to vector<8x128xf32>
    %461 = arith.addf %459, %460 : vector<8x128xf32>
    %462 = arith.negf %461 : vector<8x128xf32>
    %463 = math.exp %462 : vector<8x128xf32>
    %cst_98 = arith.constant 1.000000e+00 : f32
    %464 = vector.broadcast %cst_98 : f32 to vector<8x128xf32>
    %465 = arith.addf %464, %463 : vector<8x128xf32>
    %466 = arith.divf %464, %465 : vector<8x128xf32>
    %467 = vector.extract_strided_slice %448 {offsets = [0, 256], sizes = [8, 128], strides = [1, 1]} : vector<8x384xf32> to vector<8x128xf32>
    %468 = vector.extract_strided_slice %450 {offsets = [0, 256], sizes = [8, 128], strides = [1, 1]} : vector<8x384xf32> to vector<8x128xf32>
    %469 = arith.mulf %458, %468 : vector<8x128xf32>
    %470 = arith.addf %467, %469 : vector<8x128xf32>
    %471 = math.tanh %470 : vector<8x128xf32>
    %cst_99 = arith.constant 1.000000e+00 : f32
    %472 = vector.broadcast %cst_99 : f32 to vector<8x128xf32>
    %473 = arith.subf %472, %466 : vector<8x128xf32>
    %474 = arith.mulf %473, %471 : vector<8x128xf32>
    %475 = arith.mulf %466, %415 : vector<8x128xf32>
    %476 = arith.addf %474, %475 : vector<8x128xf32>
    %cst_100 = arith.constant dense<0.000000e+00> : vector<8x384xf32>
    %477 = tpu.matmul %476, %4, %cst_100 {dimension_numbers = #tpu.dot_dimension_numbers<[1], [0], [0], [1], [0, 0, 1, 1], [], []>} : vector<8x128xf32>, vector<128x384xf32>, vector<8x384xf32> -> vector<8x384xf32>
    %478 = arith.addf %477, %11 : vector<8x384xf32>
    %cst_101 = arith.constant dense<0.000000e+00> : vector<8x384xf32>
    %479 = tpu.matmul %445, %5, %cst_101 {dimension_numbers = #tpu.dot_dimension_numbers<[1], [0], [0], [1], [0, 0, 1, 1], [], []>} : vector<8x128xf32>, vector<128x384xf32>, vector<8x384xf32> -> vector<8x384xf32>
    %480 = arith.addf %479, %14 : vector<8x384xf32>
    %481 = vector.extract_strided_slice %478 {offsets = [0, 0], sizes = [8, 128], strides = [1, 1]} : vector<8x384xf32> to vector<8x128xf32>
    %482 = vector.extract_strided_slice %480 {offsets = [0, 0], sizes = [8, 128], strides = [1, 1]} : vector<8x384xf32> to vector<8x128xf32>
    %483 = arith.addf %481, %482 : vector<8x128xf32>
    %484 = arith.negf %483 : vector<8x128xf32>
    %485 = math.exp %484 : vector<8x128xf32>
    %cst_102 = arith.constant 1.000000e+00 : f32
    %486 = vector.broadcast %cst_102 : f32 to vector<8x128xf32>
    %487 = arith.addf %486, %485 : vector<8x128xf32>
    %488 = arith.divf %486, %487 : vector<8x128xf32>
    %489 = vector.extract_strided_slice %478 {offsets = [0, 128], sizes = [8, 128], strides = [1, 1]} : vector<8x384xf32> to vector<8x128xf32>
    %490 = vector.extract_strided_slice %480 {offsets = [0, 128], sizes = [8, 128], strides = [1, 1]} : vector<8x384xf32> to vector<8x128xf32>
    %491 = arith.addf %489, %490 : vector<8x128xf32>
    %492 = arith.negf %491 : vector<8x128xf32>
    %493 = math.exp %492 : vector<8x128xf32>
    %cst_103 = arith.constant 1.000000e+00 : f32
    %494 = vector.broadcast %cst_103 : f32 to vector<8x128xf32>
    %495 = arith.addf %494, %493 : vector<8x128xf32>
    %496 = arith.divf %494, %495 : vector<8x128xf32>
    %497 = vector.extract_strided_slice %478 {offsets = [0, 256], sizes = [8, 128], strides = [1, 1]} : vector<8x384xf32> to vector<8x128xf32>
    %498 = vector.extract_strided_slice %480 {offsets = [0, 256], sizes = [8, 128], strides = [1, 1]} : vector<8x384xf32> to vector<8x128xf32>
    %499 = arith.mulf %488, %498 : vector<8x128xf32>
    %500 = arith.addf %497, %499 : vector<8x128xf32>
    %501 = math.tanh %500 : vector<8x128xf32>
    %cst_104 = arith.constant 1.000000e+00 : f32
    %502 = vector.broadcast %cst_104 : f32 to vector<8x128xf32>
    %503 = arith.subf %502, %496 : vector<8x128xf32>
    %504 = arith.mulf %503, %501 : vector<8x128xf32>
    %505 = arith.mulf %496, %445 : vector<8x128xf32>
    %506 = arith.addf %504, %505 : vector<8x128xf32>
    %c8_i32 = arith.constant 8 : i32
    %c0_105 = arith.constant 0 : index
    %c0_106 = arith.constant 0 : index
    %c0_107 = arith.constant 0 : index
    %507 = vector.load %arg13[%c0_105, %c0_106, %c0_107] : memref<2x8x128xf32, #tpu.memory_space<vmem>>, vector<1x8x128xf32>
    %508 = vector.shape_cast %507 : vector<1x8x128xf32> to vector<8x128xf32>
    %509 = vector.shape_cast %476 : vector<8x128xf32> to vector<1x8x128xf32>
    tpu.vector_store %arg13[%c0_105, %c0_106, %c0_107], %509 {strides = array<i32>} : memref<2x8x128xf32, #tpu.memory_space<vmem>>, vector<1x8x128xf32>,
    %c1_108 = arith.constant 1 : index
    %c0_109 = arith.constant 0 : index
    %c0_110 = arith.constant 0 : index
    %510 = vector.load %arg13[%c1_108, %c0_109, %c0_110] : memref<2x8x128xf32, #tpu.memory_space<vmem>>, vector<1x8x128xf32>
    %511 = vector.shape_cast %510 : vector<1x8x128xf32> to vector<8x128xf32>
    %512 = vector.shape_cast %506 : vector<8x128xf32> to vector<1x8x128xf32>
    tpu.vector_store %arg13[%c1_108, %c0_109, %c0_110], %512 {strides = array<i32>} : memref<2x8x128xf32, #tpu.memory_space<vmem>>, vector<1x8x128xf32>,
    %c0_i32_111 = arith.constant 0 : i32
    %513 = arith.cmpi eq, %arg0, %c0_i32_111 : i32
    %514 = arith.extui %513 : i1 to i32
    %c0_i32_112 = arith.constant 0 : i32
    %515 = arith.cmpi ne, %514, %c0_i32_112 : i32
    scf.if %515 {
      %c0_113 = arith.constant 0 : index
      %c0_114 = arith.constant 0 : index
      %c0_115 = arith.constant 0 : index
      %516 = vector.load %arg12[%c0_113, %c0_114, %c0_115] : memref<2x8x128xf32, #tpu.memory_space<vmem>>, vector<1x8x128xf32>
      %517 = vector.shape_cast %516 : vector<1x8x128xf32> to vector<8x128xf32>
      %518 = vector.shape_cast %476 : vector<8x128xf32> to vector<1x8x128xf32>
      tpu.vector_store %arg12[%c0_113, %c0_114, %c0_115], %518 {strides = array<i32>} : memref<2x8x128xf32, #tpu.memory_space<vmem>>, vector<1x8x128xf32>,
      %c1_116 = arith.constant 1 : index
      %c0_117 = arith.constant 0 : index
      %c0_118 = arith.constant 0 : index
      %519 = vector.load %arg12[%c1_116, %c0_117, %c0_118] : memref<2x8x128xf32, #tpu.memory_space<vmem>>, vector<1x8x128xf32>
      %520 = vector.shape_cast %519 : vector<1x8x128xf32> to vector<8x128xf32>
      %521 = vector.shape_cast %506 : vector<8x128xf32> to vector<1x8x128xf32>
      tpu.vector_store %arg12[%c1_116, %c0_117, %c0_118], %521 {strides = array<i32>} : memref<2x8x128xf32, #tpu.memory_space<vmem>>, vector<1x8x128xf32>,
      %c0_119 = arith.constant 0 : index
      %c0_120 = arith.constant 0 : index
      %522 = vector.load %arg9[%c0_119, %c0_120] : memref<128x128xf32, #tpu.memory_space<vmem>>, vector<128x128xf32>
      %cst_121 = arith.constant dense<0.000000e+00> : vector<8x128xf32>
      %523 = tpu.matmul %476, %522, %cst_121 {dimension_numbers = #tpu.dot_dimension_numbers<[1], [0], [0], [1], [0, 0, 1, 1], [], []>} : vector<8x128xf32>, vector<128x128xf32>, vector<8x128xf32> -> vector<8x128xf32>
      %c0_122 = arith.constant 0 : index
      %c0_123 = arith.constant 0 : index
      %524 = vector.load %arg10[%c0_122, %c0_123] : memref<1x128xf32, #tpu.memory_space<vmem>>, vector<1x128xf32>
      %525 = vector.broadcast %524 : vector<1x128xf32> to vector<8x128xf32>
      %526 = arith.addf %523, %525 : vector<8x128xf32>
      %c0_124 = arith.constant 0 : index
      %c0_125 = arith.constant 0 : index
      %527 = vector.load %arg11[%c0_124, %c0_125] : memref<8x128xf32, #tpu.memory_space<vmem>>, vector<8x128xf32>
      tpu.vector_store %arg11[%c0_124, %c0_125], %526 {strides = array<i32>} : memref<8x128xf32, #tpu.memory_space<vmem>>, vector<8x128xf32>,
    } else {
    }
    return
  }
  func.func @transform_0(%arg0: i32) -> (i32, i32, i32) {
    %c0_i32 = arith.constant 0 : i32
    %c0_i32_0 = arith.constant 0 : i32
    %c0_i32_1 = arith.constant 0 : i32
    return %arg0, %c0_i32, %c0_i32_0 : i32, i32, i32
  }
  func.func @transform_1(%arg0: i32) -> (i32, i32, i32) {
    %c0_i32 = arith.constant 0 : i32
    %c0_i32_0 = arith.constant 0 : i32
    %c0_i32_1 = arith.constant 0 : i32
    %c0_i32_2 = arith.constant 0 : i32
    return %c0_i32, %c0_i32_0, %c0_i32_1 : i32, i32, i32
  }
  func.func @transform_2(%arg0: i32) -> (i32, i32) {
    %c0_i32 = arith.constant 0 : i32
    %c0_i32_0 = arith.constant 0 : i32
    %c0_i32_1 = arith.constant 0 : i32
    return %c0_i32, %c0_i32_0 : i32, i32
  }
  func.func @transform_3(%arg0: i32) -> (i32, i32) {
    %c0_i32 = arith.constant 0 : i32
    %c0_i32_0 = arith.constant 0 : i32
    %c0_i32_1 = arith.constant 0 : i32
    return %c0_i32, %c0_i32_0 : i32, i32
  }
  func.func @transform_4(%arg0: i32) -> (i32, i32) {
    %c0_i32 = arith.constant 0 : i32
    %c0_i32_0 = arith.constant 0 : i32
    %c0_i32_1 = arith.constant 0 : i32
    return %c0_i32, %c0_i32_0 : i32, i32
  }
  func.func @transform_5(%arg0: i32) -> (i32, i32) {
    %c0_i32 = arith.constant 0 : i32
    %c0_i32_0 = arith.constant 0 : i32
    %c0_i32_1 = arith.constant 0 : i32
    return %c0_i32, %c0_i32_0 : i32, i32
  }
  func.func @transform_6(%arg0: i32) -> (i32, i32) {
    %c0_i32 = arith.constant 0 : i32
    %c0_i32_0 = arith.constant 0 : i32
    %c0_i32_1 = arith.constant 0 : i32
    return %c0_i32, %c0_i32_0 : i32, i32
  }
  func.func @transform_7(%arg0: i32) -> (i32, i32) {
    %c0_i32 = arith.constant 0 : i32
    %c0_i32_0 = arith.constant 0 : i32
    %c0_i32_1 = arith.constant 0 : i32
    return %c0_i32, %c0_i32_0 : i32, i32
  }
  func.func @transform_8(%arg0: i32) -> (i32, i32) {
    %c0_i32 = arith.constant 0 : i32
    %c0_i32_0 = arith.constant 0 : i32
    %c0_i32_1 = arith.constant 0 : i32
    return %c0_i32, %c0_i32_0 : i32, i32
  }
  func.func @transform_9(%arg0: i32) -> (i32, i32) {
    %c0_i32 = arith.constant 0 : i32
    %c0_i32_0 = arith.constant 0 : i32
    %c0_i32_1 = arith.constant 0 : i32
    return %c0_i32, %c0_i32_0 : i32, i32
  }
  func.func @transform_10(%arg0: i32) -> (i32, i32) {
    %c0_i32 = arith.constant 0 : i32
    %c0_i32_0 = arith.constant 0 : i32
    %c0_i32_1 = arith.constant 0 : i32
    return %c0_i32, %c0_i32_0 : i32, i32
  }
  func.func @transform_11(%arg0: i32) -> (i32, i32, i32) {
    %c0_i32 = arith.constant 0 : i32
    %c0_i32_0 = arith.constant 0 : i32
    %c0_i32_1 = arith.constant 0 : i32
    %c0_i32_2 = arith.constant 0 : i32
    return %c0_i32, %c0_i32_0, %c0_i32_1 : i32, i32, i32
  }
}

</mosaic_0001>

<bundles_post_ra>
// kernel: gru_forward.1
= control target key start
LH: loop header
LB: loop body
LE: loop exit
PB: predicated region body
PF: predicated region fallthrough
CT: control target
= control target key end

     0   :  { %s7539_s2 = inlined_call_operand.vmem [shape: f32[128,384], index: 2, kind: input, shape index: {}]   ;;  %s7540_s4 = inlined_call_operand.vmem [shape: f32[128,384], index: 4, kind: input, shape index: {}]   ;;  %s7541_s1 = inlined_call_operand.vmem [shape: f32[2,8,128], index: 1, kind: input, shape index: {}]   ;;  %s7542_s6 = inlined_call_operand.vmem [shape: f32[128,384], index: 6, kind: input, shape index: {}]   ;;  %s7543_s3 = inlined_call_operand.vmem [shape: f32[1,384], index: 3, kind: input, shape index: {}]   ;;  %s7544_s0 = inlined_call_operand.vmem [shape: f32[8,8,384], index: 0, kind: input, shape index: {}]   ;;  %s7545_s7 = inlined_call_operand.vmem [shape: f32[1,384], index: 7, kind: input, shape index: {}]   ;;  %s7546_s5 = inlined_call_operand.vmem [shape: f32[1,384], index: 5, kind: input, shape index: {}]   ;;  %s7547_s8 = inlined_call_operand.vmem [shape: f32[128,128], index: 8, kind: input, shape index: {}]   ;;  %s7548_s11 = inlined_call_operand.vmem [shape: f32[2,8,128], index: 11, kind: output, shape index: {1}]   ;;  %s7549_s9 = inlined_call_operand.vmem [shape: f32[1,128], index: 9, kind: input, shape index: {}]   ;;  %s7550_s10 = inlined_call_operand.vmem [shape: f32[8,128], index: 10, kind: output, shape index: {0}]  }
   0x1   :  { %v3206_v0 = vld [vmem:[%s7539_s2 + $0x168] sm:$0xff]  ;;  %v3211_v1 = vld [vmem:[%s7539_s2 + $0x170] sm:$0xff]  ;;  %v3223_v3 = vld [vmem:[%s7539_s2 + $0x158] sm:$0xff] }
   0x2   :  { %v3216_v2 = vld [vmem:[%s7539_s2 + $0x150] sm:$0xff]  ;;  %219 = vmatpush.msra.mxu0 %v3206_v0  ;;  %239 = vmatpush.msra.mxu1 %v3211_v1  ;;  %v3228_v4 = vld [vmem:[%s7539_s2 + $0x138] sm:$0xff]  ;;  %v3233_v5 = vld [vmem:[%s7539_s2 + $0x140] sm:$0xff] }
   0x3   :  { %7855 = vst [vmem:[#allocation3_spill] sm:$0xff] %v3216_v2  ;;  %v3240_v6 = vld [vmem:[%s7539_s2 + $0x120] sm:$0xff]  ;;  %v3245_v7 = vld [vmem:[%s7539_s2 + $0x128] sm:$0xff]  ;;  %v3257_v9 = vld [vmem:[%s7539_s2 + $0x110] sm:$0xff] }
   0x4   :  { %7856 = vst [vmem:[#allocation4_spill] sm:$0xff] %v3228_v4  ;;  %220 = vmatpush.msra.mxu0 %v3216_v2  ;;  %240 = vmatpush.msra.mxu1 %v3223_v3  ;;  %v3252_v8 = vld [vmem:[%s7539_s2 + $0x108] sm:$0xff]  ;;  %v3264_v10 = vld [vmem:[%s7539_s2 + $0xf0] sm:$0xff]  ;;  %v3269_v11 = vld [vmem:[%s7539_s2 + $0xf8] sm:$0xff] }
   0x5   :  { %v3274_v12 = vld [vmem:[%s7539_s2 + $0x178] sm:$0xff]  ;;  %v3281_v13 = vld [vmem:[%s7539_s2 + $0x160] sm:$0xff]  ;;  %v3299_v16 = vld [vmem:[%s7539_s2 + $0x148] sm:$0xff] }
   0x6   :  { %221 = vmatpush.msra.mxu0 %v3228_v4  ;;  %241 = vmatpush.msra.mxu1 %v3233_v5  ;;  %v3286_v14 = vld [vmem:[%s7539_s2 + $0xd8] sm:$0xff]  ;;  %v3291_v15 = vld [vmem:[%s7539_s2 + $0xe0] sm:$0xff]  ;;  %v3309_v18 = vld [vmem:[%s7539_s2 + $0xc8] sm:$0xff] }
   0x7   :  { %7857 = vst [vmem:[#allocation5_spill] sm:$0xff] %v3291_v15  ;;  %259 = vmatpush.msra.mxu2 %v3274_v12  ;;  %v3304_v17 = vld [vmem:[%s7539_s2 + $0xc0] sm:$0xff]  ;;  %v3317_v19 = vld [vmem:[%s7539_s2 + $0x130] sm:$0xff]  ;;  %v3322_v20 = vld [vmem:[%s7539_s2 + $0xa8] sm:$0xff] }
   0x8   :  { %222 = vmatpush.msra.mxu0 %v3240_v6  ;;  %242 = vmatpush.msra.mxu1 %v3245_v7  ;;  %7858 = vst [vmem:[#allocation6_spill] sm:$0xff] %v3309_v18  ;;  %v3327_v21 = vld [vmem:[%s7539_s2 + $0xb0] sm:$0xff]  ;;  %v3335_v22 = vld [vmem:[%s7539_s2 + $0x118] sm:$0xff]  ;;  %v3351_v25 = vld [vmem:[%s7540_s4 + $0x168] sm:$0xff] }
   0x9   :  { %260 = vmatpush.msra.mxu2 %v3281_v13  ;;  %7859 = vst [vmem:[#allocation7_spill] sm:$0xff] %v3327_v21  ;;  %v3340_v23 = vld [vmem:[%s7539_s2 + $0x90] sm:$0xff]  ;;  %v3345_v24 = vld [vmem:[%s7539_s2 + $0x98] sm:$0xff]  ;;  %v3358_v26 = vld [vmem:[%s7539_s2 + $0x100] sm:$0xff]  ;;  %326 = vmatpush.msra.mxu3 %v3351_v25 }
   0xa   :  { %223 = vmatpush.msra.mxu0 %v3252_v8  ;;  %243 = vmatpush.msra.mxu1 %v3257_v9  ;;  %7860 = vst [vmem:[#allocation8_spill] sm:$0xff] %v3345_v24  ;;  %v3363_v27 = vld [vmem:[%s7540_s4 + $0x150] sm:$0xff]  ;;  %v3368_v28 = vld [vmem:[%s7539_s2 + $0x78] sm:$0xff]  ;;  %v3373_v29 = vld [vmem:[%s7539_s2 + $0x80] sm:$0xff] }
   0xb   :  { %261 = vmatpush.msra.mxu2 %v3299_v16  ;;  %7861 = vst [vmem:[#allocation9_spill] sm:$0xff] %v3358_v26  ;;  %v3382_v30 = vld [vmem:[%s7539_s2 + $0xe8] sm:$0xff]  ;;  %v3387_v31 = vld [vmem:[%s7540_s4 + $0x138] sm:$0xff]  ;;  %v3392_v32 = vld [vmem:[%s7539_s2 + $0x60] sm:$0xff]  ;;  %327 = vmatpush.msra.mxu3 %v3363_v27 }
   0xc   :  { %224 = vmatpush.msra.mxu0 %v3264_v10  ;;  %244 = vmatpush.msra.mxu1 %v3269_v11  ;;  %7862 = vst [vmem:[#allocation10_spill] sm:$0xff] %v3373_v29  ;;  %v3397_v33 = vld [vmem:[%s7539_s2 + $0x68] sm:$0xff]  ;;  %v3406_v34 = vld [vmem:[%s7539_s2 + $0xd0] sm:$0xff]  ;;  %v3411_v35 = vld [vmem:[%s7540_s4 + $0x120] sm:$0xff] }
   0xd   :  { %262 = vmatpush.msra.mxu2 %v3317_v19  ;;  %7863 = vst [vmem:[#allocation11_spill] sm:$0xff] %v3382_v30  ;;  %v3416_v36 = vld [vmem:[%s7539_s2 + $0x48] sm:$0xff]  ;;  %v3421_v37 = vld [vmem:[%s7539_s2 + $0x50] sm:$0xff]  ;;  %328 = vmatpush.msra.mxu3 %v3387_v31  ;;  %v3430_v38 = vld [vmem:[%s7539_s2 + $0xb8] sm:$0xff] }
   0xe   :  { %225 = vmatpush.msra.mxu0 %v3286_v14  ;;  %245 = vmatpush.msra.mxu1 %v3291_v15  ;;  %7864 = vst [vmem:[#allocation12_spill] sm:$0xff] %v3387_v31  ;;  %v3435_v39 = vld [vmem:[%s7540_s4 + $0x108] sm:$0xff]  ;;  %v3440_v40 = vld [vmem:[%s7539_s2 + $0x30] sm:$0xff]  ;;  %v3445_v41 = vld [vmem:[%s7539_s2 + $0x38] sm:$0xff] }
   0xf   :  { %263 = vmatpush.msra.mxu2 %v3335_v22  ;;  %7865 = vst [vmem:[#allocation13_spill] sm:$0xff] %v3397_v33  ;;  %329 = vmatpush.msra.mxu3 %v3411_v35  ;;  %v3454_v42 = vld [vmem:[%s7539_s2 + $0xa0] sm:$0xff]  ;;  %v3459_v43 = vld [vmem:[%s7540_s4 + $0xf0] sm:$0xff]  ;;  %v3464_v44 = vld [vmem:[%s7539_s2 + $0x18] sm:$0xff] }
  0x10   :  { %226 = vmatpush.msra.mxu0 %v3304_v17  ;;  %246 = vmatpush.msra.mxu1 %v3309_v18  ;;  %7866 = vst [vmem:[#allocation14_spill] sm:$0xff] %v3406_v34  ;;  %v3469_v45 = vld [vmem:[%s7539_s2 + $0x20] sm:$0xff]  ;;  %v3478_v46 = vld [vmem:[%s7539_s2 + $0x88] sm:$0xff]  ;;  %v3483_v47 = vld [vmem:[%s7540_s4 + $0xd8] sm:$0xff] }
  0x11   :  { %264 = vmatpush.msra.mxu2 %v3358_v26  ;;  %7867 = vst [vmem:[#allocation15_spill] sm:$0xff] %v3411_v35  ;;  %330 = vmatpush.msra.mxu3 %v3435_v39  ;;  %v3488_v48 = vld [vmem:[%s7539_s2] sm:$0xff]  ;;  %v3493_v49 = vld [vmem:[%s7539_s2 + $0x8] sm:$0xff]  ;;  %v3508_v51 = vld [vmem:[%s7539_s2 + $0x70] sm:$0xff] }
  0x12   :  { %227 = vmatpush.msra.mxu0 %v3322_v20  ;;  %247 = vmatpush.msra.mxu1 %v3327_v21  ;;  %7868 = vst [vmem:[#allocation16_spill] sm:$0xff] %v3421_v37  ;;  %v3502_v50 = vld [vmem:[%s7541_s1] sm:$0xff]  ;;  %v3513_v52 = vld [vmem:[%s7540_s4 + $0x178] sm:$0xff]  ;;  %v3540_v56 = vld [vmem:[%s7540_s4 + $0x148] sm:$0xff] }
  0x13   :  { %265 = vmatpush.msra.mxu2 %v3382_v30  ;;  %7869 = vst [vmem:[#allocation17_spill] sm:$0xff] %v3430_v38  ;;  %331 = vmatpush.msra.mxu3 %v3459_v43  ;;  %v3523_v53 = vld [vmem:[%s7539_s2 + $0x58] sm:$0xff]  ;;  %v3528_v54 = vld [vmem:[%s7540_s4 + $0x160] sm:$0xff]  ;;  %v3547_v57 = vld [vmem:[%s7539_s2 + $0x28] sm:$0xff] }
  0x14   :  { %228 = vmatpush.msra.mxu0 %v3340_v23  ;;  %248 = vmatpush.msra.mxu1 %v3345_v24  ;;  %7870 = vst [vmem:[#allocation18_spill] sm:$0xff] %v3435_v39  ;;  %v3535_v55 = vld [vmem:[%s7539_s2 + $0x40] sm:$0xff]  ;;  %v3554_v58 = vld [vmem:[%s7539_s2 + $0x10] sm:$0xff]  ;;  %v3560_v59 = vld [vmem:[%s7542_s6 + $0x168] sm:$0xff] }
  0x15   :  { %7871 = vst [vmem:[#allocation19_spill] sm:$0xff] %v3445_v41  ;;  %266 = vmatpush.msra.mxu2 %v3406_v34  ;;  %332 = vmatpush.msra.mxu3 %v3483_v47  ;;  %v3567_v60 = vld [vmem:[%s7542_s6 + $0x150] sm:$0xff]  ;;  %v3573_v61 = vld [vmem:[%s7542_s6 + $0x138] sm:$0xff]  ;;  %v3579_v62 = vld [vmem:[%s7542_s6 + $0x120] sm:$0xff] }
  0x16   :  { %229 = vmatpush.msra.mxu0 %v3368_v28  ;;  %249 = vmatpush.msra.mxu1 %v3373_v29  ;;  %7872 = vst [vmem:[#allocation20_spill] sm:$0xff] %v3454_v42  ;;  %v3585_v63 = vld [vmem:[%s7542_s6 + $0x108] sm:$0xff]  ;;  %v3846_v34 = vld [vmem:[%s7542_s6 + $0x110] sm:$0xff]  ;;  %v3851_v35 = vld [vmem:[%s7543_s3] sm:$0x7] }
  0x17   :  { %7873 = vst [vmem:[#allocation21_spill] sm:$0xff] %v3459_v43  ;;  %267 = vmatpush.msra.mxu2 %v3430_v38  ;;  %v3784_v43 = vld [vmem:[%s7540_s4 + $0x158] sm:$0xff]  ;;  %v3808_v38 = vld [vmem:[%s7542_s6 + $0x140] sm:$0xff]  ;;  %v3827_v39 = vld [vmem:[%s7542_s6 + $0x128] sm:$0xff]  ;;  %v3883_v31 = vperm.slane %v3851_v35, 1 }
  0x18   :  { %230 = vmatpush.msra.mxu0 %v3392_v32  ;;  %250 = vmatpush.msra.mxu1 %v3397_v33  ;;  %7874 = vst [vmem:[#allocation22_spill] sm:$0xff] %v3464_v44  ;;  %v3877_v30 = vld [vmem:[%s7542_s6 + $0xe0] sm:$0xff] }
  0x19   :  { %7875 = vst [vmem:[#allocation23_spill] sm:$0xff] %v3469_v45  ;;  %268 = vmatpush.msra.mxu2 %v3454_v42  ;;  %v3758_v42 = vld [vmem:[%s7542_s6] sm:$0xff] }
  0x1a   :  { %231 = vmatpush.msra.mxu0 %v3416_v36  ;;  %251 = vmatpush.msra.mxu1 %v3421_v37  ;;  %7876 = vst [vmem:[#allocation24_spill] sm:$0xff] %v3478_v46 }
  0x1b   :  { %7877 = vst [vmem:[#allocation25_spill] sm:$0xff] %v3483_v47  ;;  %269 = vmatpush.msra.mxu2 %v3478_v46  ;;  %v3722_v46 = vld [vmem:[%s7542_s6 + $0x30] sm:$0xff]  ;;  %v3740_v47 = vld [vmem:[%s7542_s6 + $0x18] sm:$0xff] }
  0x1c   :  { %232 = vmatpush.msra.mxu0 %v3440_v40  ;;  %252 = vmatpush.msra.mxu1 %v3445_v41  ;;  %7878 = vst [vmem:[#allocation26_spill] sm:$0xff] %v3493_v49 }
  0x1d   :  { %7879 = vst [vmem:[#allocation27_spill] sm:$0xff] %v3508_v51  ;;  %270 = vmatpush.msra.mxu2 %v3508_v51  ;;  %v3686_v51 = vld [vmem:[%s7542_s6 + $0x60] sm:$0xff] }
  0x1e   :  { %233 = vmatpush.msra.mxu0 %v3464_v44  ;;  %253 = vmatpush.msra.mxu1 %v3469_v45  ;;  %7880 = vst [vmem:[#allocation28_spill] sm:$0xff] %v3523_v53 }
  0x1f   :  { %7881 = vst [vmem:[#allocation29_spill] sm:$0xff] %v3535_v55  ;;  %271 = vmatpush.msra.mxu2 %v3523_v53  ;;  %v3663_v53 = vld [vmem:[%s7540_s4 + $0xe8] sm:$0xff] }
  0x20   :  { %234 = vmatpush.msra.mxu0 %v3488_v48  ;;  %254 = vmatpush.msra.mxu1 %v3493_v49  ;;  %7882 = vst [vmem:[#allocation30_spill] sm:$0xff] %v3547_v57 }
  0x21   :  { %235 = vmatmul.f32.vlgmr.msra.gmra.mxu0 %v3502_v50  ;;  %255 = vmatmul.f32.vlgmr.msra.gmra.mxu1 %v3502_v50  ;;  %7883 = vst [vmem:[#allocation31_spill] sm:$0xff] %v3554_v58 }
  0x22   :  { %366 = vmatpush.msrb.mxu1 %v3513_v52  ;;  %272 = vmatpush.msra.mxu2 %v3535_v55  ;;  %7884 = vst [vmem:[#allocation32_spill] sm:$0xff] %v3560_v59  ;;  %v3650_v55 = vld [vmem:[%s7542_s6 + $0x90] sm:$0xff] }
  0x23   :  { %7885 = vst [vmem:[#allocation33_spill] sm:$0xff] %v3567_v60 }
  0x24   :  { %367 = vmatpush.msrb.mxu1 %v3528_v54  ;;  %273 = vmatpush.msra.mxu2 %v3547_v57  ;;  %7886 = vst [vmem:[#allocation34_spill] sm:$0xff] %v3573_v61  ;;  %v3645_v57 = vld [vmem:[%s7540_s4 + $0x100] sm:$0xff] }
  0x25   :  { %7887 = vst [vmem:[#allocation35_spill] sm:$0xff] %v3579_v62 }
  0x26   :  { %368 = vmatpush.msrb.mxu1 %v3540_v56  ;;  %274 = vmatpush.msra.mxu2 %v3554_v58  ;;  %7888 = vst [vmem:[#allocation36_spill] sm:$0xff] %v3585_v63  ;;  %v3634_v58 = vld [vmem:[%s7542_s6 + $0xa8] sm:$0xff] }
  0x27   :  { %275 = vmatmul.f32.vlgmr.msra.gmra.mxu2 %v3502_v50  ;;  %7894 = vst [vmem:[#allocation42_spill] sm:$0xff] %v3634_v58 }
  0x28   :  { %386 = vmatpush.msrb.mxu2 %v3560_v59  ;;  %v3591_v59 = vld [vmem:[%s7542_s6 + $0xf0] sm:$0xff]  ;;  %7896 = vst [vmem:[#allocation44_spill] sm:$0xff] %v3650_v55 }
  0x29   :  { %7889 = vst [vmem:[#allocation37_spill] sm:$0xff] %v3591_v59 }
  0x2a   :  { %387 = vmatpush.msrb.mxu2 %v3567_v60  ;;  %v3597_v60 = vld [vmem:[%s7542_s6 + $0xd8] sm:$0xff]  ;;  %7900 = vst [vmem:[#allocation48_spill] sm:$0xff] %v3686_v51 }
  0x2b   :  { %7890 = vst [vmem:[#allocation38_spill] sm:$0xff] %v3597_v60 }
  0x2c   :  { %388 = vmatpush.msrb.mxu2 %v3573_v61  ;;  %v3609_v61 = vld [vmem:[%s7540_s4 + $0x130] sm:$0xff]  ;;  %7904 = vst [vmem:[#allocation52_spill] sm:$0xff] %v3722_v46 }
  0x2d   :  { %369 = vmatpush.msrb.mxu1 %v3609_v61  ;;  %7906 = vst [vmem:[#allocation54_spill] sm:$0xff] %v3740_v47 }
  0x2e   :  { %389 = vmatpush.msrb.mxu2 %v3579_v62  ;;  %v3604_v62 = vld [vmem:[%s7540_s4 + $0xc0] sm:$0xff]  ;;  %7908 = vst [vmem:[#allocation56_spill] sm:$0xff] %v3758_v42 }
  0x2f   :  { %7891 = vst [vmem:[#allocation39_spill] sm:$0xff] %v3604_v62  ;;  %333 = vmatpush.msra.mxu3 %v3604_v62  ;;  %v3704_v62 = vld [vmem:[%s7542_s6 + $0x48] sm:$0xff] }
  0x30   :  { %390 = vmatpush.msrb.mxu2 %v3585_v63  ;;  %v3614_v63 = vld [vmem:[%s7542_s6 + $0xc0] sm:$0xff]  ;;  %7902 = vst [vmem:[#allocation50_spill] sm:$0xff] %v3704_v62 }
  0x31   :  { %7892 = vst [vmem:[#allocation40_spill] sm:$0xff] %v3614_v63 }
  0x32   :  { %391 = vmatpush.msrb.mxu2 %v3591_v59  ;;  %v3627_v59 = vld [vmem:[%s7540_s4 + $0x118] sm:$0xff]  ;;  %7911 = vst [vmem:[#allocation59_spill] sm:$0xff] %v3808_v38 }
  0x33   :  { %370 = vmatpush.msrb.mxu1 %v3627_v59  ;;  %7913 = vst [vmem:[#allocation61_spill] sm:$0xff] %v3827_v39 }
  0x34   :  { %392 = vmatpush.msrb.mxu2 %v3597_v60  ;;  %v3622_v60 = vld [vmem:[%s7540_s4 + $0xa8] sm:$0xff]  ;;  %7915 = vst [vmem:[#allocation63_spill] sm:$0xff] %v3846_v34 }
  0x35   :  { %7893 = vst [vmem:[#allocation41_spill] sm:$0xff] %v3622_v60  ;;  %334 = vmatpush.msra.mxu3 %v3622_v60  ;;  %371 = vmatpush.msrb.mxu1 %v3645_v57  ;;  %v3668_v60 = vld [vmem:[%s7542_s6 + $0x78] sm:$0xff] }
  0x36   :  { %393 = vmatpush.msrb.mxu2 %v3614_v63  ;;  %v3640_v63 = vld [vmem:[%s7540_s4 + $0x90] sm:$0xff]  ;;  %7898 = vst [vmem:[#allocation46_spill] sm:$0xff] %v3668_v60 }
  0x37   :  { %7895 = vst [vmem:[#allocation43_spill] sm:$0xff] %v3640_v63  ;;  %335 = vmatpush.msra.mxu3 %v3640_v63  ;;  %372 = vmatpush.msrb.mxu1 %v3663_v53  ;;  %v3681_v63 = vld [vmem:[%s7540_s4 + $0xd0] sm:$0xff] }
  0x38   :  { %394 = vmatpush.msrb.mxu2 %v3634_v58  ;;  %v3658_v58 = vld [vmem:[%s7540_s4 + $0x78] sm:$0xff]  ;;  %7919 = vst [vmem:[#allocation67_spill] sm:$0xff] %v3877_v30 }
  0x39   :  { %7897 = vst [vmem:[#allocation45_spill] sm:$0xff] %v3658_v58  ;;  %336 = vmatpush.msra.mxu3 %v3658_v58  ;;  %373 = vmatpush.msrb.mxu1 %v3681_v63  ;;  %v3699_v58 = vld [vmem:[%s7540_s4 + $0xb8] sm:$0xff] }
  0x3a   :  { %395 = vmatpush.msrb.mxu2 %v3650_v55  ;;  %v3676_v55 = vld [vmem:[%s7540_s4 + $0x60] sm:$0xff]  ;;  %7921 = vst [vmem:[#allocation69_spill] sm:$0xff] %v3883_v31 }
  0x3b   :  { %7899 = vst [vmem:[#allocation47_spill] sm:$0xff] %v3676_v55  ;;  %337 = vmatpush.msra.mxu3 %v3676_v55  ;;  %374 = vmatpush.msrb.mxu1 %v3699_v58  ;;  %v3717_v55 = vld [vmem:[%s7540_s4 + $0xa0] sm:$0xff] }
  0x3c   :  { %396 = vmatpush.msrb.mxu2 %v3668_v60  ;;  %v3694_v60 = vld [vmem:[%s7540_s4 + $0x48] sm:$0xff] }
  0x3d   :  { %7901 = vst [vmem:[#allocation49_spill] sm:$0xff] %v3694_v60  ;;  %338 = vmatpush.msra.mxu3 %v3694_v60  ;;  %375 = vmatpush.msrb.mxu1 %v3717_v55  ;;  %v3735_v60 = vld [vmem:[%s7540_s4 + $0x88] sm:$0xff] }
  0x3e   :  { %397 = vmatpush.msrb.mxu2 %v3686_v51  ;;  %v3712_v51 = vld [vmem:[%s7540_s4 + $0x30] sm:$0xff] }
  0x3f   :  { %7903 = vst [vmem:[#allocation51_spill] sm:$0xff] %v3712_v51  ;;  %339 = vmatpush.msra.mxu3 %v3712_v51  ;;  %376 = vmatpush.msrb.mxu1 %v3735_v60  ;;  %v3753_v51 = vld [vmem:[%s7540_s4 + $0x70] sm:$0xff] }
  0x40   :  { %398 = vmatpush.msrb.mxu2 %v3704_v62  ;;  %v3730_v62 = vld [vmem:[%s7540_s4 + $0x18] sm:$0xff] }
  0x41   :  { %7905 = vst [vmem:[#allocation53_spill] sm:$0xff] %v3730_v62  ;;  %340 = vmatpush.msra.mxu3 %v3730_v62  ;;  %377 = vmatpush.msrb.mxu1 %v3753_v51  ;;  %v3770_v62 = vld [vmem:[%s7542_s6 + $0x170] sm:$0xff] }
  0x42   :  { %399 = vmatpush.msrb.mxu2 %v3722_v46  ;;  %v3748_v46 = vld [vmem:[%s7540_s4] sm:$0xff]  ;;  %7909 = vst [vmem:[#allocation57_spill] sm:$0xff] %v3770_v62 }
  0x43   :  { %7907 = vst [vmem:[#allocation55_spill] sm:$0xff] %v3748_v46  ;;  %341 = vmatpush.msra.mxu3 %v3748_v46  ;;  %v3777_v46 = vld [vmem:[%s7540_s4 + $0x58] sm:$0xff] }
  0x44   :  { %400 = vmatpush.msrb.mxu2 %v3740_v47  ;;  %v3765_v47 = vld [vmem:[%s7540_s4 + $0x170] sm:$0xff]  ;;  %378 = vmatpush.msrb.mxu1 %v3777_v46 }
  0x45   :  { %346 = vmatpush.msrb.mxu0 %v3765_v47  ;;  %406 = vmatpush.msrb.mxu3 %v3770_v62  ;;  %v3796_v62 = vld [vmem:[%s7540_s4 + $0x40] sm:$0xff] }
  0x46   :  { %401 = vmatpush.msrb.mxu2 %v3758_v42  ;;  %v3789_v42 = vld [vmem:[%s7542_s6 + $0x158] sm:$0xff]  ;;  %379 = vmatpush.msrb.mxu1 %v3796_v62 }
  0x47   :  { %7910 = vst [vmem:[#allocation58_spill] sm:$0xff] %v3789_v42  ;;  %347 = vmatpush.msrb.mxu0 %v3784_v43  ;;  %407 = vmatpush.msrb.mxu3 %v3789_v42  ;;  %v3815_v42 = vld [vmem:[%s7540_s4 + $0x28] sm:$0xff] }
  0x48   :  { %517 = vmatpush.msra.mxu2 %v3211_v1  ;;  %v3803_v1 = vld [vmem:[%s7540_s4 + $0x140] sm:$0xff]  ;;  %380 = vmatpush.msrb.mxu1 %v3815_v42 }
  0x49   :  { %348 = vmatpush.msrb.mxu0 %v3803_v1  ;;  %408 = vmatpush.msrb.mxu3 %v3808_v38  ;;  %v3834_v38 = vld [vmem:[%s7540_s4 + $0x10] sm:$0xff] }
  0x4a   :  { %518 = vmatpush.msra.mxu2 %v3223_v3  ;;  %v3822_v3 = vld [vmem:[%s7540_s4 + $0x128] sm:$0xff]  ;;  %381 = vmatpush.msrb.mxu1 %v3834_v38 }
  0x4b   :  { %7912 = vst [vmem:[#allocation60_spill] sm:$0xff] %v3822_v3  ;;  %349 = vmatpush.msrb.mxu0 %v3822_v3  ;;  %409 = vmatpush.msrb.mxu3 %v3827_v39  ;;  %v3865_v39 = vld [vmem:[%s7542_s6 + $0xf8] sm:$0xff]  ;;  %v3921_v3 = vld [vmem:[%s7542_s6 + $0xb0] sm:$0xff] }
  0x4c   :  { %519 = vmatpush.msra.mxu2 %v3233_v5  ;;  %v3841_v5 = vld [vmem:[%s7540_s4 + $0x110] sm:$0xff]  ;;  %497 = vmatpush.msra.mxu1 %v3206_v0  ;;  %7917 = vst [vmem:[#allocation65_spill] sm:$0xff] %v3865_v39 }
  0x4d   :  { %7914 = vst [vmem:[#allocation62_spill] sm:$0xff] %v3841_v5  ;;  %350 = vmatpush.msrb.mxu0 %v3841_v5  ;;  %410 = vmatpush.msrb.mxu3 %v3846_v34  ;;  %v3872_v34 = vld [vmem:[%s7540_s4 + $0xe0] sm:$0xff]  ;;  %v3880_v5 = vperm.slane %v3851_v35, 0 }
  0x4e   :  { %520 = vmatpush.msra.mxu2 %v3245_v7  ;;  %v3860_v7 = vld [vmem:[%s7540_s4 + $0xf8] sm:$0xff]  ;;  %7918 = vst [vmem:[#allocation66_spill] sm:$0xff] %v3872_v34  ;;  %498 = vmatpush.msra.mxu1 %v3216_v2  ;;  %v3916_v2 = vld [vmem:[%s7540_s4 + $0xb0] sm:$0xff] }
  0x4f   :  { %7916 = vst [vmem:[#allocation64_spill] sm:$0xff] %v3860_v7  ;;  %351 = vmatpush.msrb.mxu0 %v3860_v7  ;;  %411 = vmatpush.msrb.mxu3 %v3865_v39  ;;  %v3899_v7 = vld [vmem:[%s7542_s6 + $0xc8] sm:$0xff] }
  0x50   :  { %521 = vmatpush.msra.mxu2 %v3257_v9  ;;  %7920 = vst [vmem:[#allocation68_spill] sm:$0xff] %v3880_v5  ;;  %499 = vmatpush.msra.mxu1 %v3228_v4  ;;  %v3894_v9 = vld [vmem:[%s7540_s4 + $0xc8] sm:$0xff] }
  0x51   :  { %352 = vmatpush.msrb.mxu0 %v3872_v34  ;;  %412 = vmatpush.msrb.mxu3 %v3877_v30  ;;  %7922 = vst [vmem:[#allocation70_spill] sm:$0xff] %v3899_v7  ;;  %v217_v30 = vld [vmem:[%s7544_s0 + $0x8] sm:$0xff] }
  0x52   :  { %522 = vmatpush.msra.mxu2 %v3269_v11  ;;  %v216_v11 = vld [vmem:[%s7544_s0] sm:$0xff]  ;;  %500 = vmatpush.msra.mxu1 %v3240_v6  ;;  %7923 = vst [vmem:[#allocation71_spill] sm:$0xff] %v3921_v3 }
  0x53   :  { %353 = vmatpush.msrb.mxu0 %v3894_v9  ;;  %413 = vmatpush.msrb.mxu3 %v3899_v7 }
  0x54   :  { %523 = vmatpush.msra.mxu2 %v3291_v15  ;;  %501 = vmatpush.msra.mxu1 %v3252_v8  ;;  %v4010_v15 = vld [vmem:[%s7542_s6 + $0x20] sm:$0xff] }
  0x55   :  { %354 = vmatpush.msrb.mxu0 %v3916_v2  ;;  %414 = vmatpush.msrb.mxu3 %v3921_v3  ;;  %7929 = vst [vmem:[#allocation77_spill] sm:$0xff] %v4010_v15  ;;  %v4062_v3 = vld [vmem:[%s7542_s6 + $0x148] sm:$0xff] }
  0x56   :  { %524 = vmatpush.msra.mxu2 %v3309_v18  ;;  %502 = vmatpush.msra.mxu1 %v3264_v10  ;;  %v4005_v18 = vld [vmem:[%s7540_s4 + $0x20] sm:$0xff] }
  0x58   :  { %525 = vmatpush.msra.mxu2 %v3327_v21  ;;  %503 = vmatpush.msra.mxu1 %v3286_v14  ;;  %v3996_v21 = vld [vmem:[%s7542_s6 + $0x38] sm:$0xff] }
  0x59   :  { %7928 = vst [vmem:[#allocation76_spill] sm:$0xff] %v3996_v21 }
  0x5a   :  { %526 = vmatpush.msra.mxu2 %v3345_v24  ;;  %504 = vmatpush.msra.mxu1 %v3304_v17  ;;  %v3977_v24 = vld [vmem:[%s7540_s4 + $0x50] sm:$0xff] }
  0x5c   :  { %527 = vmatpush.msra.mxu2 %v3373_v29  ;;  %v3991_v29 = vld [vmem:[%s7540_s4 + $0x38] sm:$0xff]  ;;  %505 = vmatpush.msra.mxu1 %v3322_v20 }
  0x5e   :  { %528 = vmatpush.msra.mxu2 %v3397_v33  ;;  %506 = vmatpush.msra.mxu1 %v3340_v23 }
  0x60   :  { %529 = vmatpush.msra.mxu2 %v3421_v37  ;;  %v4017_v37 = vld [vmem:[%s7540_s4 + $0x8] sm:$0xff]  ;;  %507 = vmatpush.msra.mxu1 %v3368_v28 }
  0x62   :  { %530 = vmatpush.msra.mxu2 %v3445_v41  ;;  %508 = vmatpush.msra.mxu1 %v3392_v32 }
  0x64   :  { %531 = vmatpush.msra.mxu2 %v3469_v45  ;;  %509 = vmatpush.msra.mxu1 %v3416_v36 }
  0x66   :  { %532 = vmatpush.msra.mxu2 %v3493_v49  ;;  %510 = vmatpush.msra.mxu1 %v3440_v40  ;;  %v4054_v49 = vperm.slane %v3851_v35, 2 }
  0x68   :  { %511 = vmatpush.msra.mxu1 %v3464_v44 }
  0x6a   :  { %512 = vmatpush.msra.mxu1 %v3488_v48 }
  0x9e   :  { %v236_v39 = vpop.f32.mrf.mxu0  ;;  %v256_v34 = vpop.f32.mrf.mxu1 }
  0x9f   :  { %v237_v4 = vadd.f32 %v236_v39, %v3880_v5  ;;  %v257_v26 = vadd.f32 %v256_v34, %v3883_v31  ;;  %v3930_v5 = vld [vmem:[%s7540_s4 + $0x98] sm:$0xff] }
  0xa0   :  { %v3935_v31 = vld [vmem:[%s7542_s6 + $0x98] sm:$0xff]  ;;  %355 = vmatpush.msrb.mxu0 %v3930_v5 }
  0xa1   :  { %v279_v39 = vadd.f32 %v237_v4, %v216_v11  ;;  %v299_v34 = vadd.f32 %v257_v26, %v217_v30  ;;  %7924 = vst [vmem:[#allocation72_spill] sm:$0xff] %v3935_v31  ;;  %415 = vmatpush.msrb.mxu3 %v3935_v31  ;;  %v3944_v30 = vld [vmem:[%s7540_s4 + $0x80] sm:$0xff] }
  0xa2   :  { %v3949_v11 = vld [vmem:[%s7542_s6 + $0x80] sm:$0xff]  ;;  %356 = vmatpush.msrb.mxu0 %v3944_v30 }
  0xa3   :  { %v2496_v4 = vmul.f32 -1.442695, %v279_v39  ;;  %v2497_v26 = vmul.f32 -1.442695, %v299_v34  ;;  %7925 = vst [vmem:[#allocation73_spill] sm:$0xff] %v3949_v11  ;;  %416 = vmatpush.msrb.mxu3 %v3949_v11  ;;  %v3958_v39 = vld [vmem:[%s7540_s4 + $0x68] sm:$0xff] }
  0xa4   :  { %v3963_v34 = vld [vmem:[%s7542_s6 + $0x68] sm:$0xff]  ;;  %357 = vmatpush.msrb.mxu0 %v3958_v39 }
  0xa5   :  { %2551 = vpow2.f32 %v2496_v4  ;;  %7926 = vst [vmem:[#allocation74_spill] sm:$0xff] %v3963_v34  ;;  %v3970_v4 = vld [vmem:[%s7541_s1 + $0x8] sm:$0xff]  ;;  %417 = vmatpush.msrb.mxu3 %v3963_v34 }
  0xa6   :  { %2553 = vpow2.f32 %v2497_v26  ;;  %v3982_v26 = vld [vmem:[%s7542_s6 + $0x50] sm:$0xff]  ;;  %358 = vmatpush.msrb.mxu0 %v3977_v24  ;;  %402 = vmatmul.f32.vlgmr.msrb.gmra.mxu2 %v3970_v4 }
  0xa7   :  { %7927 = vst [vmem:[#allocation75_spill] sm:$0xff] %v3982_v26  ;;  %418 = vmatpush.msrb.mxu3 %v3982_v26  ;;  %644 = vmatpush.msrb.mxu2 %v3513_v52 }
  0xa8   :  { %359 = vmatpush.msrb.mxu0 %v3991_v29 }
  0xa9   :  { %419 = vmatpush.msrb.mxu3 %v3996_v21  ;;  %v4022_v21 = vld [vmem:[%s7542_s6 + $0x8] sm:$0xff]  ;;  %645 = vmatpush.msrb.mxu2 %v3528_v54  ;;  %v4051_v54 = vld [vmem:[%s7542_s6 + $0x160] sm:$0xff] }
  0xaa   :  { %7930 = vst [vmem:[#allocation78_spill] sm:$0xff] %v4022_v21  ;;  %360 = vmatpush.msrb.mxu0 %v4005_v18  ;;  %v276_v31 = vpop.f32.mrf.mxu2 }
  0xab   :  { %v2552_v33 = vpop.eup %2551  ;;  %420 = vmatpush.msrb.mxu3 %v4010_v15  ;;  %646 = vmatpush.msrb.mxu2 %v3540_v56 }
  0xac   :  { %v2554_v26 = vpop.eup %2553  ;;  %v283_v34 = vadd.f32 1.0, %v2552_v33  ;;  %361 = vmatpush.msrb.mxu0 %v4017_v37 }
  0xad   :  { %v4024_v11 = vadd.f32 1.0, %v2554_v26  ;;  %421 = vmatpush.msrb.mxu3 %v4022_v21  ;;  %v4042_v26 = vld [vmem:[%s7542_s6 + $0x178] sm:$0xff]  ;;  %647 = vmatpush.msrb.mxu2 %v3609_v61  ;;  %v277_v61 = vadd.f32 %v276_v31, %v4054_v49  ;;  %v218_v31 = vld [vmem:[%s7544_s0 + $0x10] sm:$0xff] }
  0xae   :  { %2555 = vrcp.f32 %v283_v34  ;;  %426 = vmatpush.msra.mxu0 %v4042_v26  ;;  %v295_v56 = vand.u32 2147483648, %v283_v34  ;;  %v293_v44 = vand.u32 2147483647, %v283_v34  ;;  %vm289_vm1 = vweird.f32 %v283_v34 }
  0xaf   :  { %2557 = vrcp.f32 %v4024_v11  ;;  %648 = vmatpush.msrb.mxu2 %v3627_v59  ;;  %v4077_v59 = vld [vmem:[%s7542_s6 + $0x118] sm:$0xff]  ;;  %vm309_vm4 = vweird.f32 %v4024_v11 }
  0xb0   :  { %427 = vmatpush.msra.mxu0 %v4051_v54  ;;  %vm294_vm3 = vcmp.eq.f32.partialorder %v293_v44, 8.507059e+37  ;;  %v315_v44 = vand.u32 2147483648, %v4024_v11 }
  0xb1   :  { %649 = vmatpush.msrb.mxu2 %v3645_v57 }
  0xb2   :  { %428 = vmatpush.msra.mxu0 %v4062_v3 }
  0xb3   :  { %650 = vmatpush.msrb.mxu2 %v3663_v53  ;;  %v313_v53 = vand.u32 2147483647, %v4024_v11 }
  0xb4   :  { %v2556_v33 = vpop.eup %2555 }
  0xb5   :  { %v2558_v45 = vpop.eup %2557  ;;  %v285_v41 = vmul.f32 %v2556_v33, %v283_v34  ;;  %vm290_vm0 = vweird.f32 %v2556_v33  ;;  %v4088_v34 = vld [vmem:[%s7542_s6 + $0x100] sm:$0xff]  ;;  %651 = vmatpush.msrb.mxu2 %v3681_v63  ;;  %v316_v63 = vor.u32 1.1754944e-38, %v315_v44  ;;  %vm314_vm7 = vcmp.eq.f32.partialorder %v313_v53, 8.507059e+37  ;;  %v7942_v44 = vld [vmem:[#allocation64_spill] sm:$0xff]  ;;  %v7946_v53 = vld [vmem:[#allocation17_spill] sm:$0xff] }
  0xb6   :  { %v305_v52 = vmul.f32 %v2558_v45, %v4024_v11  ;;  %vm291_vm2 = vmor %vm289_vm1, %vm290_vm0  ;;  %vm310_vm5 = vweird.f32 %v2558_v45  ;;  %v4111_v11 = vld [vmem:[%s7542_s6 + $0xb8] sm:$0xff] }
  0xb7   :  { %v286_v21 = vsub.f32 1.0, %v285_v41  ;;  %v4069_v41 = vld [vmem:[%s7542_s6 + $0x130] sm:$0xff]  ;;  %vm311_vm6 = vmor %vm309_vm4, %vm310_vm5  ;;  %652 = vmatpush.msrb.mxu2 %v3699_v58  ;;  %v4125_v58 = vld [vmem:[%s7542_s6 + $0x88] sm:$0xff] }
  0xb8   :  { %v306_v15 = vsub.f32 1.0, %v305_v52  ;;  %429 = vmatpush.msra.mxu0 %v4069_v41 }
  0xb9   :  { %v287_v7 = vmul.f32 %v2556_v33, %v286_v21  ;;  %v296_v21 = vor.u32 1.1754944e-38, %v295_v56  ;;  %v4097_v56 = vld [vmem:[%s7542_s6 + $0xe8] sm:$0xff]  ;;  %653 = vmatpush.msrb.mxu2 %v3717_v55 }
  0xba   :  { %v307_v35 = vmul.f32 %v2558_v45, %v306_v15  ;;  %430 = vmatpush.msra.mxu0 %v4077_v59 }
  0xbb   :  { %v288_v52 = vadd.f32 %v2556_v33, %v287_v7  ;;  %654 = vmatpush.msrb.mxu2 %v3735_v60 }
  0xbc   :  { %v308_v7 = vadd.f32 %v2558_v45, %v307_v35  ;;  %431 = vmatpush.msra.mxu0 %v4088_v34 }
  0xbd   :  { %v292_v15 = vsel %vm291_vm2, %v2556_v33, %v288_v52  ;;  %655 = vmatpush.msrb.mxu2 %v3753_v51 }
  0xbe   :  { %v297_v57 = vsel %vm294_vm3, %v296_v21, %v292_v15  ;;  %432 = vmatpush.msra.mxu0 %v4097_v56  ;;  %v312_v52 = vsel %vm311_vm6, %v2558_v45, %v308_v7  ;;  %v4118_v45 = vld [vmem:[%s7542_s6 + $0xa0] sm:$0xff]  ;;  %v4142_v7 = vld [vmem:[%s7542_s6 + $0x58] sm:$0xff] }
  0xbf   :  { %v319_v33 = vmul.f32 %v297_v57, %v277_v61  ;;  %v4104_v61 = vld [vmem:[%s7542_s6 + $0xd0] sm:$0xff]  ;;  %v317_v21 = vsel %vm314_vm7, %v316_v63, %v312_v52  ;;  %656 = vmatpush.msrb.mxu2 %v3777_v46  ;;  %v4151_v46 = vld [vmem:[%s7542_s6 + $0x40] sm:$0xff]  ;;  %v7948_v52 = vld [vmem:[#allocation20_spill] sm:$0xff] }
  0xc0   :  { %433 = vmatpush.msra.mxu0 %v4104_v61  ;;  %v322_v55 = vsub.f32 1.0, %v317_v21  ;;  %v4133_v57 = vld [vmem:[%s7542_s6 + $0x70] sm:$0xff]  ;;  %7931 = vst [vmem:[#allocation79_spill] sm:$0xff] %v4151_v46 }
  0xc1   :  { %v320_v35 = vadd.f32 %v319_v33, %v218_v31  ;;  %v324_v31 = vmul.f32 %v317_v21, %v3502_v50  ;;  %657 = vmatpush.msrb.mxu2 %v3796_v62  ;;  %v4158_v50 = vld [vmem:[%s7542_s6 + $0x28] sm:$0xff]  ;;  %v7941_v62 = vld [vmem:[#allocation15_spill] sm:$0xff]  ;;  %v7945_v33 = vld [vmem:[#allocation66_spill] sm:$0xff] }
  0xc2   :  { %434 = vmatpush.msra.mxu0 %v4111_v11  ;;  %7932 = vst [vmem:[#allocation80_spill] sm:$0xff] %v4158_v50  ;;  %v7949_v63 = vld [vmem:[#allocation25_spill] sm:$0xff]  ;;  %v7951_v21 = vld [vmem:[#allocation39_spill] sm:$0xff] }
  0xc3   :  { %2559 = vtanh.f32 %v320_v35  ;;  %658 = vmatpush.msrb.mxu2 %v3815_v42  ;;  %v4165_v42 = vld [vmem:[%s7542_s6 + $0x10] sm:$0xff] }
  0xc4   :  { %435 = vmatpush.msra.mxu0 %v4118_v45  ;;  %7933 = vst [vmem:[#allocation81_spill] sm:$0xff] %v4165_v42  ;;  %v7947_v35 = vld [vmem:[#allocation21_spill] sm:$0xff] }
  0xc5   :  { %659 = vmatpush.msrb.mxu2 %v3834_v38  ;;  %v7940_v38 = vld [vmem:[#allocation11_spill] sm:$0xff] }
  0xc6   :  { %436 = vmatpush.msra.mxu0 %v4125_v58 }
  0xc8   :  { %437 = vmatpush.msra.mxu0 %v4133_v57 }
  0xc9   :  { %v2560_v15 = vpop.eup %2559 }
  0xca   :  { %v323_v60 = vmul.f32 %v2560_v15, %v322_v55  ;;  %438 = vmatpush.msra.mxu0 %v4142_v7  ;;  %v7953_v55 = vld [vmem:[#allocation41_spill] sm:$0xff]  ;;  %v7955_v15 = vld [vmem:[#allocation43_spill] sm:$0xff] }
  0xcc   :  { %v4137_v51 = vadd.f32 %v324_v31, %v323_v60  ;;  %439 = vmatpush.msra.mxu0 %v4151_v46  ;;  %v7957_v60 = vld [vmem:[#allocation45_spill] sm:$0xff]  ;;  %v7959_v31 = vld [vmem:[#allocation47_spill] sm:$0xff] }
  0xce   :  { %342 = vmatmul.f32.vlgmr.msra.gmra.mxu3 %v4137_v51  ;;  %362 = vmatmul.f32.vlgmr.msrb.gmra.mxu0 %v4137_v51 }
  0xcf   :  { %382 = vmatmul.f32.vlgmr.msrb.gmra.mxu1 %v4137_v51  ;;  %533 = vmatmul.f32.vlgmr.msra.gmra.mxu2 %v4137_v51 }
  0xd0   :  { %537 = vmatpush.msra.mxu3 %v3274_v12  ;;  %624 = vmatpush.msrb.mxu1 %v3765_v47  ;;  %v7935_v12 = vld [vmem:[#allocation3_spill] sm:$0xff] }
  0xd1   :  { %440 = vmatpush.msra.mxu0 %v4158_v50  ;;  %775 = vmatpush.msra.mxu2 %v3206_v0  ;;  %v7934_v0 = vld [vmem:[#allocation60_spill] sm:$0xff] }
  0xd2   :  { %538 = vmatpush.msra.mxu3 %v3281_v13  ;;  %625 = vmatpush.msrb.mxu1 %v3784_v43  ;;  %v7936_v13 = vld [vmem:[#allocation9_spill] sm:$0xff] }
  0xd3   :  { %441 = vmatpush.msra.mxu0 %v4165_v42  ;;  %776 = vmatpush.msra.mxu2 %v7935_v12  ;;  %v7961_v12 = vld [vmem:[#allocation49_spill] sm:$0xff] }
  0xd4   :  { %539 = vmatpush.msra.mxu3 %v3299_v16  ;;  %626 = vmatpush.msrb.mxu1 %v3803_v1  ;;  %v7937_v16 = vld [vmem:[#allocation12_spill] sm:$0xff] }
  0xd5   :  { %604 = vmatpush.msrb.mxu0 %v3351_v25  ;;  %v7938_v25 = vld [vmem:[#allocation62_spill] sm:$0xff] }
  0xd6   :  { %540 = vmatpush.msra.mxu3 %v3317_v19  ;;  %442 = vmatmul.f32.vlgmr.msra.gmra.mxu0 %v3970_v4  ;;  %v7939_v19 = vld [vmem:[#allocation4_spill] sm:$0xff] }
  0xd7   :  { %422 = vmatmul.f32.vlgmr.msrb.gmra.mxu3 %v3970_v4  ;;  %513 = vmatmul.f32.vlgmr.msra.gmra.mxu1 %v4137_v51 }
  0xd8   :  { %541 = vmatpush.msra.mxu3 %v3335_v22  ;;  %605 = vmatpush.msrb.mxu0 %v3363_v27  ;;  %v7943_v22 = vld [vmem:[#allocation14_spill] sm:$0xff] }
  0xd9   :  { %627 = vmatpush.msrb.mxu1 %v7934_v0  ;;  %777 = vmatpush.msra.mxu2 %v7939_v19  ;;  %v7944_v27 = vld [vmem:[#allocation18_spill] sm:$0xff]  ;;  %v7967_v19 = vld [vmem:[#allocation55_spill] sm:$0xff] }
  0xda   :  { %542 = vmatpush.msra.mxu3 %v7936_v13  ;;  %606 = vmatpush.msrb.mxu0 %v7937_v16  ;;  %v7963_v13 = vld [vmem:[#allocation51_spill] sm:$0xff]  ;;  %v7965_v16 = vld [vmem:[#allocation53_spill] sm:$0xff] }
  0xdb   :  { %628 = vmatpush.msrb.mxu1 %v7938_v25  ;;  %778 = vmatpush.msra.mxu2 %v3240_v6  ;;  %v7950_v6 = vld [vmem:[#allocation24_spill] sm:$0xff] }
  0xdc   :  { %543 = vmatpush.msra.mxu3 %v7940_v38  ;;  %607 = vmatpush.msrb.mxu0 %v7941_v62  ;;  %v7968_v38 = vld [vmem:[#allocation57_spill] sm:$0xff]  ;;  %v7969_v62 = vld [vmem:[#allocation35_spill] sm:$0xff] }
  0xdd   :  { %629 = vmatpush.msrb.mxu1 %v7942_v44  ;;  %779 = vmatpush.msra.mxu2 %v3252_v8  ;;  %v7952_v8 = vld [vmem:[#allocation27_spill] sm:$0xff] }
  0xde   :  { %544 = vmatpush.msra.mxu3 %v7943_v22  ;;  %608 = vmatpush.msrb.mxu0 %v7944_v27  ;;  %v7970_v22 = vld [vmem:[#allocation22_spill] sm:$0xff]  ;;  %v7972_v27 = vld [vmem:[#allocation36_spill] sm:$0xff] }
  0xdf   :  { %630 = vmatpush.msrb.mxu1 %v7945_v33  ;;  %780 = vmatpush.msra.mxu2 %v3264_v10  ;;  %v7954_v10 = vld [vmem:[#allocation28_spill] sm:$0xff] }
  0xe0   :  { %545 = vmatpush.msra.mxu3 %v7946_v53  ;;  %609 = vmatpush.msrb.mxu0 %v7947_v35  ;;  %v7974_v53 = vld [vmem:[#allocation37_spill] sm:$0xff] }
  0xe1   :  { %631 = vmatpush.msrb.mxu1 %v3894_v9  ;;  %781 = vmatpush.msra.mxu2 %v3286_v14  ;;  %v7956_v14 = vld [vmem:[#allocation29_spill] sm:$0xff] }
  0xe2   :  { %546 = vmatpush.msra.mxu3 %v7948_v52  ;;  %610 = vmatpush.msrb.mxu0 %v7949_v63  ;;  %v7975_v35 = vld [vmem:[#allocation61_spill] sm:$0xff]  ;;  %v7976_v52 = vld [vmem:[#allocation38_spill] sm:$0xff]  ;;  %v7977_v63 = vld [vmem:[#allocation63_spill] sm:$0xff] }
  0xe3   :  { %632 = vmatpush.msrb.mxu1 %v3916_v2  ;;  %782 = vmatpush.msra.mxu2 %v3304_v17  ;;  %v7958_v17 = vld [vmem:[#allocation30_spill] sm:$0xff] }
  0xe4   :  { %547 = vmatpush.msra.mxu3 %v7950_v6  ;;  %611 = vmatpush.msrb.mxu0 %v7951_v21  ;;  %v7978_v6 = vld [vmem:[#allocation40_spill] sm:$0xff]  ;;  %v7979_v21 = vld [vmem:[#allocation65_spill] sm:$0xff] }
  0xe5   :  { %633 = vmatpush.msrb.mxu1 %v3930_v5  ;;  %783 = vmatpush.msra.mxu2 %v3322_v20  ;;  %v7960_v20 = vld [vmem:[#allocation31_spill] sm:$0xff] }
  0xe6   :  { %548 = vmatpush.msra.mxu3 %v7952_v8  ;;  %612 = vmatpush.msrb.mxu0 %v7953_v55  ;;  %v7981_v8 = vld [vmem:[#allocation67_spill] sm:$0xff]  ;;  %v7982_v55 = vld [vmem:[#allocation44_spill] sm:$0xff] }
  0xe7   :  { %634 = vmatpush.msrb.mxu1 %v3944_v30  ;;  %784 = vmatpush.msra.mxu2 %v3340_v23  ;;  %v7962_v23 = vld [vmem:[#allocation32_spill] sm:$0xff] }
  0xe8   :  { %549 = vmatpush.msra.mxu3 %v7954_v10  ;;  %613 = vmatpush.msrb.mxu0 %v7955_v15  ;;  %v7983_v10 = vld [vmem:[#allocation70_spill] sm:$0xff] }
  0xe9   :  { %635 = vmatpush.msrb.mxu1 %v3958_v39  ;;  %785 = vmatpush.msra.mxu2 %v3368_v28  ;;  %v7964_v28 = vld [vmem:[#allocation33_spill] sm:$0xff]  ;;  %v7984_v15 = vld [vmem:[#allocation46_spill] sm:$0xff] }
  0xea   :  { %550 = vmatpush.msra.mxu3 %v7956_v14  ;;  %614 = vmatpush.msrb.mxu0 %v7957_v60  ;;  %v7985_v14 = vld [vmem:[#allocation71_spill] sm:$0xff]  ;;  %v7986_v60 = vld [vmem:[#allocation48_spill] sm:$0xff] }
  0xeb   :  { %636 = vmatpush.msrb.mxu1 %v3977_v24  ;;  %786 = vmatpush.msra.mxu2 %v3392_v32  ;;  %v7966_v32 = vld [vmem:[#allocation34_spill] sm:$0xff] }
  0xec   :  { %551 = vmatpush.msra.mxu3 %v7958_v17  ;;  %615 = vmatpush.msrb.mxu0 %v7959_v31  ;;  %v7987_v17 = vld [vmem:[#allocation72_spill] sm:$0xff]  ;;  %v7988_v31 = vld [vmem:[#allocation50_spill] sm:$0xff] }
  0xed   :  { %637 = vmatpush.msrb.mxu1 %v3991_v29  ;;  %787 = vmatpush.msra.mxu2 %v3416_v36  ;;  %v7971_v36 = vld [vmem:[#allocation58_spill] sm:$0xff] }
  0xee   :  { %552 = vmatpush.msra.mxu3 %v7960_v20  ;;  %616 = vmatpush.msrb.mxu0 %v7961_v12  ;;  %v7989_v20 = vld [vmem:[#allocation73_spill] sm:$0xff]  ;;  %v7990_v12 = vld [vmem:[#allocation52_spill] sm:$0xff] }
  0xef   :  { %553 = vmatmul.f32.vlgmr.msra.gmra.mxu3 %v4137_v51  ;;  %638 = vmatpush.msrb.mxu1 %v4005_v18 }
  0xf0   :  { %664 = vmatpush.msrb.mxu3 %v7962_v23  ;;  %617 = vmatpush.msrb.mxu0 %v7963_v13  ;;  %v7991_v23 = vld [vmem:[#allocation74_spill] sm:$0xff] }
  0xf1   :  { %639 = vmatpush.msrb.mxu1 %v4017_v37  ;;  %788 = vmatpush.msra.mxu2 %v3440_v40  ;;  %v7973_v40 = vld [vmem:[#allocation59_spill] sm:$0xff]  ;;  %v7992_v13 = vld [vmem:[#allocation54_spill] sm:$0xff] }
  0xf2   :  { %665 = vmatpush.msrb.mxu3 %v7964_v28  ;;  %618 = vmatpush.msrb.mxu0 %v7965_v16  ;;  %v7993_v28 = vld [vmem:[#allocation75_spill] sm:$0xff]  ;;  %v7994_v16 = vld [vmem:[#allocation56_spill] sm:$0xff] }
  0xf3   :  { %704 = vmatpush.msra.mxu1 %v4042_v26  ;;  %789 = vmatpush.msra.mxu2 %v7970_v22  ;;  %v4299_v22 = vld [vmem:[%s7539_s2 + $0x140] sm:$0xff] }
  0xf4   :  { %666 = vmatpush.msrb.mxu3 %v7966_v32  ;;  %619 = vmatpush.msrb.mxu0 %v7967_v19  ;;  %v4283_v32 = vld [vmem:[%s7539_s2 + $0x170] sm:$0xff]  ;;  %v7996_v19 = vld [vmem:[#allocation76_spill] sm:$0xff]  ;;  %7999 = vst [vmem:[#allocation9_spill] sm:$0xff] %v4299_v22 }
  0xf5   :  { %705 = vmatpush.msra.mxu1 %v4051_v54  ;;  %790 = vmatpush.msra.mxu2 %v3488_v48  ;;  %v7980_v48 = vld [vmem:[#allocation42_spill] sm:$0xff]  ;;  %7995 = vst [vmem:[#allocation60_spill] sm:$0xff] %v4283_v32 }
  0xf6   :  { %684 = vmatpush.msra.mxu0 %v7968_v38  ;;  %667 = vmatpush.msrb.mxu3 %v7969_v62  ;;  %v4291_v38 = vld [vmem:[%s7539_s2 + $0x158] sm:$0xff]  ;;  %v7998_v62 = vld [vmem:[#allocation77_spill] sm:$0xff] }
  0xf7   :  { %706 = vmatpush.msra.mxu1 %v4062_v3  ;;  %7997 = vst [vmem:[#allocation3_spill] sm:$0xff] %v4291_v38 }
  0xf8   :  { %685 = vmatpush.msra.mxu0 %v7971_v36  ;;  %668 = vmatpush.msrb.mxu3 %v7972_v27  ;;  %v8000_v36 = vld [vmem:[#allocation78_spill] sm:$0xff]  ;;  %v4306_v27 = vld [vmem:[%s7539_s2 + $0x128] sm:$0xff] }
  0xf9   :  { %707 = vmatpush.msra.mxu1 %v4069_v41  ;;  %8001 = vst [vmem:[#allocation12_spill] sm:$0xff] %v4306_v27 }
  0xfa   :  { %686 = vmatpush.msra.mxu0 %v7973_v40  ;;  %669 = vmatpush.msrb.mxu3 %v7974_v53  ;;  %v4312_v40 = vld [vmem:[%s7539_s2 + $0x110] sm:$0xff]  ;;  %v4318_v53 = vld [vmem:[%s7539_s2 + $0xf8] sm:$0xff] }
  0xfb   :  { %708 = vmatpush.msra.mxu1 %v4077_v59  ;;  %8002 = vst [vmem:[#allocation62_spill] sm:$0xff] %v4312_v40 }
  0xfc   :  { %687 = vmatpush.msra.mxu0 %v7975_v35  ;;  %670 = vmatpush.msrb.mxu3 %v7976_v52  ;;  %8003 = vst [vmem:[#allocation4_spill] sm:$0xff] %v4318_v53  ;;  %v8004_v35 = vld [vmem:[#allocation5_spill] sm:$0xff]  ;;  %v8005_v52 = vld [vmem:[#allocation6_spill] sm:$0xff] }
  0xfd   :  { %709 = vmatpush.msra.mxu1 %v4088_v34 }
  0xfe   :  { %688 = vmatpush.msra.mxu0 %v7977_v63  ;;  %671 = vmatpush.msrb.mxu3 %v7978_v6  ;;  %v8006_v63 = vld [vmem:[#allocation7_spill] sm:$0xff]  ;;  %v8007_v6 = vld [vmem:[#allocation8_spill] sm:$0xff] }
  0xff   :  { %710 = vmatpush.msra.mxu1 %v4097_v56 }
 0x100   :  { %689 = vmatpush.msra.mxu0 %v7979_v21  ;;  %672 = vmatpush.msrb.mxu3 %v7980_v48  ;;  %v8008_v21 = vld [vmem:[#allocation10_spill] sm:$0xff]  ;;  %v8009_v48 = vld [vmem:[#allocation13_spill] sm:$0xff] }
 0x101   :  { %711 = vmatpush.msra.mxu1 %v4104_v61 }
 0x102   :  { %690 = vmatpush.msra.mxu0 %v7981_v8  ;;  %673 = vmatpush.msrb.mxu3 %v7982_v55  ;;  %v8010_v8 = vld [vmem:[#allocation16_spill] sm:$0xff]  ;;  %v8011_v55 = vld [vmem:[#allocation19_spill] sm:$0xff] }
 0x103   :  { %712 = vmatpush.msra.mxu1 %v4111_v11 }
 0x104   :  { %691 = vmatpush.msra.mxu0 %v7983_v10  ;;  %674 = vmatpush.msrb.mxu3 %v7984_v15  ;;  %v8012_v10 = vld [vmem:[#allocation23_spill] sm:$0xff]  ;;  %v8013_v15 = vld [vmem:[#allocation26_spill] sm:$0xff] }
 0x105   :  { %713 = vmatpush.msra.mxu1 %v4118_v45 }
 0x106   :  { %692 = vmatpush.msra.mxu0 %v7985_v14  ;;  %675 = vmatpush.msrb.mxu3 %v7986_v60  ;;  %v205_v60 = vld [vmem:[%s7545_s7] sm:$0x7] }
 0x107   :  { %714 = vmatpush.msra.mxu1 %v4125_v58 }
 0x108   :  { %693 = vmatpush.msra.mxu0 %v7987_v17  ;;  %676 = vmatpush.msrb.mxu3 %v7988_v31  ;;  %v4334_v17 = vperm.slane %v205_v60, 0 }
 0x109   :  { %715 = vmatpush.msra.mxu1 %v4133_v57 }
 0x10a   :  { %694 = vmatpush.msra.mxu0 %v7989_v20  ;;  %677 = vmatpush.msrb.mxu3 %v7990_v12  ;;  %8014 = vst [vmem:[#allocation11_spill] sm:$0xff] %v4334_v17  ;;  %v197_v20 = vld [vmem:[%s7546_s5] sm:$0x7] }
 0x10b   :  { %716 = vmatpush.msra.mxu1 %v4142_v7  ;;  %v4341_v12 = vperm.slane %v197_v20, 0 }
 0x10c   :  { %695 = vmatpush.msra.mxu0 %v7991_v23  ;;  %678 = vmatpush.msrb.mxu3 %v7992_v13 }
 0x10d   :  { %717 = vmatpush.msra.mxu1 %v4151_v46  ;;  %8015 = vst [vmem:[#allocation15_spill] sm:$0xff] %v4341_v12 }
 0x10e   :  { %696 = vmatpush.msra.mxu0 %v7993_v28  ;;  %679 = vmatpush.msrb.mxu3 %v7994_v16 }
 0x10f   :  { %718 = vmatpush.msra.mxu1 %v4158_v50 }
 0x110   :  { %795 = vmatpush.msra.mxu3 %v4283_v32  ;;  %697 = vmatpush.msra.mxu0 %v7996_v19 }
 0x111   :  { %719 = vmatpush.msra.mxu1 %v4165_v42 }
 0x112   :  { %796 = vmatpush.msra.mxu3 %v4291_v38  ;;  %698 = vmatpush.msra.mxu0 %v7998_v62 }
 0x114   :  { %797 = vmatpush.msra.mxu3 %v4299_v22  ;;  %699 = vmatpush.msra.mxu0 %v8000_v36 }
 0x116   :  { %798 = vmatpush.msra.mxu3 %v4306_v27 }
 0x118   :  { %799 = vmatpush.msra.mxu3 %v4312_v40  ;;  %v4355_v40 = vperm.slane %v205_v60, 1 }
 0x11a   :  { %800 = vmatpush.msra.mxu3 %v4318_v53  ;;  %8019 = vst [vmem:[#allocation14_spill] sm:$0xff] %v4355_v40 }
 0x11c   :  { %801 = vmatpush.msra.mxu3 %v8004_v35 }
 0x11e   :  { %802 = vmatpush.msra.mxu3 %v8005_v52  ;;  %v2501_v52 = vld [vmem:[%s7544_s0 + $0x20] sm:$0xff] }
 0x120   :  { %803 = vmatpush.msra.mxu3 %v8006_v63 }
 0x122   :  { %804 = vmatpush.msra.mxu3 %v8007_v6  ;;  %v8016_v6 = vld [vmem:[#allocation69_spill] sm:$0xff] }
 0x124   :  { %805 = vmatpush.msra.mxu3 %v8008_v21 }
 0x126   :  { %806 = vmatpush.msra.mxu3 %v8009_v48 }
 0x128   :  { %807 = vmatpush.msra.mxu3 %v8010_v8  ;;  %v2500_v8 = vld [vmem:[%s7544_s0 + $0x18] sm:$0xff] }
 0x129   :  { %v403_v14 = vpop.f32.mrf.mxu2 }
 0x12a   :  { %808 = vmatpush.msra.mxu3 %v8011_v55  ;;  %v404_v13 = vadd.f32 %v403_v14, %v4334_v17  ;;  %v4353_v17 = vperm.slane %v197_v20, 1 }
 0x12c   :  { %809 = vmatpush.msra.mxu3 %v8012_v10  ;;  %8018 = vst [vmem:[#allocation64_spill] sm:$0xff] %v4353_v17 }
 0x12e   :  { %810 = vmatpush.msra.mxu3 %v8013_v15  ;;  %v8017_v15 = vld [vmem:[#allocation68_spill] sm:$0xff] }
 0x14b   :  { %v363_v27 = vpop.f32.mrf.mxu0 }
 0x14c   :  { %v4336_v31 = vpop.f32.mrf.mxu1 }
 0x151   :  { %v343_v16 = vpop.f32.mrf.mxu3 }
 0x152   :  { %v344_v35 = vadd.f32 %v343_v16, %v4341_v12  ;;  %v534_v63 = vpop.f32.mrf.mxu2 }
 0x153   :  { %v535_v21 = vadd.f32 %v534_v63, %v8016_v6 }
 0x154   :  { %v446_v48 = vadd.f32 %v404_v13, %v344_v35  ;;  %v514_v55 = vpop.f32.mrf.mxu1  ;;  %v364_v35 = vadd.f32 %v363_v27, %v4353_v17  ;;  %v4371_v17 = vperm.slane %v197_v20, 2 }
 0x155   :  { %v577_v10 = vadd.f32 %v2501_v52, %v535_v21  ;;  %v515_v53 = vadd.f32 %v514_v55, %v8017_v15 }
 0x156   :  { %v2498_v14 = vmul.f32 -1.442695, %v446_v48  ;;  %8021 = vst [vmem:[#allocation66_spill] sm:$0xff] %v4371_v17 }
 0x157   :  { %v2504_v16 = vmul.f32 -1.442695, %v577_v10  ;;  %v557_v12 = vadd.f32 %v2500_v8, %v515_v53 }
 0x158   :  { %2561 = vpow2.f32 %v2498_v14 }
 0x159   :  { %2563 = vpow2.f32 %v2504_v16  ;;  %v2503_v63 = vmul.f32 -1.442695, %v557_v12 }
 0x15a   :  { %v423_v13 = vpop.f32.mrf.mxu3 }
 0x15b   :  { %2565 = vpow2.f32 %v2503_v63  ;;  %v424_v6 = vadd.f32 %v423_v13, %v4355_v40  ;;  %v4368_v13 = vperm.slane %v205_v60, 2 }
 0x15d   :  { %v466_v52 = vadd.f32 %v424_v6, %v364_v35  ;;  %8020 = vst [vmem:[#allocation18_spill] sm:$0xff] %v4368_v13 }
 0x15e   :  { %v2562_v21 = vpop.eup %2561 }
 0x15f   :  { %v2564_v55 = vpop.eup %2563  ;;  %v450_v48 = vadd.f32 1.0, %v2562_v21  ;;  %v2499_v15 = vmul.f32 -1.442695, %v466_v52  ;;  %v443_v52 = vpop.f32.mrf.mxu0 }
 0x160   :  { %v4359_v42 = vadd.f32 1.0, %v2564_v55  ;;  %v444_v50 = vadd.f32 %v443_v52, %v4368_v13 }
 0x161   :  { %v2566_v53 = vpop.eup %2565  ;;  %2567 = vrcp.f32 %v450_v48  ;;  %v460_v21 = vand.u32 2147483647, %v450_v48  ;;  %v462_v55 = vand.u32 2147483648, %v450_v48  ;;  %vm456_vm9 = vweird.f32 %v450_v48 }
 0x162   :  { %2569 = vrcp.f32 %v4359_v42  ;;  %v561_v8 = vadd.f32 1.0, %v2566_v53  ;;  %vm587_vm1 = vweird.f32 %v4359_v42 }
 0x163   :  { %2571 = vpow2.f32 %v2499_v15  ;;  %v463_v60 = vor.u32 1.1754944e-38, %v462_v55  ;;  %vm461_vm12 = vcmp.eq.f32.partialorder %v460_v21, 8.507059e+37 }
 0x164   :  { %2573 = vrcp.f32 %v561_v8  ;;  %v571_v46 = vand.u32 2147483647, %v561_v8  ;;  %vm567_vm13 = vweird.f32 %v561_v8 }
 0x166   :  { %vm572_vm15 = vcmp.eq.f32.partialorder %v571_v46, 8.507059e+37 }
 0x167   :  { %v2568_v12 = vpop.eup %2567 }
 0x168   :  { %v4362_v10 = vpop.eup %2569  ;;  %v452_v27 = vmul.f32 %v2568_v12, %v450_v48  ;;  %vm457_vm8 = vweird.f32 %v2568_v12 }
 0x169   :  { %v2572_v14 = vpop.eup %2571  ;;  %v583_v6 = vmul.f32 %v4362_v10, %v4359_v42  ;;  %vm458_vm10 = vmor %vm456_vm9, %vm457_vm8  ;;  %vm588_vm0 = vweird.f32 %v4362_v10 }
 0x16a   :  { %v2574_v16 = vpop.eup %2573  ;;  %v4366_v63 = vadd.f32 1.0, %v2572_v14  ;;  %v453_v35 = vsub.f32 1.0, %v452_v27  ;;  %v573_v14 = vand.u32 2147483648, %v561_v8  ;;  %vm589_vm2 = vmor %vm587_vm1, %vm588_vm0 }
 0x16b   :  { %v563_v53 = vmul.f32 %v2574_v16, %v561_v8  ;;  %v584_v15 = vsub.f32 1.0, %v583_v6  ;;  %vm568_vm11 = vweird.f32 %v2574_v16  ;;  %v2502_v8 = vld [vmem:[%s7544_s0 + $0x28] sm:$0xff] }
 0x16c   :  { %2575 = vrcp.f32 %v4366_v63  ;;  %v454_v40 = vmul.f32 %v2568_v12, %v453_v35  ;;  %vm569_vm14 = vmor %vm567_vm13, %vm568_vm11  ;;  %v574_v48 = vor.u32 1.1754944e-38, %v573_v14  ;;  %v482_v46 = vand.u32 2147483648, %v4366_v63 }
 0x16d   :  { %v564_v22 = vsub.f32 1.0, %v563_v53  ;;  %v585_v36 = vmul.f32 %v4362_v10, %v584_v15  ;;  %v384_v53 = vadd.f32 %v4336_v31, %v4371_v17  ;;  %vm476_vm4 = vweird.f32 %v4366_v63 }
 0x16e   :  { %v455_v38 = vadd.f32 %v2568_v12, %v454_v40 }
 0x16f   :  { %v565_v27 = vmul.f32 %v2574_v16, %v564_v22  ;;  %v586_v31 = vadd.f32 %v4362_v10, %v585_v36 }
 0x170   :  { %v459_v6 = vsel %vm458_vm10, %v2568_v12, %v455_v38 }
 0x171   :  { %v464_v32 = vsel %vm461_vm12, %v463_v60, %v459_v6  ;;  %v566_v35 = vadd.f32 %v2574_v16, %v565_v27  ;;  %v480_v60 = vand.u32 2147483647, %v4366_v63  ;;  %v483_v6 = vor.u32 1.1754944e-38, %v482_v46  ;;  %v4477_v46 = vld [vmem:[%s7540_s4 + $0x148] sm:$0xff] }
 0x172   :  { %v2576_v20 = vpop.eup %2575  ;;  %v486_v52 = vmul.f32 %v464_v32, %v444_v50  ;;  %v554_v40 = vpop.f32.mrf.mxu3  ;;  %v593_v50 = vand.u32 2147483648, %v4359_v42 }
 0x173   :  { %v472_v55 = vmul.f32 %v2576_v20, %v4366_v63  ;;  %v555_v22 = vadd.f32 %v554_v40, %v4054_v49  ;;  %v570_v13 = vsel %vm569_vm14, %v2574_v16, %v566_v35  ;;  %v591_v16 = vand.u32 2147483647, %v4359_v42 }
 0x174   :  { %v487_v38 = vadd.f32 %v486_v52, %v384_v53  ;;  %v575_v12 = vsel %vm572_vm15, %v574_v48, %v570_v13  ;;  %vm477_vm3 = vweird.f32 %v2576_v20  ;;  %v590_v13 = vsel %vm589_vm2, %v4362_v10, %v586_v31  ;;  %v4423_v31 = vld [vmem:[%s7540_s4 + $0x178] sm:$0xff] }
 0x175   :  { %v473_v32 = vsub.f32 1.0, %v472_v55  ;;  %v597_v21 = vmul.f32 %v575_v12, %v555_v22  ;;  %v594_v36 = vor.u32 1.1754944e-38, %v593_v50  ;;  %vm592_vm5 = vcmp.eq.f32.partialorder %v591_v16, 8.507059e+37  ;;  %vm478_vm6 = vmor %vm476_vm4, %vm477_vm3  ;;  %v4429_v50 = vld [vmem:[%s7540_s4 + $0x150] sm:$0xff]  ;;  %v4465_v16 = vld [vmem:[%s7539_s2 + $0x118] sm:$0xff] }
 0x176   :  { %2577 = vtanh.f32 %v487_v38  ;;  %vm481_vm7 = vcmp.eq.f32.partialorder %v480_v60, 8.507059e+37  ;;  %v4496_v60 = vld [vmem:[%s7540_s4 + $0x130] sm:$0xff] }
 0x177   :  { %v598_v15 = vadd.f32 %v2502_v8, %v597_v21  ;;  %v474_v14 = vmul.f32 %v2576_v20, %v473_v32  ;;  %v595_v35 = vsel %vm592_vm5, %v594_v36, %v590_v13  ;;  %v4442_v32 = vld [vmem:[%s7540_s4 + $0x160] sm:$0xff]  ;;  %v4448_v21 = vld [vmem:[%s7540_s4 + $0x138] sm:$0xff]  ;;  %v4502_v13 = vld [vmem:[%s7539_s2 + $0xe8] sm:$0xff] }
 0x178   :  { %v600_v48 = vsub.f32 1.0, %v595_v35  ;;  %v602_v8 = vmul.f32 %v595_v35, %v4137_v51  ;;  %v4417_v51 = vld [vmem:[%s7539_s2 + $0x160] sm:$0xff]  ;;  %v4515_v36 = vld [vmem:[%s7540_s4 + $0x118] sm:$0xff] }
 0x179   :  { %2579 = vtanh.f32 %v598_v15  ;;  %v475_v27 = vadd.f32 %v2576_v20, %v474_v14  ;;  %v4483_v15 = vld [vmem:[%s7539_s2 + $0x100] sm:$0xff]  ;;  %v4490_v14 = vld [vmem:[%s7540_s4 + $0x108] sm:$0xff]  ;;  %v4540_v35 = vld [vmem:[%s7539_s2 + $0xb8] sm:$0xff] }
 0x17b   :  { %v479_v42 = vsel %vm478_vm6, %v2576_v20, %v475_v27  ;;  %v4404_v20 = vld [vmem:[%s7539_s2 + $0x178] sm:$0xff]  ;;  %v4521_v27 = vld [vmem:[%s7539_s2 + $0xd0] sm:$0xff] }
 0x17c   :  { %v2578_v53 = vpop.eup %2577  ;;  %v484_v52 = vsel %vm481_vm7, %v483_v6, %v479_v42  ;;  %v4534_v6 = vld [vmem:[%s7540_s4 + $0x100] sm:$0xff]  ;;  %v4553_v42 = vld [vmem:[%s7540_s4 + $0xe8] sm:$0xff] }
 0x17d   :  { %v489_v40 = vsub.f32 1.0, %v484_v52  ;;  %v491_v38 = vmul.f32 %v484_v52, %v3970_v4  ;;  %v4410_v4 = vld [vmem:[%s7540_s4 + $0x168] sm:$0xff]  ;;  %v4572_v52 = vld [vmem:[%s7540_s4 + $0xd0] sm:$0xff] }
 0x17f   :  { %v2580_v55 = vpop.eup %2579  ;;  %v490_v22 = vmul.f32 %v2578_v53, %v489_v40  ;;  %v4559_v53 = vld [vmem:[%s7539_s2 + $0xa0] sm:$0xff]  ;;  %v4578_v40 = vld [vmem:[%s7539_s2 + $0x88] sm:$0xff] }
 0x180   :  { %v601_v10 = vmul.f32 %v2580_v55, %v600_v48  ;;  %8022 = vst [vmem:[#allocation17_spill] sm:$0xff] %v4578_v40  ;;  %v4591_v48 = vld [vmem:[%s7540_s4 + $0xb8] sm:$0xff]  ;;  %v4597_v55 = vld [vmem:[%s7539_s2 + $0x70] sm:$0xff] }
 0x181   :  { %v4393_v12 = vadd.f32 %v491_v38, %v490_v22  ;;  %8024 = vst [vmem:[#allocation20_spill] sm:$0xff] %v4597_v55  ;;  %v4610_v22 = vld [vmem:[%s7540_s4 + $0xa0] sm:$0xff]  ;;  %v4616_v38 = vld [vmem:[%s7539_s2 + $0x58] sm:$0xff] }
 0x182   :  { %v4395_v63 = vadd.f32 %v602_v8, %v601_v10  ;;  %8026 = vst [vmem:[#allocation24_spill] sm:$0xff] %v4616_v38  ;;  %v4629_v10 = vld [vmem:[%s7540_s4 + $0x88] sm:$0xff]  ;;  %v4635_v8 = vld [vmem:[%s7539_s2 + $0x40] sm:$0xff] }
 0x183   :  { %680 = vmatmul.f32.vlgmr.msrb.gmra.mxu3 %v4393_v12  ;;  %8028 = vst [vmem:[#allocation27_spill] sm:$0xff] %v4635_v8 }
 0x184   :  { %620 = vmatmul.f32.vlgmr.msrb.gmra.mxu0 %v4395_v63  ;;  %640 = vmatmul.f32.vlgmr.msrb.gmra.mxu1 %v4395_v63 }
 0x185   :  { %660 = vmatmul.f32.vlgmr.msrb.gmra.mxu2 %v4395_v63  ;;  %815 = vmatpush.msrb.mxu0 %v4404_v20 }
 0x186   :  { %882 = vmatpush.msrb.mxu1 %v4410_v4  ;;  %902 = vmatpush.msrb.mxu2 %v3765_v47  ;;  %v4436_v47 = vld [vmem:[%s7539_s2 + $0x148] sm:$0xff] }
 0x187   :  { %816 = vmatpush.msrb.mxu0 %v4417_v51  ;;  %922 = vmatpush.msrb.mxu3 %v4423_v31 }
 0x188   :  { %883 = vmatpush.msrb.mxu1 %v4429_v50  ;;  %903 = vmatpush.msrb.mxu2 %v3784_v43  ;;  %v4456_v43 = vld [vmem:[%s7539_s2 + $0x130] sm:$0xff] }
 0x189   :  { %817 = vmatpush.msrb.mxu0 %v4436_v47  ;;  %923 = vmatpush.msrb.mxu3 %v4442_v32 }
 0x18a   :  { %884 = vmatpush.msrb.mxu1 %v4448_v21  ;;  %904 = vmatpush.msrb.mxu2 %v3803_v1  ;;  %v4471_v1 = vld [vmem:[%s7540_s4 + $0x120] sm:$0xff] }
 0x18b   :  { %811 = vmatmul.f32.vlgmr.msra.gmra.mxu3 %v4395_v63  ;;  %818 = vmatpush.msrb.mxu0 %v4456_v43 }
 0x18c   :  { %700 = vmatmul.f32.vlgmr.msra.gmra.mxu0 %v4393_v12  ;;  %720 = vmatmul.f32.vlgmr.msra.gmra.mxu1 %v4393_v12 }
 0x18d   :  { %791 = vmatmul.f32.vlgmr.msra.gmra.mxu2 %v4395_v63  ;;  %819 = vmatpush.msrb.mxu0 %v4465_v16 }
 0x18e   :  { %885 = vmatpush.msrb.mxu1 %v4471_v1  ;;  %924 = vmatpush.msrb.mxu3 %v4477_v46 }
 0x18f   :  { %820 = vmatpush.msrb.mxu0 %v4483_v15  ;;  %905 = vmatpush.msrb.mxu2 %v7934_v0  ;;  %v4509_v0 = vld [vmem:[%s7540_s4 + $0xf0] sm:$0xff] }
 0x190   :  { %886 = vmatpush.msrb.mxu1 %v4490_v14  ;;  %925 = vmatpush.msrb.mxu3 %v4496_v60 }
 0x191   :  { %821 = vmatpush.msrb.mxu0 %v4502_v13  ;;  %906 = vmatpush.msrb.mxu2 %v7938_v25  ;;  %v4528_v25 = vld [vmem:[%s7540_s4 + $0xd8] sm:$0xff] }
 0x192   :  { %887 = vmatpush.msrb.mxu1 %v4509_v0  ;;  %926 = vmatpush.msrb.mxu3 %v4515_v36 }
 0x193   :  { %822 = vmatpush.msrb.mxu0 %v4521_v27  ;;  %907 = vmatpush.msrb.mxu2 %v7942_v44  ;;  %v4547_v44 = vld [vmem:[%s7540_s4 + $0xc0] sm:$0xff] }
 0x194   :  { %888 = vmatpush.msrb.mxu1 %v4528_v25  ;;  %927 = vmatpush.msrb.mxu3 %v4534_v6 }
 0x195   :  { %823 = vmatpush.msrb.mxu0 %v4540_v35  ;;  %908 = vmatpush.msrb.mxu2 %v7945_v33  ;;  %v4566_v33 = vld [vmem:[%s7540_s4 + $0xa8] sm:$0xff] }
 0x196   :  { %889 = vmatpush.msrb.mxu1 %v4547_v44  ;;  %928 = vmatpush.msrb.mxu3 %v4553_v42 }
 0x197   :  { %824 = vmatpush.msrb.mxu0 %v4559_v53  ;;  %909 = vmatpush.msrb.mxu2 %v3894_v9  ;;  %v4585_v9 = vld [vmem:[%s7540_s4 + $0x90] sm:$0xff] }
 0x198   :  { %890 = vmatpush.msrb.mxu1 %v4566_v33  ;;  %929 = vmatpush.msrb.mxu3 %v4572_v52  ;;  %8023 = vst [vmem:[#allocation21_spill] sm:$0xff] %v4585_v9 }
 0x199   :  { %825 = vmatpush.msrb.mxu0 %v4578_v40  ;;  %910 = vmatpush.msrb.mxu2 %v3916_v2  ;;  %v4604_v2 = vld [vmem:[%s7540_s4 + $0x78] sm:$0xff] }
 0x19a   :  { %891 = vmatpush.msrb.mxu1 %v4585_v9  ;;  %930 = vmatpush.msrb.mxu3 %v4591_v48  ;;  %8025 = vst [vmem:[#allocation25_spill] sm:$0xff] %v4604_v2 }
 0x19b   :  { %826 = vmatpush.msrb.mxu0 %v4597_v55  ;;  %911 = vmatpush.msrb.mxu2 %v3930_v5  ;;  %v4623_v5 = vld [vmem:[%s7540_s4 + $0x60] sm:$0xff] }
 0x19c   :  { %892 = vmatpush.msrb.mxu1 %v4604_v2  ;;  %931 = vmatpush.msrb.mxu3 %v4610_v22  ;;  %8027 = vst [vmem:[#allocation39_spill] sm:$0xff] %v4623_v5 }
 0x19d   :  { %827 = vmatpush.msrb.mxu0 %v4616_v38  ;;  %912 = vmatpush.msrb.mxu2 %v3944_v30  ;;  %v4642_v30 = vld [vmem:[%s7540_s4 + $0x48] sm:$0xff]  ;;  %v8106_v38 = vld [vmem:[#allocation18_spill] sm:$0xff] }
 0x19e   :  { %893 = vmatpush.msrb.mxu1 %v4623_v5  ;;  %932 = vmatpush.msrb.mxu3 %v4629_v10  ;;  %8029 = vst [vmem:[#allocation41_spill] sm:$0xff] %v4642_v30  ;;  %v4648_v5 = vld [vmem:[%s7540_s4 + $0x70] sm:$0xff] }
 0x19f   :  { %828 = vmatpush.msrb.mxu0 %v4635_v8  ;;  %913 = vmatpush.msrb.mxu2 %v3958_v39  ;;  %v4654_v8 = vld [vmem:[%s7539_s2 + $0x28] sm:$0xff]  ;;  %v4661_v39 = vld [vmem:[%s7540_s4 + $0x30] sm:$0xff] }
 0x1a0   :  { %894 = vmatpush.msrb.mxu1 %v4642_v30  ;;  %933 = vmatpush.msrb.mxu3 %v4648_v5  ;;  %8030 = vst [vmem:[#allocation28_spill] sm:$0xff] %v4654_v8  ;;  %v4667_v30 = vld [vmem:[%s7540_s4 + $0x58] sm:$0xff] }
 0x1a1   :  { %829 = vmatpush.msrb.mxu0 %v4654_v8  ;;  %914 = vmatpush.msrb.mxu2 %v3977_v24  ;;  %8031 = vst [vmem:[#allocation43_spill] sm:$0xff] %v4661_v39  ;;  %v4673_v8 = vld [vmem:[%s7539_s2 + $0x10] sm:$0xff]  ;;  %v4681_v24 = vld [vmem:[%s7540_s4 + $0x18] sm:$0xff] }
 0x1a2   :  { %895 = vmatpush.msrb.mxu1 %v4661_v39  ;;  %934 = vmatpush.msrb.mxu3 %v4667_v30  ;;  %8032 = vst [vmem:[#allocation29_spill] sm:$0xff] %v4673_v8  ;;  %v4687_v39 = vld [vmem:[%s7542_s6 + $0x168] sm:$0xff] }
 0x1a3   :  { %830 = vmatpush.msrb.mxu0 %v4673_v8  ;;  %915 = vmatpush.msrb.mxu2 %v3991_v29  ;;  %8033 = vst [vmem:[#allocation45_spill] sm:$0xff] %v4681_v24  ;;  %v4693_v29 = vld [vmem:[%s7540_s4 + $0x40] sm:$0xff] }
 0x1a4   :  { %831 = vmatmul.f32.vlgmr.msrb.gmra.mxu0 %v4395_v63  ;;  %896 = vmatpush.msrb.mxu1 %v4681_v24  ;;  %8034 = vst [vmem:[#allocation30_spill] sm:$0xff] %v4687_v39  ;;  %v4699_v8 = vld [vmem:[%s7540_s4] sm:$0xff]  ;;  %v4712_v24 = vld [vmem:[%s7542_s6 + $0x170] sm:$0xff] }
 0x1a5   :  { %942 = vmatpush.msra.mxu0 %v4687_v39  ;;  %935 = vmatpush.msrb.mxu3 %v4693_v29  ;;  %8035 = vst [vmem:[#allocation47_spill] sm:$0xff] %v4699_v8  ;;  %v4706_v39 = vld [vmem:[%s7542_s6 + $0x150] sm:$0xff] }
 0x1a6   :  { %897 = vmatpush.msrb.mxu1 %v4699_v8  ;;  %916 = vmatpush.msrb.mxu2 %v4005_v18  ;;  %8036 = vst [vmem:[#allocation31_spill] sm:$0xff] %v4706_v39  ;;  %v4718_v8 = vld [vmem:[%s7540_s4 + $0x28] sm:$0xff]  ;;  %v4725_v18 = vld [vmem:[%s7542_s6 + $0x138] sm:$0xff] }
 0x1a7   :  { %943 = vmatpush.msra.mxu0 %v4706_v39  ;;  %8037 = vst [vmem:[#allocation49_spill] sm:$0xff] %v4712_v24  ;;  %936 = vmatpush.msrb.mxu3 %v4718_v8  ;;  %v4731_v39 = vld [vmem:[%s7542_s6 + $0x158] sm:$0xff] }
 0x1a8   :  { %962 = vmatpush.msra.mxu1 %v4712_v24  ;;  %8038 = vst [vmem:[#allocation32_spill] sm:$0xff] %v4718_v8  ;;  %917 = vmatpush.msrb.mxu2 %v4017_v37  ;;  %v4737_v24 = vld [vmem:[%s7540_s4 + $0x10] sm:$0xff]  ;;  %v4744_v37 = vld [vmem:[%s7542_s6 + $0x120] sm:$0xff] }
 0x1a9   :  { %8039 = vst [vmem:[#allocation51_spill] sm:$0xff] %v4725_v18  ;;  %944 = vmatpush.msra.mxu0 %v4725_v18  ;;  %937 = vmatpush.msrb.mxu3 %v4737_v24  ;;  %v4750_v18 = vld [vmem:[%s7542_s6 + $0x140] sm:$0xff] }
 0x1aa   :  { %8040 = vst [vmem:[#allocation33_spill] sm:$0xff] %v4731_v39  ;;  %963 = vmatpush.msra.mxu1 %v4731_v39  ;;  %982 = vmatpush.msra.mxu2 %v4042_v26  ;;  %v4756_v39 = vld [vmem:[%s7539_s2 + $0x168] sm:$0xff] }
 0x1ab   :  { %8041 = vst [vmem:[#allocation53_spill] sm:$0xff] %v4737_v24  ;;  %945 = vmatpush.msra.mxu0 %v4744_v37  ;;  %1053 = vmatpush.msra.mxu3 %v4756_v39  ;;  %v4763_v26 = vld [vmem:[%s7542_s6 + $0x108] sm:$0xff] }
 0x1ac   :  { %8042 = vst [vmem:[#allocation34_spill] sm:$0xff] %v4744_v37  ;;  %964 = vmatpush.msra.mxu1 %v4750_v18  ;;  %983 = vmatpush.msra.mxu2 %v4051_v54  ;;  %v4769_v37 = vld [vmem:[%s7542_s6 + $0x128] sm:$0xff]  ;;  %v4782_v54 = vld [vmem:[%s7542_s6 + $0xf0] sm:$0xff] }
 0x1ad   :  { %8043 = vst [vmem:[#allocation55_spill] sm:$0xff] %v4750_v18  ;;  %946 = vmatpush.msra.mxu0 %v4763_v26  ;;  %v4775_v18 = vld [vmem:[%s7539_s2 + $0x150] sm:$0xff] }
 0x1ae   :  { %8044 = vst [vmem:[#allocation57_spill] sm:$0xff] %v4756_v39  ;;  %965 = vmatpush.msra.mxu1 %v4769_v37  ;;  %1054 = vmatpush.msra.mxu3 %v4775_v18 }
 0x1af   :  { %8045 = vst [vmem:[#allocation35_spill] sm:$0xff] %v4763_v26  ;;  %984 = vmatpush.msra.mxu2 %v4062_v3  ;;  %947 = vmatpush.msra.mxu0 %v4782_v54  ;;  %v4788_v26 = vld [vmem:[%s7542_s6 + $0x110] sm:$0xff]  ;;  %v4801_v3 = vld [vmem:[%s7542_s6 + $0xd8] sm:$0xff] }
 0x1b0   :  { %8046 = vst [vmem:[#allocation22_spill] sm:$0xff] %v4769_v37  ;;  %966 = vmatpush.msra.mxu1 %v4788_v26  ;;  %v4794_v37 = vld [vmem:[%s7539_s2 + $0x138] sm:$0xff] }
 0x1b1   :  { %8047 = vst [vmem:[#allocation58_spill] sm:$0xff] %v4775_v18  ;;  %1055 = vmatpush.msra.mxu3 %v4794_v37  ;;  %985 = vmatpush.msra.mxu2 %v4069_v41  ;;  %v4820_v41 = vld [vmem:[%s7542_s6 + $0xc0] sm:$0xff] }
 0x1b2   :  { %8048 = vst [vmem:[#allocation36_spill] sm:$0xff] %v4782_v54  ;;  %948 = vmatpush.msra.mxu0 %v4801_v3  ;;  %v4807_v54 = vld [vmem:[%s7542_s6 + $0xf8] sm:$0xff] }
 0x1b3   :  { %8049 = vst [vmem:[#allocation59_spill] sm:$0xff] %v4788_v26  ;;  %967 = vmatpush.msra.mxu1 %v4807_v54  ;;  %v4813_v26 = vld [vmem:[%s7539_s2 + $0x120] sm:$0xff]  ;;  %986 = vmatpush.msra.mxu2 %v4077_v59  ;;  %v4839_v59 = vld [vmem:[%s7542_s6 + $0xa8] sm:$0xff] }
 0x1b4   :  { %8050 = vst [vmem:[#allocation37_spill] sm:$0xff] %v4794_v37  ;;  %1056 = vmatpush.msra.mxu3 %v4813_v26  ;;  %949 = vmatpush.msra.mxu0 %v4820_v41 }
 0x1b5   :  { %8051 = vst [vmem:[#allocation61_spill] sm:$0xff] %v4801_v3  ;;  %v4826_v3 = vld [vmem:[%s7542_s6 + $0xe0] sm:$0xff]  ;;  %987 = vmatpush.msra.mxu2 %v4088_v34  ;;  %v4858_v34 = vld [vmem:[%s7542_s6 + $0x90] sm:$0xff] }
 0x1b6   :  { %8052 = vst [vmem:[#allocation38_spill] sm:$0xff] %v4807_v54  ;;  %968 = vmatpush.msra.mxu1 %v4826_v3  ;;  %v4832_v54 = vld [vmem:[%s7539_s2 + $0x108] sm:$0xff]  ;;  %950 = vmatpush.msra.mxu0 %v4839_v59 }
 0x1b7   :  { %8053 = vst [vmem:[#allocation63_spill] sm:$0xff] %v4813_v26  ;;  %1057 = vmatpush.msra.mxu3 %v4832_v54  ;;  %988 = vmatpush.msra.mxu2 %v4097_v56  ;;  %v4877_v56 = vld [vmem:[%s7542_s6 + $0x78] sm:$0xff] }
 0x1b8   :  { %8054 = vst [vmem:[#allocation40_spill] sm:$0xff] %v4820_v41  ;;  %v4845_v41 = vld [vmem:[%s7542_s6 + $0xc8] sm:$0xff]  ;;  %951 = vmatpush.msra.mxu0 %v4858_v34 }
 0x1b9   :  { %8055 = vst [vmem:[#allocation65_spill] sm:$0xff] %v4826_v3  ;;  %969 = vmatpush.msra.mxu1 %v4845_v41  ;;  %v4851_v3 = vld [vmem:[%s7539_s2 + $0xf0] sm:$0xff]  ;;  %989 = vmatpush.msra.mxu2 %v4104_v61  ;;  %v4896_v61 = vld [vmem:[%s7542_s6 + $0x60] sm:$0xff] }
 0x1ba   :  { %8056 = vst [vmem:[#allocation42_spill] sm:$0xff] %v4832_v54  ;;  %1058 = vmatpush.msra.mxu3 %v4851_v3  ;;  %952 = vmatpush.msra.mxu0 %v4877_v56 }
 0x1bb   :  { %8057 = vst [vmem:[#allocation67_spill] sm:$0xff] %v4839_v59  ;;  %v4864_v59 = vld [vmem:[%s7542_s6 + $0xb0] sm:$0xff]  ;;  %990 = vmatpush.msra.mxu2 %v4111_v11  ;;  %v4915_v11 = vld [vmem:[%s7542_s6 + $0x48] sm:$0xff] }
 0x1bc   :  { %8058 = vst [vmem:[#allocation44_spill] sm:$0xff] %v4845_v41  ;;  %970 = vmatpush.msra.mxu1 %v4864_v59  ;;  %v4870_v41 = vld [vmem:[%s7539_s2 + $0xd8] sm:$0xff]  ;;  %953 = vmatpush.msra.mxu0 %v4896_v61 }
 0x1bd   :  { %8059 = vst [vmem:[#allocation70_spill] sm:$0xff] %v4851_v3  ;;  %1059 = vmatpush.msra.mxu3 %v4870_v41  ;;  %991 = vmatpush.msra.mxu2 %v4118_v45  ;;  %v4929_v45 = vld [vmem:[%s7542_s6 + $0x30] sm:$0xff] }
 0x1be   :  { %8060 = vst [vmem:[#allocation46_spill] sm:$0xff] %v4858_v34  ;;  %v4883_v34 = vld [vmem:[%s7542_s6 + $0x98] sm:$0xff]  ;;  %954 = vmatpush.msra.mxu0 %v4915_v11 }
 0x1bf   :  { %8061 = vst [vmem:[#allocation71_spill] sm:$0xff] %v4864_v59  ;;  %971 = vmatpush.msra.mxu1 %v4883_v34  ;;  %v4889_v59 = vld [vmem:[%s7539_s2 + $0xc0] sm:$0xff]  ;;  %992 = vmatpush.msra.mxu2 %v4125_v58  ;;  %v4943_v58 = vld [vmem:[%s7542_s6 + $0x18] sm:$0xff] }
 0x1c0   :  { %8062 = vst [vmem:[#allocation48_spill] sm:$0xff] %v4870_v41  ;;  %1060 = vmatpush.msra.mxu3 %v4889_v59  ;;  %955 = vmatpush.msra.mxu0 %v4929_v45 }
 0x1c1   :  { %8063 = vst [vmem:[#allocation72_spill] sm:$0xff] %v4877_v56  ;;  %v4902_v56 = vld [vmem:[%s7542_s6 + $0x80] sm:$0xff]  ;;  %993 = vmatpush.msra.mxu2 %v4133_v57 }
 0x1c2   :  { %8064 = vst [vmem:[#allocation50_spill] sm:$0xff] %v4883_v34  ;;  %972 = vmatpush.msra.mxu1 %v4902_v56  ;;  %v4908_v34 = vld [vmem:[%s7539_s2 + $0xa8] sm:$0xff]  ;;  %956 = vmatpush.msra.mxu0 %v4943_v58  ;;  %v4957_v57 = vld [vmem:[%s7542_s6] sm:$0xff] }
 0x1c3   :  { %8065 = vst [vmem:[#allocation73_spill] sm:$0xff] %v4889_v59  ;;  %1061 = vmatpush.msra.mxu3 %v4908_v34  ;;  %994 = vmatpush.msra.mxu2 %v4142_v7  ;;  %v8079_v7 = vld [vmem:[#allocation79_spill] sm:$0xff]  ;;  %v8102_v59 = vld [vmem:[#allocation64_spill] sm:$0xff] }
 0x1c4   :  { %8066 = vst [vmem:[#allocation52_spill] sm:$0xff] %v4896_v61  ;;  %973 = vmatpush.msra.mxu1 %v7991_v23  ;;  %v4922_v61 = vld [vmem:[%s7539_s2 + $0x90] sm:$0xff]  ;;  %v4936_v23 = vld [vmem:[%s7539_s2 + $0x78] sm:$0xff]  ;;  %957 = vmatpush.msra.mxu0 %v4957_v57 }
 0x1c5   :  { %8067 = vst [vmem:[#allocation74_spill] sm:$0xff] %v4902_v56  ;;  %1062 = vmatpush.msra.mxu3 %v4922_v61  ;;  %995 = vmatpush.msra.mxu2 %v8079_v7  ;;  %v4990_v7 = vld [vmem:[%s7539_s2] sm:$0xff] }
 0x1c6   :  { %8068 = vst [vmem:[#allocation54_spill] sm:$0xff] %v4908_v34  ;;  %974 = vmatpush.msra.mxu1 %v7993_v28  ;;  %v4950_v28 = vld [vmem:[%s7539_s2 + $0x60] sm:$0xff] }
 0x1c7   :  { %8069 = vst [vmem:[#allocation75_spill] sm:$0xff] %v4915_v11  ;;  %1063 = vmatpush.msra.mxu3 %v4936_v23  ;;  %v8080_v11 = vld [vmem:[#allocation3_spill] sm:$0xff] }
 0x1c8   :  { %8070 = vst [vmem:[#allocation56_spill] sm:$0xff] %v4922_v61  ;;  %975 = vmatpush.msra.mxu1 %v7996_v19  ;;  %v4965_v19 = vld [vmem:[%s7539_s2 + $0x48] sm:$0xff] }
 0x1c9   :  { %8071 = vst [vmem:[#allocation76_spill] sm:$0xff] %v4929_v45  ;;  %1064 = vmatpush.msra.mxu3 %v4950_v28  ;;  %v8078_v45 = vld [vmem:[#allocation78_spill] sm:$0xff] }
 0x1ca   :  { %8072 = vst [vmem:[#allocation77_spill] sm:$0xff] %v4936_v23  ;;  %976 = vmatpush.msra.mxu1 %v7998_v62  ;;  %v8082_v62 = vld [vmem:[#allocation80_spill] sm:$0xff] }
 0x1cb   :  { %8073 = vst [vmem:[#allocation5_spill] sm:$0xff] %v4943_v58  ;;  %v8076_v58 = vld [vmem:[#allocation60_spill] sm:$0xff]  ;;  %1065 = vmatpush.msra.mxu3 %v4965_v19  ;;  %996 = vmatpush.msra.mxu2 %v8082_v62  ;;  %v8088_v62 = vld [vmem:[#allocation62_spill] sm:$0xff] }
 0x1cc   :  { %8074 = vst [vmem:[#allocation6_spill] sm:$0xff] %v4950_v28  ;;  %1073 = vmatpush.msrb.mxu0 %v8076_v58  ;;  %977 = vmatpush.msra.mxu1 %v8078_v45  ;;  %v8083_v58 = vld [vmem:[#allocation9_spill] sm:$0xff] }
 0x1cd   :  { %8075 = vst [vmem:[#allocation7_spill] sm:$0xff] %v4957_v57  ;;  %v4974_v57 = vld [vmem:[%s7539_s2 + $0x30] sm:$0xff] }
 0x1ce   :  { %8077 = vst [vmem:[#allocation8_spill] sm:$0xff] %v4965_v19  ;;  %1074 = vmatpush.msrb.mxu0 %v8080_v11  ;;  %1066 = vmatpush.msra.mxu3 %v4974_v57  ;;  %v4982_v19 = vld [vmem:[%s7539_s2 + $0x18] sm:$0xff]  ;;  %v8085_v45 = vld [vmem:[#allocation81_spill] sm:$0xff]  ;;  %v8086_v11 = vld [vmem:[#allocation12_spill] sm:$0xff] }
 0x1cf   :  { %8081 = vst [vmem:[#allocation10_spill] sm:$0xff] %v4974_v57  ;;  %997 = vmatpush.msra.mxu2 %v8085_v45  ;;  %v4998_v57 = vld [vmem:[%s7539_s2 + $0xe0] sm:$0xff]  ;;  %v5004_v45 = vld [vmem:[%s7539_s2 + $0xc8] sm:$0xff] }
 0x1d0   :  { %1075 = vmatpush.msrb.mxu0 %v8083_v58  ;;  %8084 = vst [vmem:[#allocation13_spill] sm:$0xff] %v4982_v19  ;;  %1067 = vmatpush.msra.mxu3 %v4982_v19  ;;  %v8089_v58 = vld [vmem:[#allocation4_spill] sm:$0xff] }
 0x1d1   :  { %8087 = vst [vmem:[#allocation16_spill] sm:$0xff] %v4990_v7 }
 0x1d2   :  { %1076 = vmatpush.msrb.mxu0 %v8086_v11  ;;  %1068 = vmatpush.msra.mxu3 %v4990_v7  ;;  %8090 = vst [vmem:[#allocation19_spill] sm:$0xff] %v4998_v57  ;;  %v5010_v11 = vld [vmem:[%s7539_s2 + $0xb0] sm:$0xff]  ;;  %v8100_v7 = vld [vmem:[#allocation15_spill] sm:$0xff] }
 0x1d3   :  { %8091 = vst [vmem:[#allocation23_spill] sm:$0xff] %v5004_v45 }
 0x1d4   :  { %1077 = vmatpush.msrb.mxu0 %v8088_v62  ;;  %8092 = vst [vmem:[#allocation26_spill] sm:$0xff] %v5010_v11  ;;  %v5016_v62 = vld [vmem:[%s7539_s2 + $0x98] sm:$0xff] }
 0x1d5   :  { %8093 = vst [vmem:[#allocation60_spill] sm:$0xff] %v5016_v62 }
 0x1d6   :  { %1078 = vmatpush.msrb.mxu0 %v8089_v58  ;;  %v5022_v58 = vld [vmem:[%s7539_s2 + $0x80] sm:$0xff] }
 0x1d7   :  { %8094 = vst [vmem:[#allocation78_spill] sm:$0xff] %v5022_v58 }
 0x1d8   :  { %1079 = vmatpush.msrb.mxu0 %v4998_v57 }
 0x1da   :  { %1080 = vmatpush.msrb.mxu0 %v5004_v45  ;;  %v5028_v45 = vld [vmem:[%s7539_s2 + $0x68] sm:$0xff] }
 0x1db   :  { %8095 = vst [vmem:[#allocation79_spill] sm:$0xff] %v5028_v45 }
 0x1dc   :  { %1081 = vmatpush.msrb.mxu0 %v5010_v11  ;;  %v5034_v11 = vld [vmem:[%s7539_s2 + $0x50] sm:$0xff] }
 0x1dd   :  { %8096 = vst [vmem:[#allocation3_spill] sm:$0xff] %v5034_v11 }
 0x1de   :  { %1082 = vmatpush.msrb.mxu0 %v5016_v62  ;;  %v5040_v62 = vld [vmem:[%s7539_s2 + $0x38] sm:$0xff] }
 0x1df   :  { %8097 = vst [vmem:[#allocation80_spill] sm:$0xff] %v5040_v62 }
 0x1e0   :  { %1083 = vmatpush.msrb.mxu0 %v5022_v58  ;;  %v5046_v58 = vld [vmem:[%s7539_s2 + $0x20] sm:$0xff] }
 0x1e1   :  { %8098 = vst [vmem:[#allocation9_spill] sm:$0xff] %v5046_v58 }
 0x1e2   :  { %1084 = vmatpush.msrb.mxu0 %v5028_v45  ;;  %v5052_v45 = vld [vmem:[%s7539_s2 + $0x8] sm:$0xff] }
 0x1e3   :  { %8099 = vst [vmem:[#allocation81_spill] sm:$0xff] %v5052_v45 }
 0x1e4   :  { %1085 = vmatpush.msrb.mxu0 %v5034_v11 }
 0x1e6   :  { %1086 = vmatpush.msrb.mxu0 %v5040_v62  ;;  %v8101_v62 = vld [vmem:[#allocation11_spill] sm:$0xff] }
 0x1e8   :  { %1087 = vmatpush.msrb.mxu0 %v5046_v58  ;;  %v8103_v58 = vld [vmem:[#allocation14_spill] sm:$0xff] }
 0x1ea   :  { %1088 = vmatpush.msrb.mxu0 %v5052_v45  ;;  %v2508_v45 = vld [vmem:[%s7544_s0 + $0x38] sm:$0xff] }
 0x201   :  { %v621_v11 = vpop.f32.mrf.mxu0  ;;  %v641_v56 = vpop.f32.mrf.mxu1 }
 0x202   :  { %v622_v19 = vadd.f32 %v621_v11, %v8100_v7  ;;  %v642_v41 = vadd.f32 %v641_v56, %v8102_v59  ;;  %v8104_v11 = vld [vmem:[#allocation69_spill] sm:$0xff] }
 0x206   :  { %v681_v57 = vpop.f32.mrf.mxu3 }
 0x207   :  { %v682_v28 = vadd.f32 %v681_v57, %v8101_v62 }
 0x208   :  { %v661_v23 = vpop.f32.mrf.mxu2 }
 0x209   :  { %v724_v61 = vadd.f32 %v682_v28, %v622_v19  ;;  %v701_v34 = vpop.f32.mrf.mxu0  ;;  %v2507_v28 = vld [vmem:[%s7544_s0 + $0x30] sm:$0xff]  ;;  %v8105_v19 = vld [vmem:[#allocation68_spill] sm:$0xff] }
 0x20a   :  { %v702_v3 = vadd.f32 %v701_v34, %v8103_v58 }
 0x20b   :  { %v2505_v54 = vmul.f32 -1.442695, %v724_v61 }
 0x20c   :  { %v744_v26 = vadd.f32 %v702_v3, %v642_v41 }
 0x20d   :  { %2581 = vpow2.f32 %v2505_v54 }
 0x20e   :  { %v2506_v37 = vmul.f32 -1.442695, %v744_v26  ;;  %v812_v18 = vpop.f32.mrf.mxu3 }
 0x20f   :  { %v813_v7 = vadd.f32 %v812_v18, %v8104_v11 }
 0x210   :  { %2583 = vpow2.f32 %v2506_v37  ;;  %v792_v57 = vpop.f32.mrf.mxu2 }
 0x211   :  { %v855_v56 = vadd.f32 %v2508_v45, %v813_v7  ;;  %v793_v34 = vadd.f32 %v792_v57, %v8105_v19 }
 0x213   :  { %v2582_v61 = vpop.eup %2581  ;;  %v2511_v3 = vmul.f32 -1.442695, %v855_v56  ;;  %v835_v54 = vadd.f32 %v2507_v28, %v793_v34 }
 0x214   :  { %v728_v26 = vadd.f32 1.0, %v2582_v61 }
 0x215   :  { %2585 = vpow2.f32 %v2511_v3  ;;  %v2510_v41 = vmul.f32 -1.442695, %v835_v54  ;;  %v721_v3 = vpop.f32.mrf.mxu1 }
 0x216   :  { %v2584_v58 = vpop.eup %2583  ;;  %2587 = vrcp.f32 %v728_v26  ;;  %v740_v56 = vand.u32 2147483648, %v728_v26  ;;  %v738_v61 = vand.u32 2147483647, %v728_v26  ;;  %vm734_vm9 = vweird.f32 %v728_v26 }
 0x217   :  { %v748_v59 = vadd.f32 1.0, %v2584_v58  ;;  %2589 = vpow2.f32 %v2510_v41  ;;  %v722_v24 = vadd.f32 %v721_v3, %v8106_v38 }
 0x218   :  { %vm739_vm11 = vcmp.eq.f32.partialorder %v738_v61, 8.507059e+37 }
 0x219   :  { %2591 = vrcp.f32 %v748_v59  ;;  %vm754_vm13 = vweird.f32 %v748_v59  ;;  %v758_v40 = vand.u32 2147483647, %v748_v59 }
 0x21b   :  { %v2586_v18 = vpop.eup %2585  ;;  %vm759_vm0 = vcmp.eq.f32.partialorder %v758_v40, 8.507059e+37 }
 0x21c   :  { %v2588_v37 = vpop.eup %2587  ;;  %v5067_v11 = vadd.f32 1.0, %v2586_v18  ;;  %v741_v18 = vor.u32 1.1754944e-38, %v740_v56 }
 0x21d   :  { %v2590_v62 = vpop.eup %2589  ;;  %v730_v39 = vmul.f32 %v2588_v37, %v728_v26  ;;  %vm735_vm8 = vweird.f32 %v2588_v37 }
 0x21e   :  { %2593 = vrcp.f32 %v5067_v11  ;;  %v839_v7 = vadd.f32 1.0, %v2590_v62  ;;  %vm736_vm10 = vmor %vm734_vm9, %vm735_vm8  ;;  %v871_v40 = vand.u32 2147483648, %v5067_v11  ;;  %vm865_vm5 = vweird.f32 %v5067_v11 }
 0x21f   :  { %v2592_v45 = vpop.eup %2591  ;;  %v731_v57 = vsub.f32 1.0, %v730_v39 }
 0x220   :  { %v750_v28 = vmul.f32 %v2592_v45, %v748_v59  ;;  %2595 = vrcp.f32 %v839_v7  ;;  %vm755_vm12 = vweird.f32 %v2592_v45  ;;  %v851_v3 = vand.u32 2147483648, %v839_v7 }
 0x221   :  { %v732_v34 = vmul.f32 %v2588_v37, %v731_v57  ;;  %v760_v57 = vand.u32 2147483648, %v748_v59  ;;  %vm756_vm14 = vmor %vm754_vm13, %vm755_vm12  ;;  %vm845_vm1 = vweird.f32 %v839_v7 }
 0x222   :  { %v751_v58 = vsub.f32 1.0, %v750_v28  ;;  %v662_v28 = vadd.f32 %v661_v23, %v4371_v17 }
 0x223   :  { %v733_v54 = vadd.f32 %v2588_v37, %v732_v34  ;;  %v761_v61 = vor.u32 1.1754944e-38, %v760_v57 }
 0x224   :  { %v2594_v41 = vpop.eup %2593  ;;  %v752_v19 = vmul.f32 %v2592_v45, %v751_v58 }
 0x225   :  { %v737_v2 = vsel %vm736_vm10, %v2588_v37, %v733_v54  ;;  %v861_v39 = vmul.f32 %v2594_v41, %v5067_v11  ;;  %vm866_vm4 = vweird.f32 %v2594_v41 }
 0x226   :  { %v2596_v62 = vpop.eup %2595  ;;  %v742_v55 = vsel %vm739_vm11, %v741_v18, %v737_v2  ;;  %v753_v8 = vadd.f32 %v2592_v45, %v752_v19  ;;  %v849_v2 = vand.u32 2147483647, %v839_v7  ;;  %v832_v18 = vpop.f32.mrf.mxu0  ;;  %vm867_vm6 = vmor %vm865_vm5, %vm866_vm4 }
 0x227   :  { %v764_v9 = vmul.f32 %v742_v55, %v722_v24  ;;  %v841_v34 = vmul.f32 %v2596_v62, %v839_v7  ;;  %v862_v26 = vsub.f32 1.0, %v861_v39  ;;  %vm846_vm15 = vweird.f32 %v2596_v62 }
 0x228   :  { %v757_v37 = vsel %vm756_vm14, %v2592_v45, %v753_v8  ;;  %vm847_vm2 = vmor %vm845_vm1, %vm846_vm15  ;;  %v852_v24 = vor.u32 1.1754944e-38, %v851_v3  ;;  %v833_v59 = vadd.f32 %v832_v18, %v4054_v49  ;;  %vm850_vm3 = vcmp.eq.f32.partialorder %v849_v2, 8.507059e+37  ;;  %v2509_v8 = vld [vmem:[%s7544_s0 + $0x40] sm:$0xff]  ;;  %v5241_v18 = vld [vmem:[%s7540_s4 + $0x8] sm:$0xff] }
 0x229   :  { %v765_v56 = vadd.f32 %v764_v9, %v662_v28  ;;  %v842_v58 = vsub.f32 1.0, %v841_v34  ;;  %v863_v19 = vmul.f32 %v2594_v41, %v862_v26  ;;  %v762_v55 = vsel %vm759_vm0, %v761_v61, %v757_v37  ;;  %v8125_v2 = vld [vmem:[#allocation47_spill] sm:$0xff] }
 0x22a   :  { %v767_v39 = vsub.f32 1.0, %v762_v55  ;;  %v869_v7 = vand.u32 2147483647, %v5067_v11 }
 0x22b   :  { %2597 = vtanh.f32 %v765_v56  ;;  %v843_v54 = vmul.f32 %v2596_v62, %v842_v58  ;;  %v864_v45 = vadd.f32 %v2594_v41, %v863_v19  ;;  %v872_v58 = vor.u32 1.1754944e-38, %v871_v40  ;;  %v8126_v19 = vld [vmem:[#allocation49_spill] sm:$0xff]  ;;  %v5266_v40 = vld [vmem:[%s7542_s6 + $0x148] sm:$0xff] }
 0x22c   :  { %vm870_vm7 = vcmp.eq.f32.partialorder %v869_v7, 8.507059e+37  ;;  %v8135_v7 = vld [vmem:[#allocation70_spill] sm:$0xff] }
 0x22d   :  { %v844_v38 = vadd.f32 %v2596_v62, %v843_v54  ;;  %v868_v26 = vsel %vm867_vm6, %v2594_v41, %v864_v45  ;;  %v8124_v54 = vld [vmem:[#allocation30_spill] sm:$0xff]  ;;  %v8131_v45 = vld [vmem:[#allocation55_spill] sm:$0xff] }
 0x22e   :  { %v873_v3 = vsel %vm870_vm7, %v872_v58, %v868_v26  ;;  %v8138_v26 = vld [vmem:[#allocation48_spill] sm:$0xff] }
 0x22f   :  { %v848_v9 = vsel %vm847_vm2, %v2596_v62, %v844_v38  ;;  %v769_v38 = vmul.f32 %v762_v55, %v4393_v12  ;;  %v878_v37 = vsub.f32 1.0, %v873_v3  ;;  %v880_v61 = vmul.f32 %v873_v3, %v4395_v63  ;;  %v5101_v63 = vld [vmem:[%s7540_s4 + $0x170] sm:$0xff]  ;;  %v8127_v55 = vld [vmem:[#allocation31_spill] sm:$0xff]  ;;  %v8139_v58 = vld [vmem:[#allocation36_spill] sm:$0xff] }
 0x230   :  { %v853_v23 = vsel %vm850_vm3, %v852_v24, %v848_v9  ;;  %v5248_v24 = vld [vmem:[%s7542_s6 + $0x178] sm:$0xff]  ;;  %v8129_v9 = vld [vmem:[#allocation63_spill] sm:$0xff] }
 0x231   :  { %v2598_v57 = vpop.eup %2597  ;;  %v875_v28 = vmul.f32 %v853_v23, %v833_v59  ;;  %v8128_v59 = vld [vmem:[#allocation33_spill] sm:$0xff]  ;;  %v5257_v23 = vld [vmem:[%s7542_s6 + $0x160] sm:$0xff]  ;;  %v5284_v3 = vld [vmem:[%s7542_s6 + $0x118] sm:$0xff] }
 0x232   :  { %v768_v34 = vmul.f32 %v2598_v57, %v767_v39  ;;  %v8132_v39 = vld [vmem:[#allocation42_spill] sm:$0xff] }
 0x233   :  { %v876_v62 = vadd.f32 %v2509_v8, %v875_v28  ;;  %v8130_v8 = vld [vmem:[#allocation51_spill] sm:$0xff]  ;;  %v8133_v57 = vld [vmem:[#allocation34_spill] sm:$0xff] }
 0x234   :  { %v5081_v56 = vadd.f32 %v769_v38, %v768_v34  ;;  %v8134_v28 = vld [vmem:[#allocation22_spill] sm:$0xff]  ;;  %v8136_v34 = vld [vmem:[#allocation35_spill] sm:$0xff]  ;;  %v5275_v38 = vld [vmem:[%s7542_s6 + $0x130] sm:$0xff] }
 0x235   :  { %2599 = vtanh.f32 %v876_v62  ;;  %v8137_v62 = vld [vmem:[#allocation59_spill] sm:$0xff] }
 0x236   :  { %958 = vmatmul.f32.vlgmr.msra.gmra.mxu0 %v5081_v56 }
 0x237   :  { %1200 = vmatpush.msra.mxu0 %v4423_v31  ;;  %v5110_v31 = vld [vmem:[%s7540_s4 + $0x158] sm:$0xff] }
 0x239   :  { %1201 = vmatpush.msra.mxu0 %v4442_v32  ;;  %v5168_v32 = vld [vmem:[%s7540_s4 + $0xc8] sm:$0xff] }
 0x23b   :  { %v2600_v11 = vpop.eup %2599  ;;  %1202 = vmatpush.msra.mxu0 %v4477_v46  ;;  %v8109_v46 = vld [vmem:[#allocation32_spill] sm:$0xff] }
 0x23c   :  { %v879_v12 = vmul.f32 %v2600_v11, %v878_v37  ;;  %v8140_v37 = vld [vmem:[#allocation38_spill] sm:$0xff]  ;;  %v8141_v11 = vld [vmem:[#allocation73_spill] sm:$0xff] }
 0x23d   :  { %1203 = vmatpush.msra.mxu0 %v4496_v60  ;;  %v5195_v60 = vld [vmem:[%s7540_s4 + $0x80] sm:$0xff] }
 0x23e   :  { %v5089_v41 = vadd.f32 %v880_v61, %v879_v12  ;;  %v8142_v12 = vld [vmem:[#allocation61_spill] sm:$0xff]  ;;  %v5293_v61 = vld [vmem:[%s7542_s6 + $0x100] sm:$0xff] }
 0x23f   :  { %1204 = vmatpush.msra.mxu0 %v4515_v36  ;;  %v8114_v36 = vld [vmem:[#allocation39_spill] sm:$0xff] }
 0x240   :  { %898 = vmatmul.f32.vlgmr.msrb.gmra.mxu1 %v5089_v41  ;;  %918 = vmatmul.f32.vlgmr.msrb.gmra.mxu2 %v5089_v41 }
 0x241   :  { %938 = vmatmul.f32.vlgmr.msrb.gmra.mxu3 %v5089_v41  ;;  %1089 = vmatmul.f32.vlgmr.msrb.gmra.mxu0 %v5089_v41 }
 0x242   :  { %1093 = vmatpush.msrb.mxu1 %v4404_v20  ;;  %1160 = vmatpush.msrb.mxu2 %v4410_v4  ;;  %v5119_v20 = vld [vmem:[%s7540_s4 + $0x140] sm:$0xff]  ;;  %v5132_v4 = vld [vmem:[%s7540_s4 + $0x128] sm:$0xff] }
 0x243   :  { %1180 = vmatpush.msrb.mxu3 %v5101_v63  ;;  %1205 = vmatpush.msra.mxu0 %v4534_v6 }
 0x244   :  { %1094 = vmatpush.msrb.mxu1 %v4417_v51  ;;  %1161 = vmatpush.msrb.mxu2 %v4429_v50  ;;  %v5141_v51 = vld [vmem:[%s7540_s4 + $0x110] sm:$0xff]  ;;  %v5150_v50 = vld [vmem:[%s7540_s4 + $0xf8] sm:$0xff] }
 0x245   :  { %1181 = vmatpush.msrb.mxu3 %v5110_v31  ;;  %1206 = vmatpush.msra.mxu0 %v4553_v42 }
 0x246   :  { %1095 = vmatpush.msrb.mxu1 %v4436_v47  ;;  %1162 = vmatpush.msrb.mxu2 %v4448_v21  ;;  %v5159_v47 = vld [vmem:[%s7540_s4 + $0xe0] sm:$0xff]  ;;  %v5177_v21 = vld [vmem:[%s7540_s4 + $0xb0] sm:$0xff] }
 0x247   :  { %1182 = vmatpush.msrb.mxu3 %v5119_v20  ;;  %1207 = vmatpush.msra.mxu0 %v4572_v52  ;;  %v8119_v52 = vld [vmem:[#allocation28_spill] sm:$0xff] }
 0x248   :  { %1096 = vmatpush.msrb.mxu1 %v4456_v43  ;;  %998 = vmatmul.f32.vlgmr.msra.gmra.mxu2 %v5081_v56  ;;  %v8107_v43 = vld [vmem:[#allocation17_spill] sm:$0xff] }
 0x249   :  { %978 = vmatmul.f32.vlgmr.msra.gmra.mxu1 %v5081_v56  ;;  %1069 = vmatmul.f32.vlgmr.msra.gmra.mxu3 %v5089_v41 }
 0x24a   :  { %1097 = vmatpush.msrb.mxu1 %v4465_v16  ;;  %1163 = vmatpush.msrb.mxu2 %v4471_v1  ;;  %v8108_v16 = vld [vmem:[#allocation21_spill] sm:$0xff]  ;;  %v5186_v1 = vld [vmem:[%s7540_s4 + $0x98] sm:$0xff] }
 0x24b   :  { %1183 = vmatpush.msrb.mxu3 %v5132_v4  ;;  %1208 = vmatpush.msra.mxu0 %v4591_v48  ;;  %v8120_v48 = vld [vmem:[#allocation43_spill] sm:$0xff] }
 0x24c   :  { %1098 = vmatpush.msrb.mxu1 %v4483_v15  ;;  %1164 = vmatpush.msrb.mxu2 %v4490_v14  ;;  %v8110_v15 = vld [vmem:[#allocation20_spill] sm:$0xff]  ;;  %v8111_v14 = vld [vmem:[#allocation25_spill] sm:$0xff] }
 0x24d   :  { %1184 = vmatpush.msrb.mxu3 %v5141_v51  ;;  %1209 = vmatpush.msra.mxu0 %v4610_v22  ;;  %v5222_v22 = vld [vmem:[%s7540_s4 + $0x38] sm:$0xff] }
 0x24e   :  { %1099 = vmatpush.msrb.mxu1 %v4502_v13  ;;  %1165 = vmatpush.msrb.mxu2 %v4509_v0  ;;  %v8112_v13 = vld [vmem:[#allocation53_spill] sm:$0xff]  ;;  %v8113_v0 = vld [vmem:[#allocation24_spill] sm:$0xff] }
 0x24f   :  { %1185 = vmatpush.msrb.mxu3 %v5150_v50  ;;  %1210 = vmatpush.msra.mxu0 %v4629_v10  ;;  %v8122_v10 = vld [vmem:[#allocation29_spill] sm:$0xff] }
 0x250   :  { %1100 = vmatpush.msrb.mxu1 %v4521_v27  ;;  %1166 = vmatpush.msrb.mxu2 %v4528_v25  ;;  %v5204_v27 = vld [vmem:[%s7540_s4 + $0x68] sm:$0xff]  ;;  %v8115_v25 = vld [vmem:[#allocation57_spill] sm:$0xff] }
 0x251   :  { %1186 = vmatpush.msrb.mxu3 %v5159_v47  ;;  %1211 = vmatpush.msra.mxu0 %v4648_v5  ;;  %v8121_v5 = vld [vmem:[#allocation37_spill] sm:$0xff] }
 0x252   :  { %1101 = vmatpush.msrb.mxu1 %v4540_v35  ;;  %1167 = vmatpush.msrb.mxu2 %v4547_v44  ;;  %v8116_v35 = vld [vmem:[#allocation27_spill] sm:$0xff]  ;;  %v8117_v44 = vld [vmem:[#allocation41_spill] sm:$0xff] }
 0x253   :  { %1187 = vmatpush.msrb.mxu3 %v5168_v32  ;;  %1212 = vmatpush.msra.mxu0 %v4667_v30  ;;  %v8123_v30 = vld [vmem:[#allocation45_spill] sm:$0xff] }
 0x254   :  { %1102 = vmatpush.msrb.mxu1 %v4559_v53  ;;  %1168 = vmatpush.msrb.mxu2 %v4566_v33  ;;  %v5213_v53 = vld [vmem:[%s7540_s4 + $0x50] sm:$0xff]  ;;  %v8118_v33 = vld [vmem:[#allocation58_spill] sm:$0xff] }
 0x255   :  { %1188 = vmatpush.msrb.mxu3 %v5177_v21  ;;  %1213 = vmatpush.msra.mxu0 %v4693_v29  ;;  %v5232_v29 = vld [vmem:[%s7540_s4 + $0x20] sm:$0xff] }
 0x256   :  { %1103 = vmatpush.msrb.mxu1 %v8107_v43  ;;  %1169 = vmatpush.msrb.mxu2 %v8108_v16  ;;  %v8143_v43 = vld [vmem:[#allocation65_spill] sm:$0xff]  ;;  %v8144_v16 = vld [vmem:[#allocation54_spill] sm:$0xff] }
 0x257   :  { %1189 = vmatpush.msrb.mxu3 %v5186_v1  ;;  %1214 = vmatpush.msra.mxu0 %v8109_v46  ;;  %v8145_v46 = vld [vmem:[#allocation40_spill] sm:$0xff] }
 0x258   :  { %1104 = vmatpush.msrb.mxu1 %v8110_v15  ;;  %1170 = vmatpush.msrb.mxu2 %v8111_v14  ;;  %v5302_v15 = vld [vmem:[%s7542_s6 + $0xe8] sm:$0xff] }
 0x259   :  { %1190 = vmatpush.msrb.mxu3 %v5195_v60  ;;  %1215 = vmatpush.msra.mxu0 %v8112_v13  ;;  %v8146_v14 = vld [vmem:[#allocation44_spill] sm:$0xff] }
 0x25a   :  { %1105 = vmatpush.msrb.mxu1 %v8113_v0  ;;  %1171 = vmatpush.msrb.mxu2 %v8114_v36  ;;  %v8147_v13 = vld [vmem:[#allocation56_spill] sm:$0xff]  ;;  %v8148_v0 = vld [vmem:[#allocation67_spill] sm:$0xff]  ;;  %v5311_v36 = vld [vmem:[%s7542_s6 + $0xd0] sm:$0xff] }
 0x25b   :  { %1191 = vmatpush.msrb.mxu3 %v5204_v27  ;;  %1331 = vmatpush.msrb.mxu0 %v8115_v25  ;;  %v8149_v25 = vld [vmem:[#allocation71_spill] sm:$0xff] }
 0x25c   :  { %1106 = vmatpush.msrb.mxu1 %v8116_v35  ;;  %1172 = vmatpush.msrb.mxu2 %v8117_v44  ;;  %v8150_v35 = vld [vmem:[#allocation77_spill] sm:$0xff]  ;;  %v8151_v44 = vld [vmem:[#allocation46_spill] sm:$0xff] }
 0x25d   :  { %1192 = vmatpush.msrb.mxu3 %v5213_v53  ;;  %1332 = vmatpush.msrb.mxu0 %v8118_v33  ;;  %v5320_v33 = vld [vmem:[%s7542_s6 + $0xb8] sm:$0xff] }
 0x25e   :  { %1107 = vmatpush.msrb.mxu1 %v8119_v52  ;;  %1173 = vmatpush.msrb.mxu2 %v8120_v48  ;;  %v8152_v52 = vld [vmem:[#allocation50_spill] sm:$0xff] }
 0x25f   :  { %1193 = vmatpush.msrb.mxu3 %v5222_v22  ;;  %1333 = vmatpush.msrb.mxu0 %v8121_v5  ;;  %v8153_v48 = vld [vmem:[#allocation6_spill] sm:$0xff]  ;;  %v8154_v5 = vld [vmem:[#allocation72_spill] sm:$0xff] }
 0x260   :  { %1108 = vmatpush.msrb.mxu1 %v8122_v10  ;;  %1174 = vmatpush.msrb.mxu2 %v8123_v30  ;;  %v5329_v10 = vld [vmem:[%s7542_s6 + $0xa0] sm:$0xff]  ;;  %v8155_v30 = vld [vmem:[#allocation74_spill] sm:$0xff] }
 0x261   :  { %1109 = vmatmul.f32.vlgmr.msrb.gmra.mxu1 %v5089_v41  ;;  %1194 = vmatpush.msrb.mxu3 %v5232_v29 }
 0x262   :  { %1220 = vmatpush.msra.mxu1 %v8124_v54  ;;  %1175 = vmatpush.msrb.mxu2 %v8125_v2  ;;  %v8156_v54 = vld [vmem:[#allocation8_spill] sm:$0xff] }
 0x263   :  { %1195 = vmatpush.msrb.mxu3 %v5241_v18  ;;  %1334 = vmatpush.msrb.mxu0 %v8129_v9  ;;  %v8157_v2 = vld [vmem:[#allocation52_spill] sm:$0xff]  ;;  %v8159_v9 = vld [vmem:[#allocation75_spill] sm:$0xff] }
 0x264   :  { %1240 = vmatpush.msra.mxu2 %v8126_v19  ;;  %1221 = vmatpush.msra.mxu1 %v8127_v55  ;;  %v5338_v19 = vld [vmem:[%s7542_s6 + $0x88] sm:$0xff] }
 0x265   :  { %1260 = vmatpush.msra.mxu3 %v5248_v24  ;;  %1335 = vmatpush.msrb.mxu0 %v8132_v39  ;;  %v5344_v55 = vld [vmem:[%s7542_s6 + $0x68] sm:$0xff]  ;;  %v8160_v39 = vld [vmem:[#allocation13_spill] sm:$0xff] }
 0x266   :  { %1241 = vmatpush.msra.mxu2 %v8128_v59  ;;  %1222 = vmatpush.msra.mxu1 %v8130_v8  ;;  %v8158_v59 = vld [vmem:[#allocation10_spill] sm:$0xff]  ;;  %v5352_v8 = vld [vmem:[%s7542_s6 + $0x70] sm:$0xff] }
 0x267   :  { %1261 = vmatpush.msra.mxu3 %v5257_v23  ;;  %1336 = vmatpush.msrb.mxu0 %v8135_v7  ;;  %v5372_v7 = vld [vmem:[%s7542_s6 + $0x38] sm:$0xff] }
 0x268   :  { %1242 = vmatpush.msra.mxu2 %v8131_v45  ;;  %1223 = vmatpush.msra.mxu1 %v8133_v57  ;;  %v5358_v45 = vld [vmem:[%s7542_s6 + $0x50] sm:$0xff]  ;;  %v8161_v57 = vld [vmem:[#allocation76_spill] sm:$0xff] }
 0x269   :  { %1262 = vmatpush.msra.mxu3 %v5266_v40  ;;  %1337 = vmatpush.msrb.mxu0 %v8138_v26  ;;  %v5380_v26 = vld [vmem:[%s7542_s6 + $0x40] sm:$0xff] }
 0x26a   :  { %1243 = vmatpush.msra.mxu2 %v8134_v28  ;;  %1224 = vmatpush.msra.mxu1 %v8136_v34  ;;  %v5366_v28 = vld [vmem:[%s7542_s6 + $0x58] sm:$0xff]  ;;  %v8162_v34 = vld [vmem:[#allocation16_spill] sm:$0xff] }
 0x26b   :  { %1263 = vmatpush.msra.mxu3 %v5275_v38  ;;  %1338 = vmatpush.msrb.mxu0 %v8141_v11  ;;  %v5393_v11 = vld [vmem:[%s7542_s6 + $0x28] sm:$0xff] }
 0x26c   :  { %1244 = vmatpush.msra.mxu2 %v8137_v62  ;;  %1225 = vmatpush.msra.mxu1 %v8139_v58  ;;  %v8163_v62 = vld [vmem:[#allocation5_spill] sm:$0xff]  ;;  %v5386_v58 = vld [vmem:[%s7542_s6 + $0x20] sm:$0xff]  ;;  %8165 = vst [vmem:[#allocation12_spill] sm:$0xff] %v5393_v11 }
 0x26d   :  { %1264 = vmatpush.msra.mxu3 %v5284_v3  ;;  %1339 = vmatpush.msrb.mxu0 %v8144_v16  ;;  %v5411_v16 = vld [vmem:[%s7542_s6 + $0x10] sm:$0xff] }
 0x26e   :  { %1245 = vmatpush.msra.mxu2 %v8140_v37  ;;  %1226 = vmatpush.msra.mxu1 %v8142_v12  ;;  %v8164_v37 = vld [vmem:[#allocation7_spill] sm:$0xff]  ;;  %v5399_v12 = vld [vmem:[%s7539_s2 + $0x170] sm:$0xff]  ;;  %8168 = vst [vmem:[#allocation17_spill] sm:$0xff] %v5411_v16 }
 0x26f   :  { %1265 = vmatpush.msra.mxu3 %v5293_v61  ;;  %1340 = vmatpush.msrb.mxu0 %v8147_v13  ;;  %8166 = vst [vmem:[#allocation62_spill] sm:$0xff] %v5399_v12  ;;  %v5429_v13 = vld [vmem:[%s7539_s2 + $0x128] sm:$0xff] }
 0x270   :  { %1246 = vmatpush.msra.mxu2 %v8143_v43  ;;  %1227 = vmatpush.msra.mxu1 %v8145_v46  ;;  %v5405_v43 = vld [vmem:[%s7542_s6 + $0x8] sm:$0xff]  ;;  %v5417_v46 = vld [vmem:[%s7539_s2 + $0x158] sm:$0xff]  ;;  %8171 = vst [vmem:[#allocation20_spill] sm:$0xff] %v5429_v13 }
 0x271   :  { %1266 = vmatpush.msra.mxu3 %v5302_v15  ;;  %1341 = vmatpush.msrb.mxu0 %v8150_v35  ;;  %8167 = vst [vmem:[#allocation4_spill] sm:$0xff] %v5405_v43  ;;  %v8174_v35 = vld [vmem:[#allocation19_spill] sm:$0xff] }
 0x272   :  { %1247 = vmatpush.msra.mxu2 %v8146_v14  ;;  %1228 = vmatpush.msra.mxu1 %v8148_v0  ;;  %8169 = vst [vmem:[#allocation21_spill] sm:$0xff] %v5417_v46  ;;  %v5423_v14 = vld [vmem:[%s7539_s2 + $0x140] sm:$0xff]  ;;  %v5435_v0 = vld [vmem:[%s7539_s2 + $0x110] sm:$0xff] }
 0x273   :  { %1267 = vmatpush.msra.mxu3 %v5311_v36  ;;  %1342 = vmatpush.msrb.mxu0 %v8153_v48  ;;  %8170 = vst [vmem:[#allocation32_spill] sm:$0xff] %v5423_v14  ;;  %v8177_v48 = vld [vmem:[#allocation60_spill] sm:$0xff] }
 0x274   :  { %1248 = vmatpush.msra.mxu2 %v8149_v25  ;;  %1229 = vmatpush.msra.mxu1 %v8151_v44  ;;  %8172 = vst [vmem:[#allocation25_spill] sm:$0xff] %v5435_v0  ;;  %v5441_v25 = vld [vmem:[%s7539_s2 + $0xf8] sm:$0xff]  ;;  %v8175_v44 = vld [vmem:[#allocation23_spill] sm:$0xff] }
 0x275   :  { %1268 = vmatpush.msra.mxu3 %v5320_v33  ;;  %1343 = vmatpush.msrb.mxu0 %v8156_v54  ;;  %8173 = vst [vmem:[#allocation53_spill] sm:$0xff] %v5441_v25  ;;  %v8180_v54 = vld [vmem:[#allocation3_spill] sm:$0xff] }
 0x276   :  { %1249 = vmatpush.msra.mxu2 %v8152_v52  ;;  %1230 = vmatpush.msra.mxu1 %v8154_v5  ;;  %v8176_v52 = vld [vmem:[#allocation26_spill] sm:$0xff] }
 0x277   :  { %1269 = vmatpush.msra.mxu3 %v5329_v10  ;;  %1344 = vmatpush.msrb.mxu0 %v8158_v59  ;;  %v8178_v5 = vld [vmem:[#allocation78_spill] sm:$0xff]  ;;  %v8182_v59 = vld [vmem:[#allocation9_spill] sm:$0xff] }
 0x278   :  { %1250 = vmatpush.msra.mxu2 %v8155_v30  ;;  %1231 = vmatpush.msra.mxu1 %v8157_v2  ;;  %v8179_v30 = vld [vmem:[#allocation79_spill] sm:$0xff]  ;;  %v8181_v2 = vld [vmem:[#allocation80_spill] sm:$0xff] }
 0x279   :  { %1270 = vmatpush.msra.mxu3 %v5338_v19  ;;  %1345 = vmatpush.msrb.mxu0 %v8160_v39 }
 0x27a   :  { %1251 = vmatpush.msra.mxu2 %v5344_v55  ;;  %1232 = vmatpush.msra.mxu1 %v8159_v9  ;;  %v8183_v9 = vld [vmem:[#allocation81_spill] sm:$0xff] }
 0x27b   :  { %1271 = vmatpush.msra.mxu3 %v5352_v8  ;;  %1346 = vmatpush.msrb.mxu0 %v8162_v34  ;;  %v8184_v34 = vld [vmem:[#allocation11_spill] sm:$0xff] }
 0x27c   :  { %1252 = vmatpush.msra.mxu2 %v5358_v45  ;;  %1233 = vmatpush.msra.mxu1 %v8161_v57 }
 0x27d   :  { %1272 = vmatpush.msra.mxu3 %v5366_v28 }
 0x27e   :  { %1253 = vmatpush.msra.mxu2 %v5372_v7  ;;  %1234 = vmatpush.msra.mxu1 %v8163_v62 }
 0x27f   :  { %1273 = vmatpush.msra.mxu3 %v5380_v26 }
 0x280   :  { %1254 = vmatpush.msra.mxu2 %v5386_v58  ;;  %1235 = vmatpush.msra.mxu1 %v8164_v37  ;;  %v8185_v37 = vld [vmem:[#allocation15_spill] sm:$0xff] }
 0x281   :  { %1274 = vmatpush.msra.mxu3 %v5393_v11 }
 0x282   :  { %1351 = vmatpush.msrb.mxu1 %v5399_v12  ;;  %1255 = vmatpush.msra.mxu2 %v5405_v43 }
 0x283   :  { %1275 = vmatpush.msra.mxu3 %v5411_v16 }
 0x284   :  { %1352 = vmatpush.msrb.mxu1 %v5417_v46 }
 0x286   :  { %1353 = vmatpush.msrb.mxu1 %v5423_v14 }
 0x288   :  { %1354 = vmatpush.msrb.mxu1 %v5429_v13  ;;  %v8187_v13 = vld [vmem:[#allocation64_spill] sm:$0xff] }
 0x28a   :  { %1355 = vmatpush.msrb.mxu1 %v5435_v0 }
 0x28c   :  { %1356 = vmatpush.msrb.mxu1 %v5441_v25 }
 0x28e   :  { %1357 = vmatpush.msrb.mxu1 %v8174_v35 }
 0x290   :  { %1358 = vmatpush.msrb.mxu1 %v8175_v44 }
 0x292   :  { %1359 = vmatpush.msrb.mxu1 %v8176_v52  ;;  %v2515_v52 = vld [vmem:[%s7544_s0 + $0x50] sm:$0xff] }
 0x294   :  { %1360 = vmatpush.msrb.mxu1 %v8177_v48  ;;  %v8186_v48 = vld [vmem:[#allocation69_spill] sm:$0xff] }
 0x296   :  { %1361 = vmatpush.msrb.mxu1 %v8178_v5 }
 0x298   :  { %1362 = vmatpush.msrb.mxu1 %v8179_v30 }
 0x29a   :  { %1363 = vmatpush.msrb.mxu1 %v8180_v54 }
 0x29c   :  { %1364 = vmatpush.msrb.mxu1 %v8181_v2 }
 0x29e   :  { %1365 = vmatpush.msrb.mxu1 %v8182_v59 }
 0x2a0   :  { %1366 = vmatpush.msrb.mxu1 %v8183_v9 }
 0x2b3   :  { %v959_v39 = vpop.f32.mrf.mxu0 }
 0x2b4   :  { %v960_v62 = vadd.f32 %v959_v39, %v8184_v34  ;;  %v8188_v39 = vld [vmem:[#allocation14_spill] sm:$0xff] }
 0x2bd   :  { %v899_v57 = vpop.f32.mrf.mxu1 }
 0x2be   :  { %v900_v35 = vadd.f32 %v899_v57, %v8185_v37  ;;  %v1090_v44 = vpop.f32.mrf.mxu0 }
 0x2bf   :  { %v1091_v5 = vadd.f32 %v1090_v44, %v8186_v48 }
 0x2c0   :  { %v1002_v30 = vadd.f32 %v960_v62, %v900_v35  ;;  %v2514_v62 = vld [vmem:[%s7544_s0 + $0x48] sm:$0xff] }
 0x2c1   :  { %v1133_v2 = vadd.f32 %v2515_v52, %v1091_v5  ;;  %v8189_v35 = vld [vmem:[#allocation68_spill] sm:$0xff] }
 0x2c2   :  { %v2512_v54 = vmul.f32 -1.442695, %v1002_v30 }
 0x2c3   :  { %v919_v59 = vpop.f32.mrf.mxu2  ;;  %v2518_v9 = vmul.f32 -1.442695, %v1133_v2 }
 0x2c4   :  { %2601 = vpow2.f32 %v2512_v54  ;;  %v939_v25 = vpop.f32.mrf.mxu3  ;;  %v920_v14 = vadd.f32 %v919_v59, %v8187_v13 }
 0x2c5   :  { %2603 = vpow2.f32 %v2518_v9 }
 0x2c6   :  { %v979_v0 = vpop.f32.mrf.mxu1 }
 0x2c7   :  { %v980_v34 = vadd.f32 %v979_v0, %v8188_v39 }
 0x2c9   :  { %v1022_v57 = vadd.f32 %v980_v34, %v920_v14 }
 0x2ca   :  { %v2602_v37 = vpop.eup %2601 }
 0x2cb   :  { %v1006_v46 = vadd.f32 1.0, %v2602_v37  ;;  %v2513_v16 = vmul.f32 -1.442695, %v1022_v57  ;;  %v2604_v52 = vpop.eup %2603 }
 0x2cc   :  { %v1070_v43 = vpop.f32.mrf.mxu3  ;;  %v5466_v2 = vadd.f32 1.0, %v2604_v52  ;;  %v8190_v52 = vld [vmem:[#allocation18_spill] sm:$0xff] }
 0x2cd   :  { %2605 = vrcp.f32 %v1006_v46  ;;  %v1071_v44 = vadd.f32 %v1070_v43, %v8189_v35  ;;  %v1018_v59 = vand.u32 2147483648, %v1006_v46  ;;  %v1016_v57 = vand.u32 2147483647, %v1006_v46  ;;  %v999_v43 = vpop.f32.mrf.mxu2 }
 0x2ce   :  { %2607 = vpow2.f32 %v2513_v16  ;;  %vm1012_vm9 = vweird.f32 %v1006_v46  ;;  %vm1143_vm5 = vweird.f32 %v5466_v2 }
 0x2cf   :  { %v1113_v5 = vadd.f32 %v2514_v62, %v1071_v44  ;;  %v1019_v62 = vor.u32 1.1754944e-38, %v1018_v59  ;;  %vm1017_vm11 = vcmp.eq.f32.partialorder %v1016_v57, 8.507059e+37 }
 0x2d1   :  { %v2517_v30 = vmul.f32 -1.442695, %v1113_v5  ;;  %v1000_v5 = vadd.f32 %v999_v43, %v8190_v52 }
 0x2d3   :  { %v2606_v54 = vpop.eup %2605  ;;  %2609 = vpow2.f32 %v2517_v30 }
 0x2d4   :  { %v1008_v14 = vmul.f32 %v2606_v54, %v1006_v46  ;;  %v2608_v0 = vpop.eup %2607  ;;  %2611 = vrcp.f32 %v5466_v2  ;;  %vm1013_vm8 = vweird.f32 %v2606_v54 }
 0x2d5   :  { %v1026_v34 = vadd.f32 1.0, %v2608_v0  ;;  %vm1014_vm10 = vmor %vm1012_vm9, %vm1013_vm8 }
 0x2d6   :  { %v1009_v37 = vsub.f32 1.0, %v1008_v14 }
 0x2d7   :  { %2613 = vrcp.f32 %v1026_v34  ;;  %v1038_v59 = vand.u32 2147483648, %v1026_v34  ;;  %vm1032_vm13 = vweird.f32 %v1026_v34 }
 0x2d8   :  { %v1010_v9 = vmul.f32 %v2606_v54, %v1009_v37  ;;  %v940_v37 = vadd.f32 %v939_v25, %v4371_v17 }
 0x2d9   :  { %v2610_v16 = vpop.eup %2609  ;;  %v1039_v25 = vor.u32 1.1754944e-38, %v1038_v59 }
 0x2da   :  { %v1011_v39 = vadd.f32 %v2606_v54, %v1010_v9  ;;  %v1117_v44 = vadd.f32 1.0, %v2610_v16  ;;  %v5470_v0 = vpop.eup %2611 }
 0x2db   :  { %v1139_v46 = vmul.f32 %v5470_v0, %v5466_v2  ;;  %vm1144_vm4 = vweird.f32 %v5470_v0 }
 0x2dc   :  { %v1015_v30 = vsel %vm1014_vm10, %v2606_v54, %v1011_v39  ;;  %2615 = vrcp.f32 %v1117_v44  ;;  %v1036_v39 = vand.u32 2147483647, %v1026_v34  ;;  %vm1123_vm1 = vweird.f32 %v1117_v44  ;;  %vm1145_vm6 = vmor %vm1143_vm5, %vm1144_vm4 }
 0x2dd   :  { %v1020_v14 = vsel %vm1017_vm11, %v1019_v62, %v1015_v30  ;;  %v2614_v13 = vpop.eup %2613  ;;  %v1140_v57 = vsub.f32 1.0, %v1139_v46 }
 0x2de   :  { %v1042_v35 = vmul.f32 %v1020_v14, %v1000_v5  ;;  %v1028_v48 = vmul.f32 %v2614_v13, %v1026_v34  ;;  %vm1033_vm12 = vweird.f32 %v2614_v13  ;;  %v1129_v5 = vand.u32 2147483648, %v1117_v44 }
 0x2df   :  { %vm1034_vm14 = vmor %vm1032_vm13, %vm1033_vm12  ;;  %vm1037_vm15 = vcmp.eq.f32.partialorder %v1036_v39, 8.507059e+37  ;;  %v1141_v17 = vmul.f32 %v5470_v0, %v1140_v57  ;;  %v2516_v39 = vld [vmem:[%s7544_s0 + $0x58] sm:$0xff] }
 0x2e0   :  { %v1043_v12 = vadd.f32 %v1042_v35, %v940_v37  ;;  %v1029_v9 = vsub.f32 1.0, %v1028_v48  ;;  %v1127_v48 = vand.u32 2147483647, %v1117_v44  ;;  %v1130_v46 = vor.u32 1.1754944e-38, %v1129_v5  ;;  %v5505_v5 = vld [vmem:[%s7540_s4 + $0x148] sm:$0xff] }
 0x2e1   :  { %v1142_v57 = vadd.f32 %v5470_v0, %v1141_v17 }
 0x2e2   :  { %2617 = vtanh.f32 %v1043_v12  ;;  %v2616_v16 = vpop.eup %2615  ;;  %v1030_v43 = vmul.f32 %v2614_v13, %v1029_v9  ;;  %v1110_v9 = vpop.f32.mrf.mxu1  ;;  %vm1128_vm3 = vcmp.eq.f32.partialorder %v1127_v48, 8.507059e+37 }
 0x2e3   :  { %v1119_v54 = vmul.f32 %v2616_v16, %v1117_v44  ;;  %vm1124_vm0 = vweird.f32 %v2616_v16  ;;  %v1111_v59 = vadd.f32 %v1110_v9, %v4054_v49  ;;  %v1149_v44 = vand.u32 2147483648, %v5466_v2 }
 0x2e4   :  { %v1031_v62 = vadd.f32 %v2614_v13, %v1030_v43  ;;  %vm1125_vm2 = vmor %vm1123_vm1, %vm1124_vm0  ;;  %v1146_v17 = vsel %vm1145_vm6, %v5470_v0, %v1142_v57  ;;  %v5511_v0 = vld [vmem:[%s7540_s4 + $0x130] sm:$0xff]  ;;  %v5617_v57 = vld [vmem:[%s7539_s2 + $0x100] sm:$0xff] }
 0x2e5   :  { %v1120_v30 = vsub.f32 1.0, %v1119_v54 }
 0x2e6   :  { %v1035_v14 = vsel %vm1034_vm14, %v2614_v13, %v1031_v62 }
 0x2e7   :  { %v1121_v37 = vmul.f32 %v2616_v16, %v1120_v30  ;;  %v1040_v12 = vsel %vm1037_vm15, %v1039_v25, %v1035_v14  ;;  %v1150_v30 = vor.u32 1.1754944e-38, %v1149_v44  ;;  %v5499_v25 = vld [vmem:[%s7540_s4 + $0x160] sm:$0xff]  ;;  %v5623_v44 = vld [vmem:[%s7540_s4 + $0x108] sm:$0xff] }
 0x2e8   :  { %v2618_v35 = vpop.eup %2617  ;;  %v1045_v52 = vsub.f32 1.0, %v1040_v12  ;;  %v1047_v43 = vmul.f32 %v1040_v12, %v5081_v56  ;;  %v1147_v56 = vand.u32 2147483647, %v5466_v2 }
 0x2e9   :  { %v1122_v11 = vadd.f32 %v2616_v16, %v1121_v37  ;;  %v5517_v37 = vld [vmem:[%s7540_s4 + $0x118] sm:$0xff] }
 0x2ea   :  { %v1046_v34 = vmul.f32 %v2618_v35, %v1045_v52  ;;  %vm1148_vm7 = vcmp.eq.f32.partialorder %v1147_v56, 8.507059e+37  ;;  %v5642_v56 = vld [vmem:[%s7540_s4 + $0xf0] sm:$0xff] }
 0x2eb   :  { %v1126_v13 = vsel %vm1125_vm2, %v2616_v16, %v1122_v11  ;;  %v5492_v16 = vld [vmem:[%s7540_s4 + $0x178] sm:$0xff]  ;;  %v1151_v2 = vsel %vm1148_vm7, %v1150_v30, %v1146_v17 }
 0x2ec   :  { %v1131_v54 = vsel %vm1128_vm3, %v1130_v46, %v1126_v13  ;;  %v5483_v62 = vadd.f32 %v1047_v43, %v1046_v34  ;;  %v1156_v14 = vsub.f32 1.0, %v1151_v2  ;;  %v1158_v12 = vmul.f32 %v1151_v2, %v5089_v41  ;;  %v5532_v46 = vld [vmem:[%s7539_s2 + $0x178] sm:$0xff]  ;;  %v5551_v41 = vld [vmem:[%s7539_s2 + $0x160] sm:$0xff]  ;;  %v5557_v34 = vld [vmem:[%s7540_s4 + $0x150] sm:$0xff] }
 0x2ed   :  { %v1153_v52 = vmul.f32 %v1131_v54, %v1111_v59  ;;  %v5570_v43 = vld [vmem:[%s7539_s2 + $0x148] sm:$0xff]  ;;  %v5576_v59 = vld [vmem:[%s7540_s4 + $0x138] sm:$0xff]  ;;  %v5589_v13 = vld [vmem:[%s7539_s2 + $0x130] sm:$0xff] }
 0x2ee   :  { %1236 = vmatmul.f32.vlgmr.msra.gmra.mxu1 %v5483_v62  ;;  %v5611_v54 = vld [vmem:[%s7540_s4 + $0x88] sm:$0xff]  ;;  %v5661_v17 = vld [vmem:[%s7540_s4 + $0xd8] sm:$0xff]  ;;  %v5680_v2 = vld [vmem:[%s7540_s4 + $0xc0] sm:$0xff] }
 0x2ef   :  { %v1154_v11 = vadd.f32 %v2516_v39, %v1153_v52  ;;  %1478 = vmatpush.msra.mxu1 %v5492_v16  ;;  %v5604_v39 = vld [vmem:[%s7540_s4 + $0x120] sm:$0xff]  ;;  %v5636_v52 = vld [vmem:[%s7539_s2 + $0xe8] sm:$0xff]  ;;  %v5674_v30 = vld [vmem:[%s7539_s2 + $0xb8] sm:$0xff] }
 0x2f1   :  { %2619 = vtanh.f32 %v1154_v11  ;;  %1479 = vmatpush.msra.mxu1 %v5499_v25  ;;  %v5655_v11 = vld [vmem:[%s7539_s2 + $0xd0] sm:$0xff] }
 0x2f3   :  { %1480 = vmatpush.msra.mxu1 %v5505_v5 }
 0x2f5   :  { %1481 = vmatpush.msra.mxu1 %v5511_v0 }
 0x2f7   :  { %v2620_v35 = vpop.eup %2619  ;;  %1482 = vmatpush.msra.mxu1 %v5517_v37 }
 0x2f8   :  { %v1157_v48 = vmul.f32 %v2620_v35, %v1156_v14  ;;  %v5693_v14 = vld [vmem:[%s7539_s2 + $0xa0] sm:$0xff]  ;;  %v5699_v35 = vld [vmem:[%s7540_s4 + $0xa8] sm:$0xff] }
 0x2f9   :  { %1483 = vmatpush.msra.mxu1 %v4534_v6  ;;  %v5538_v6 = vld [vmem:[%s7540_s4 + $0x168] sm:$0xff] }
 0x2fa   :  { %v5522_v9 = vadd.f32 %v1158_v12, %v1157_v48  ;;  %v5712_v48 = vld [vmem:[%s7539_s2 + $0x88] sm:$0xff]  ;;  %v5718_v12 = vld [vmem:[%s7540_s4 + $0x90] sm:$0xff] }
 0x2fb   :  { %1484 = vmatpush.msra.mxu1 %v4553_v42  ;;  %v5545_v42 = vld [vmem:[%s7540_s4 + $0xd0] sm:$0xff] }
 0x2fc   :  { %1176 = vmatmul.f32.vlgmr.msrb.gmra.mxu2 %v5522_v9  ;;  %1196 = vmatmul.f32.vlgmr.msrb.gmra.mxu3 %v5522_v9 }
 0x2fd   :  { %1216 = vmatmul.f32.vlgmr.msra.gmra.mxu0 %v5522_v9  ;;  %1367 = vmatmul.f32.vlgmr.msrb.gmra.mxu1 %v5522_v9 }
 0x2fe   :  { %1371 = vmatpush.msrb.mxu2 %v5532_v46  ;;  %1438 = vmatpush.msrb.mxu3 %v5538_v6 }
 0x2ff   :  { %1458 = vmatpush.msra.mxu0 %v5101_v63  ;;  %1485 = vmatpush.msra.mxu1 %v5545_v42  ;;  %v5564_v63 = vld [vmem:[%s7540_s4 + $0xb8] sm:$0xff] }
 0x300   :  { %1372 = vmatpush.msrb.mxu2 %v5551_v41  ;;  %1439 = vmatpush.msrb.mxu3 %v5557_v34 }
 0x301   :  { %1459 = vmatpush.msra.mxu0 %v5110_v31  ;;  %1486 = vmatpush.msra.mxu1 %v5564_v63  ;;  %v5583_v31 = vld [vmem:[%s7540_s4 + $0xa0] sm:$0xff] }
 0x302   :  { %1373 = vmatpush.msrb.mxu2 %v5570_v43  ;;  %1440 = vmatpush.msrb.mxu3 %v5576_v59 }
 0x303   :  { %1460 = vmatpush.msra.mxu0 %v5119_v20  ;;  %1487 = vmatpush.msra.mxu1 %v5583_v31  ;;  %v5598_v20 = vld [vmem:[%s7539_s2 + $0x118] sm:$0xff] }
 0x304   :  { %1374 = vmatpush.msrb.mxu2 %v5589_v13  ;;  %1276 = vmatmul.f32.vlgmr.msra.gmra.mxu3 %v5483_v62 }
 0x305   :  { %1256 = vmatmul.f32.vlgmr.msra.gmra.mxu2 %v5483_v62  ;;  %1347 = vmatmul.f32.vlgmr.msrb.gmra.mxu0 %v5522_v9 }
 0x306   :  { %1375 = vmatpush.msrb.mxu2 %v5598_v20  ;;  %1441 = vmatpush.msrb.mxu3 %v5604_v39 }
 0x307   :  { %1461 = vmatpush.msra.mxu0 %v5132_v4  ;;  %1488 = vmatpush.msra.mxu1 %v5611_v54  ;;  %v5630_v4 = vld [vmem:[%s7540_s4 + $0x70] sm:$0xff] }
 0x308   :  { %1376 = vmatpush.msrb.mxu2 %v5617_v57  ;;  %1442 = vmatpush.msrb.mxu3 %v5623_v44  ;;  %8191 = vst [vmem:[#allocation24_spill] sm:$0xff] %v5630_v4 }
 0x309   :  { %1462 = vmatpush.msra.mxu0 %v5141_v51  ;;  %1489 = vmatpush.msra.mxu1 %v5630_v4  ;;  %v5649_v51 = vld [vmem:[%s7540_s4 + $0x58] sm:$0xff] }
 0x30a   :  { %1377 = vmatpush.msrb.mxu2 %v5636_v52  ;;  %1443 = vmatpush.msrb.mxu3 %v5642_v56  ;;  %8192 = vst [vmem:[#allocation39_spill] sm:$0xff] %v5649_v51 }
 0x30b   :  { %1463 = vmatpush.msra.mxu0 %v5150_v50  ;;  %1490 = vmatpush.msra.mxu1 %v5649_v51  ;;  %v5668_v50 = vld [vmem:[%s7540_s4 + $0x40] sm:$0xff]  ;;  %v5775_v51 = vld [vmem:[%s7540_s4 + $0x48] sm:$0xff] }
 0x30c   :  { %1378 = vmatpush.msrb.mxu2 %v5655_v11  ;;  %1444 = vmatpush.msrb.mxu3 %v5661_v17  ;;  %8193 = vst [vmem:[#allocation57_spill] sm:$0xff] %v5668_v50 }
 0x30d   :  { %1464 = vmatpush.msra.mxu0 %v5159_v47  ;;  %1491 = vmatpush.msra.mxu1 %v5668_v50  ;;  %v5687_v47 = vld [vmem:[%s7540_s4 + $0x28] sm:$0xff]  ;;  %v5756_v50 = vld [vmem:[%s7540_s4 + $0x60] sm:$0xff]  ;;  %8201 = vst [vmem:[#allocation45_spill] sm:$0xff] %v5775_v51 }
 0x30e   :  { %1379 = vmatpush.msrb.mxu2 %v5674_v30  ;;  %1445 = vmatpush.msrb.mxu3 %v5680_v2  ;;  %8194 = vst [vmem:[#allocation27_spill] sm:$0xff] %v5687_v47 }
 0x30f   :  { %1465 = vmatpush.msra.mxu0 %v5168_v32  ;;  %1492 = vmatpush.msra.mxu1 %v5687_v47  ;;  %v5706_v32 = vld [vmem:[%s7540_s4 + $0x10] sm:$0xff]  ;;  %v5737_v47 = vld [vmem:[%s7540_s4 + $0x78] sm:$0xff]  ;;  %8198 = vst [vmem:[#allocation43_spill] sm:$0xff] %v5756_v50 }
 0x310   :  { %1380 = vmatpush.msrb.mxu2 %v5693_v14  ;;  %1446 = vmatpush.msrb.mxu3 %v5699_v35  ;;  %8195 = vst [vmem:[#allocation41_spill] sm:$0xff] %v5706_v32 }
 0x311   :  { %1466 = vmatpush.msra.mxu0 %v5177_v21  ;;  %1493 = vmatpush.msra.mxu1 %v5706_v32  ;;  %v5725_v21 = vld [vmem:[%s7539_s2 + $0x168] sm:$0xff]  ;;  %v5731_v32 = vld [vmem:[%s7539_s2 + $0x70] sm:$0xff] }
 0x312   :  { %1381 = vmatpush.msrb.mxu2 %v5712_v48  ;;  %1447 = vmatpush.msrb.mxu3 %v5718_v12  ;;  %8196 = vst [vmem:[#allocation58_spill] sm:$0xff] %v5725_v21 }
 0x313   :  { %1467 = vmatpush.msra.mxu0 %v5186_v1  ;;  %1609 = vmatpush.msrb.mxu1 %v5725_v21  ;;  %v5744_v1 = vld [vmem:[%s7539_s2 + $0x150] sm:$0xff]  ;;  %v5750_v21 = vld [vmem:[%s7539_s2 + $0x58] sm:$0xff] }
 0x314   :  { %1382 = vmatpush.msrb.mxu2 %v5731_v32  ;;  %1448 = vmatpush.msrb.mxu3 %v5737_v47  ;;  %8197 = vst [vmem:[#allocation28_spill] sm:$0xff] %v5744_v1 }
 0x315   :  { %1468 = vmatpush.msra.mxu0 %v5195_v60  ;;  %1610 = vmatpush.msrb.mxu1 %v5744_v1  ;;  %v5763_v60 = vld [vmem:[%s7539_s2 + $0x138] sm:$0xff]  ;;  %v5769_v1 = vld [vmem:[%s7539_s2 + $0x40] sm:$0xff] }
 0x316   :  { %1383 = vmatpush.msrb.mxu2 %v5750_v21  ;;  %1449 = vmatpush.msrb.mxu3 %v5756_v50  ;;  %8199 = vst [vmem:[#allocation37_spill] sm:$0xff] %v5763_v60 }
 0x317   :  { %1469 = vmatpush.msra.mxu0 %v5204_v27  ;;  %1611 = vmatpush.msrb.mxu1 %v5763_v60  ;;  %8200 = vst [vmem:[#allocation29_spill] sm:$0xff] %v5769_v1  ;;  %v5782_v27 = vld [vmem:[%s7539_s2 + $0x120] sm:$0xff]  ;;  %v5788_v60 = vld [vmem:[%s7539_s2 + $0x28] sm:$0xff] }
 0x318   :  { %1384 = vmatpush.msrb.mxu2 %v5769_v1  ;;  %1450 = vmatpush.msrb.mxu3 %v5775_v51  ;;  %8202 = vst [vmem:[#allocation30_spill] sm:$0xff] %v5782_v27  ;;  %v5794_v51 = vld [vmem:[%s7540_s4 + $0x30] sm:$0xff] }
 0x319   :  { %1470 = vmatpush.msra.mxu0 %v5213_v53  ;;  %1612 = vmatpush.msrb.mxu1 %v5782_v27  ;;  %8203 = vst [vmem:[#allocation47_spill] sm:$0xff] %v5788_v60  ;;  %v5801_v53 = vld [vmem:[%s7539_s2 + $0x108] sm:$0xff]  ;;  %v5807_v27 = vld [vmem:[%s7539_s2 + $0x10] sm:$0xff] }
 0x31a   :  { %1385 = vmatpush.msrb.mxu2 %v5788_v60  ;;  %8204 = vst [vmem:[#allocation49_spill] sm:$0xff] %v5794_v51  ;;  %1451 = vmatpush.msrb.mxu3 %v5794_v51  ;;  %v5813_v51 = vld [vmem:[%s7540_s4 + $0x18] sm:$0xff] }
 0x31b   :  { %1471 = vmatpush.msra.mxu0 %v5222_v22  ;;  %8205 = vst [vmem:[#allocation31_spill] sm:$0xff] %v5801_v53  ;;  %1613 = vmatpush.msrb.mxu1 %v5801_v53  ;;  %v5821_v22 = vld [vmem:[%s7542_s6 + $0x168] sm:$0xff]  ;;  %v5827_v53 = vld [vmem:[%s7540_s4] sm:$0xff] }
 0x31c   :  { %8206 = vst [vmem:[#allocation33_spill] sm:$0xff] %v5807_v27  ;;  %1386 = vmatpush.msrb.mxu2 %v5807_v27  ;;  %1452 = vmatpush.msrb.mxu3 %v5813_v51  ;;  %v8272_v27 = vld [vmem:[#allocation18_spill] sm:$0xff] }
 0x31d   :  { %8207 = vst [vmem:[#allocation63_spill] sm:$0xff] %v5813_v51  ;;  %1387 = vmatmul.f32.vlgmr.msrb.gmra.mxu2 %v5522_v9  ;;  %1472 = vmatpush.msra.mxu0 %v5232_v29  ;;  %v5833_v51 = vld [vmem:[%s7542_s6 + $0x170] sm:$0xff] }
 0x31e   :  { %8208 = vst [vmem:[#allocation51_spill] sm:$0xff] %v5821_v22  ;;  %1498 = vmatpush.msra.mxu2 %v5821_v22  ;;  %1453 = vmatpush.msrb.mxu3 %v5827_v53  ;;  %v5840_v29 = vld [vmem:[%s7542_s6 + $0x150] sm:$0xff] }
 0x31f   :  { %8209 = vst [vmem:[#allocation55_spill] sm:$0xff] %v5827_v53  ;;  %1473 = vmatpush.msra.mxu0 %v5241_v18  ;;  %v5847_v53 = vld [vmem:[%s7542_s6 + $0x158] sm:$0xff]  ;;  %v5853_v18 = vld [vmem:[%s7539_s2 + $0xf0] sm:$0xff] }
 0x320   :  { %8210 = vst [vmem:[#allocation42_spill] sm:$0xff] %v5833_v51  ;;  %1518 = vmatpush.msra.mxu3 %v5833_v51  ;;  %1499 = vmatpush.msra.mxu2 %v5840_v29  ;;  %v5859_v51 = vld [vmem:[%s7542_s6 + $0x138] sm:$0xff] }
 0x321   :  { %8211 = vst [vmem:[#allocation34_spill] sm:$0xff] %v5840_v29  ;;  %1538 = vmatpush.msrb.mxu0 %v5248_v24  ;;  %1614 = vmatpush.msrb.mxu1 %v5853_v18  ;;  %v5866_v24 = vld [vmem:[%s7542_s6 + $0x140] sm:$0xff] }
 0x322   :  { %8212 = vst [vmem:[#allocation22_spill] sm:$0xff] %v5847_v53  ;;  %1519 = vmatpush.msra.mxu3 %v5847_v53  ;;  %1500 = vmatpush.msra.mxu2 %v5859_v51  ;;  %v5878_v53 = vld [vmem:[%s7542_s6 + $0x120] sm:$0xff] }
 0x323   :  { %8213 = vst [vmem:[#allocation70_spill] sm:$0xff] %v5853_v18  ;;  %1539 = vmatpush.msrb.mxu0 %v5257_v23  ;;  %v5872_v18 = vld [vmem:[%s7539_s2 + $0xd8] sm:$0xff]  ;;  %v5885_v23 = vld [vmem:[%s7542_s6 + $0x128] sm:$0xff] }
 0x324   :  { %8214 = vst [vmem:[#allocation35_spill] sm:$0xff] %v5859_v51  ;;  %1520 = vmatpush.msra.mxu3 %v5866_v24  ;;  %1615 = vmatpush.msrb.mxu1 %v5872_v18 }
 0x325   :  { %8215 = vst [vmem:[#allocation59_spill] sm:$0xff] %v5866_v24  ;;  %1501 = vmatpush.msra.mxu2 %v5878_v53  ;;  %1540 = vmatpush.msrb.mxu0 %v5266_v40  ;;  %v5897_v24 = vld [vmem:[%s7542_s6 + $0x108] sm:$0xff]  ;;  %v5904_v40 = vld [vmem:[%s7542_s6 + $0x110] sm:$0xff] }
 0x326   :  { %8216 = vst [vmem:[#allocation48_spill] sm:$0xff] %v5872_v18  ;;  %1521 = vmatpush.msra.mxu3 %v5885_v23  ;;  %v5891_v18 = vld [vmem:[%s7539_s2 + $0xc0] sm:$0xff] }
 0x327   :  { %8217 = vst [vmem:[#allocation36_spill] sm:$0xff] %v5878_v53  ;;  %1616 = vmatpush.msrb.mxu1 %v5891_v18  ;;  %1502 = vmatpush.msra.mxu2 %v5897_v24 }
 0x328   :  { %8218 = vst [vmem:[#allocation38_spill] sm:$0xff] %v5885_v23  ;;  %1541 = vmatpush.msrb.mxu0 %v5275_v38  ;;  %1522 = vmatpush.msra.mxu3 %v5904_v40  ;;  %v5916_v23 = vld [vmem:[%s7542_s6 + $0xf0] sm:$0xff]  ;;  %v5923_v38 = vld [vmem:[%s7542_s6 + $0xf8] sm:$0xff] }
 0x329   :  { %8219 = vst [vmem:[#allocation73_spill] sm:$0xff] %v5891_v18  ;;  %v5910_v18 = vld [vmem:[%s7539_s2 + $0xa8] sm:$0xff]  ;;  %1503 = vmatpush.msra.mxu2 %v5916_v23 }
 0x32a   :  { %8220 = vst [vmem:[#allocation61_spill] sm:$0xff] %v5897_v24  ;;  %1617 = vmatpush.msrb.mxu1 %v5910_v18  ;;  %1542 = vmatpush.msrb.mxu0 %v5284_v3  ;;  %v5942_v3 = vld [vmem:[%s7542_s6 + $0xe0] sm:$0xff] }
 0x32b   :  { %8221 = vst [vmem:[#allocation65_spill] sm:$0xff] %v5904_v40  ;;  %1523 = vmatpush.msra.mxu3 %v5923_v38  ;;  %v5935_v40 = vld [vmem:[%s7542_s6 + $0xd8] sm:$0xff] }
 0x32c   :  { %8222 = vst [vmem:[#allocation54_spill] sm:$0xff] %v5910_v18  ;;  %v5929_v18 = vld [vmem:[%s7539_s2 + $0x90] sm:$0xff]  ;;  %1504 = vmatpush.msra.mxu2 %v5935_v40  ;;  %1543 = vmatpush.msrb.mxu0 %v5293_v61  ;;  %v5961_v61 = vld [vmem:[%s7542_s6 + $0xc8] sm:$0xff] }
 0x32d   :  { %8223 = vst [vmem:[#allocation40_spill] sm:$0xff] %v5916_v23  ;;  %1618 = vmatpush.msrb.mxu1 %v5929_v18  ;;  %1524 = vmatpush.msra.mxu3 %v5942_v3 }
 0x32e   :  { %8224 = vst [vmem:[#allocation44_spill] sm:$0xff] %v5923_v38  ;;  %v5954_v38 = vld [vmem:[%s7542_s6 + $0xc0] sm:$0xff]  ;;  %1544 = vmatpush.msrb.mxu0 %v5302_v15  ;;  %v5980_v15 = vld [vmem:[%s7542_s6 + $0xb0] sm:$0xff] }
 0x32f   :  { %8225 = vst [vmem:[#allocation56_spill] sm:$0xff] %v5929_v18  ;;  %v5948_v18 = vld [vmem:[%s7539_s2 + $0x78] sm:$0xff]  ;;  %1505 = vmatpush.msra.mxu2 %v5954_v38  ;;  %1525 = vmatpush.msra.mxu3 %v5961_v61 }
 0x330   :  { %8226 = vst [vmem:[#allocation67_spill] sm:$0xff] %v5935_v40  ;;  %1619 = vmatpush.msrb.mxu1 %v5948_v18  ;;  %1545 = vmatpush.msrb.mxu0 %v5311_v36  ;;  %v5999_v36 = vld [vmem:[%s7542_s6 + $0x98] sm:$0xff]  ;;  %v8269_v40 = vld [vmem:[#allocation68_spill] sm:$0xff] }
 0x331   :  { %8227 = vst [vmem:[#allocation71_spill] sm:$0xff] %v5942_v3  ;;  %v5973_v3 = vld [vmem:[%s7542_s6 + $0xa8] sm:$0xff]  ;;  %1526 = vmatpush.msra.mxu3 %v5980_v15 }
 0x332   :  { %8228 = vst [vmem:[#allocation77_spill] sm:$0xff] %v5948_v18  ;;  %v5967_v18 = vld [vmem:[%s7539_s2 + $0x60] sm:$0xff]  ;;  %1506 = vmatpush.msra.mxu2 %v5973_v3  ;;  %1546 = vmatpush.msrb.mxu0 %v5320_v33 }
 0x333   :  { %8229 = vst [vmem:[#allocation46_spill] sm:$0xff] %v5954_v38  ;;  %1620 = vmatpush.msrb.mxu1 %v5967_v18  ;;  %1527 = vmatpush.msra.mxu3 %v5999_v36  ;;  %v6018_v33 = vld [vmem:[%s7542_s6 + $0x80] sm:$0xff] }
 0x334   :  { %8230 = vst [vmem:[#allocation50_spill] sm:$0xff] %v5961_v61  ;;  %v5992_v61 = vld [vmem:[%s7542_s6 + $0x90] sm:$0xff]  ;;  %1547 = vmatpush.msrb.mxu0 %v5329_v10  ;;  %v6038_v10 = vld [vmem:[%s7539_s2] sm:$0xff] }
 0x335   :  { %8231 = vst [vmem:[#allocation6_spill] sm:$0xff] %v5967_v18  ;;  %v5986_v18 = vld [vmem:[%s7539_s2 + $0x48] sm:$0xff]  ;;  %1507 = vmatpush.msra.mxu2 %v5992_v61  ;;  %1528 = vmatpush.msra.mxu3 %v6018_v33 }
 0x336   :  { %8232 = vst [vmem:[#allocation72_spill] sm:$0xff] %v5973_v3  ;;  %1621 = vmatpush.msrb.mxu1 %v5986_v18  ;;  %1548 = vmatpush.msrb.mxu0 %v5338_v19  ;;  %v6052_v19 = vld [vmem:[%s7542_s6 + $0x30] sm:$0xff] }
 0x337   :  { %8233 = vst [vmem:[#allocation74_spill] sm:$0xff] %v5980_v15  ;;  %v6011_v15 = vld [vmem:[%s7542_s6 + $0x78] sm:$0xff]  ;;  %1529 = vmatpush.msra.mxu3 %v5344_v55 }
 0x338   :  { %8234 = vst [vmem:[#allocation8_spill] sm:$0xff] %v5986_v18  ;;  %v6005_v18 = vld [vmem:[%s7539_s2 + $0x30] sm:$0xff]  ;;  %1508 = vmatpush.msra.mxu2 %v6011_v15  ;;  %1549 = vmatpush.msrb.mxu0 %v5352_v8  ;;  %v6060_v55 = vld [vmem:[%s7542_s6 + $0x18] sm:$0xff]  ;;  %v6068_v8 = vld [vmem:[%s7542_s6] sm:$0xff] }
 0x339   :  { %8235 = vst [vmem:[#allocation52_spill] sm:$0xff] %v5992_v61  ;;  %1622 = vmatpush.msrb.mxu1 %v6005_v18  ;;  %1530 = vmatpush.msra.mxu3 %v5358_v45  ;;  %v8247_v45 = vld [vmem:[#allocation12_spill] sm:$0xff] }
 0x33a   :  { %8236 = vst [vmem:[#allocation10_spill] sm:$0xff] %v5999_v36  ;;  %v6030_v36 = vld [vmem:[%s7542_s6 + $0x60] sm:$0xff]  ;;  %1550 = vmatpush.msrb.mxu0 %v5366_v28  ;;  %v8248_v28 = vld [vmem:[#allocation62_spill] sm:$0xff] }
 0x33b   :  { %8237 = vst [vmem:[#allocation75_spill] sm:$0xff] %v6005_v18  ;;  %v6024_v18 = vld [vmem:[%s7539_s2 + $0x18] sm:$0xff]  ;;  %1509 = vmatpush.msra.mxu2 %v6030_v36  ;;  %1531 = vmatpush.msra.mxu3 %v5372_v7  ;;  %v8249_v7 = vld [vmem:[#allocation4_spill] sm:$0xff] }
 0x33c   :  { %8238 = vst [vmem:[#allocation13_spill] sm:$0xff] %v6011_v15  ;;  %1623 = vmatpush.msrb.mxu1 %v6024_v18  ;;  %1551 = vmatpush.msrb.mxu0 %v5380_v26  ;;  %v8252_v26 = vld [vmem:[#allocation32_spill] sm:$0xff]  ;;  %v8268_v15 = vld [vmem:[#allocation15_spill] sm:$0xff] }
 0x33d   :  { %8239 = vst [vmem:[#allocation76_spill] sm:$0xff] %v6018_v33  ;;  %1532 = vmatpush.msra.mxu3 %v5386_v58  ;;  %v8253_v58 = vld [vmem:[#allocation20_spill] sm:$0xff]  ;;  %v8267_v33 = vld [vmem:[#allocation11_spill] sm:$0xff] }
 0x33e   :  { %8240 = vst [vmem:[#allocation16_spill] sm:$0xff] %v6024_v18  ;;  %1624 = vmatpush.msrb.mxu1 %v6038_v10  ;;  %v6044_v18 = vld [vmem:[%s7542_s6 + $0x48] sm:$0xff]  ;;  %1552 = vmatpush.msrb.mxu0 %v8247_v45  ;;  %v6083_v45 = vld [vmem:[%s7539_s2 + $0xe0] sm:$0xff] }
 0x33f   :  { %8241 = vst [vmem:[#allocation5_spill] sm:$0xff] %v6030_v36  ;;  %1510 = vmatpush.msra.mxu2 %v6044_v18  ;;  %1533 = vmatpush.msra.mxu3 %v8249_v7  ;;  %v6119_v7 = vld [vmem:[%s7539_s2 + $0x50] sm:$0xff] }
 0x340   :  { %8242 = vst [vmem:[#allocation7_spill] sm:$0xff] %v6038_v10  ;;  %v8250_v10 = vld [vmem:[#allocation17_spill] sm:$0xff] }
 0x341   :  { %8243 = vst [vmem:[#allocation19_spill] sm:$0xff] %v6044_v18  ;;  %1511 = vmatpush.msra.mxu2 %v6052_v19  ;;  %1553 = vmatpush.msrb.mxu0 %v8250_v10  ;;  %v8255_v18 = vld [vmem:[#allocation53_spill] sm:$0xff]  ;;  %v6089_v10 = vld [vmem:[%s7539_s2 + $0xc8] sm:$0xff] }
 0x342   :  { %8244 = vst [vmem:[#allocation23_spill] sm:$0xff] %v6052_v19  ;;  %v8254_v19 = vld [vmem:[#allocation25_spill] sm:$0xff] }
 0x343   :  { %8245 = vst [vmem:[#allocation26_spill] sm:$0xff] %v6060_v55  ;;  %1512 = vmatpush.msra.mxu2 %v6060_v55  ;;  %v8251_v55 = vld [vmem:[#allocation21_spill] sm:$0xff] }
 0x344   :  { %8246 = vst [vmem:[#allocation60_spill] sm:$0xff] %v6068_v8 }
 0x345   :  { %1513 = vmatpush.msra.mxu2 %v6068_v8  ;;  %8256 = vst [vmem:[#allocation78_spill] sm:$0xff] %v6083_v45 }
 0x346   :  { %8257 = vst [vmem:[#allocation79_spill] sm:$0xff] %v6089_v10 }
 0x347   :  { %1629 = vmatpush.msrb.mxu2 %v8248_v28  ;;  %v6113_v28 = vld [vmem:[%s7539_s2 + $0x68] sm:$0xff]  ;;  %8262 = vst [vmem:[#allocation12_spill] sm:$0xff] %v6119_v7 }
 0x348   :  { %8261 = vst [vmem:[#allocation81_spill] sm:$0xff] %v6113_v28 }
 0x349   :  { %1630 = vmatpush.msrb.mxu2 %v8251_v55  ;;  %v6107_v55 = vld [vmem:[%s7539_s2 + $0x80] sm:$0xff] }
 0x34a   :  { %8260 = vst [vmem:[#allocation9_spill] sm:$0xff] %v6107_v55 }
 0x34b   :  { %1631 = vmatpush.msrb.mxu2 %v8252_v26  ;;  %v6125_v26 = vld [vmem:[%s7539_s2 + $0x38] sm:$0xff] }
 0x34c   :  { %8263 = vst [vmem:[#allocation62_spill] sm:$0xff] %v6125_v26 }
 0x34d   :  { %1632 = vmatpush.msrb.mxu2 %v8253_v58  ;;  %v6131_v58 = vld [vmem:[%s7539_s2 + $0x20] sm:$0xff] }
 0x34e   :  { %8264 = vst [vmem:[#allocation4_spill] sm:$0xff] %v6131_v58 }
 0x34f   :  { %1633 = vmatpush.msrb.mxu2 %v8254_v19  ;;  %v6095_v19 = vld [vmem:[%s7539_s2 + $0xb0] sm:$0xff] }
 0x350   :  { %8258 = vst [vmem:[#allocation3_spill] sm:$0xff] %v6095_v19 }
 0x351   :  { %1634 = vmatpush.msrb.mxu2 %v8255_v18  ;;  %v6101_v18 = vld [vmem:[%s7539_s2 + $0x98] sm:$0xff] }
 0x352   :  { %8259 = vst [vmem:[#allocation80_spill] sm:$0xff] %v6101_v18 }
 0x353   :  { %1635 = vmatpush.msrb.mxu2 %v6083_v45 }
 0x355   :  { %1636 = vmatpush.msrb.mxu2 %v6089_v10 }
 0x357   :  { %1637 = vmatpush.msrb.mxu2 %v6095_v19  ;;  %v8266_v19 = vld [vmem:[#allocation69_spill] sm:$0xff] }
 0x359   :  { %1638 = vmatpush.msrb.mxu2 %v6101_v18 }
 0x35b   :  { %1639 = vmatpush.msrb.mxu2 %v6107_v55 }
 0x35d   :  { %1640 = vmatpush.msrb.mxu2 %v6113_v28  ;;  %v6137_v28 = vld [vmem:[%s7539_s2 + $0x8] sm:$0xff] }
 0x35e   :  { %8265 = vst [vmem:[#allocation17_spill] sm:$0xff] %v6137_v28 }
 0x35f   :  { %1641 = vmatpush.msrb.mxu2 %v6119_v7 }
 0x361   :  { %1642 = vmatpush.msrb.mxu2 %v6125_v26  ;;  %v2522_v26 = vld [vmem:[%s7544_s0 + $0x68] sm:$0xff] }
 0x363   :  { %1643 = vmatpush.msrb.mxu2 %v6131_v58 }
 0x365   :  { %1644 = vmatpush.msrb.mxu2 %v6137_v28  ;;  %v2521_v28 = vld [vmem:[%s7544_s0 + $0x60] sm:$0xff] }
 0x36b   :  { %v1237_v7 = vpop.f32.mrf.mxu1 }
 0x36c   :  { %v1238_v36 = vadd.f32 %v1237_v7, %v8267_v33  ;;  %v8270_v7 = vld [vmem:[#allocation64_spill] sm:$0xff] }
 0x37a   :  { %v6140_v55 = vpop.f32.mrf.mxu0  ;;  %v1368_v18 = vpop.f32.mrf.mxu1 }
 0x37b   :  { %v1369_v10 = vadd.f32 %v1368_v18, %v8266_v19 }
 0x37d   :  { %v1411_v45 = vadd.f32 %v2522_v26, %v1369_v10 }
 0x37f   :  { %v2525_v8 = vmul.f32 -1.442695, %v1411_v45  ;;  %v1177_v58 = vpop.f32.mrf.mxu2  ;;  %v1197_v18 = vpop.f32.mrf.mxu3 }
 0x380   :  { %v1178_v61 = vadd.f32 %v1177_v58, %v8268_v15  ;;  %v1198_v58 = vadd.f32 %v1197_v18, %v8270_v7 }
 0x381   :  { %2621 = vpow2.f32 %v2525_v8 }
 0x382   :  { %v1280_v3 = vadd.f32 %v1238_v36, %v1178_v61  ;;  %v1348_v38 = vpop.f32.mrf.mxu0  ;;  %v8271_v61 = vld [vmem:[#allocation14_spill] sm:$0xff] }
 0x383   :  { %v1349_v23 = vadd.f32 %v1348_v38, %v8269_v40 }
 0x384   :  { %v2519_v24 = vmul.f32 -1.442695, %v1280_v3 }
 0x385   :  { %v1391_v53 = vadd.f32 %v2521_v28, %v1349_v23 }
 0x386   :  { %2623 = vpow2.f32 %v2519_v24 }
 0x387   :  { %v2622_v10 = vpop.eup %2621  ;;  %v2524_v45 = vmul.f32 -1.442695, %v1391_v53 }
 0x388   :  { %v1257_v26 = vpop.f32.mrf.mxu2  ;;  %v6152_v19 = vadd.f32 1.0, %v2622_v10 }
 0x389   :  { %2625 = vpow2.f32 %v2524_v45  ;;  %v1258_v36 = vadd.f32 %v1257_v26, %v8271_v61  ;;  %v1277_v61 = vpop.f32.mrf.mxu3 }
 0x38a   :  { %2627 = vrcp.f32 %v6152_v19  ;;  %v1278_v60 = vadd.f32 %v1277_v61, %v8272_v27  ;;  %vm1421_vm14 = vweird.f32 %v6152_v19 }
 0x38b   :  { %v1300_v8 = vadd.f32 %v1258_v36, %v1198_v58 }
 0x38c   :  { %v2624_v15 = vpop.eup %2623 }
 0x38d   :  { %v1284_v33 = vadd.f32 1.0, %v2624_v15  ;;  %v2520_v38 = vmul.f32 -1.442695, %v1300_v8 }
 0x38f   :  { %v2626_v3 = vpop.eup %2625  ;;  %2629 = vrcp.f32 %v1284_v33  ;;  %v1296_v15 = vand.u32 2147483648, %v1284_v33  ;;  %vm1290_vm9 = vweird.f32 %v1284_v33 }
 0x390   :  { %v1395_v24 = vadd.f32 1.0, %v2626_v3  ;;  %2631 = vpow2.f32 %v2520_v38  ;;  %v6157_v53 = vpop.eup %2627  ;;  %v1294_v38 = vand.u32 2147483647, %v1284_v33 }
 0x391   :  { %v1417_v18 = vmul.f32 %v6157_v53, %v6152_v19  ;;  %v1297_v29 = vor.u32 1.1754944e-38, %v1296_v15  ;;  %vm1422_vm0 = vweird.f32 %v6157_v53 }
 0x392   :  { %2633 = vrcp.f32 %v1395_v24  ;;  %v1407_v51 = vand.u32 2147483648, %v1395_v24  ;;  %vm1295_vm12 = vcmp.eq.f32.partialorder %v1294_v38, 8.507059e+37  ;;  %vm1401_vm13 = vweird.f32 %v1395_v24  ;;  %vm1423_vm3 = vmor %vm1421_vm14, %vm1422_vm0 }
 0x393   :  { %v1418_v8 = vsub.f32 1.0, %v1417_v18 }
 0x395   :  { %v2630_v23 = vpop.eup %2629 }
 0x396   :  { %v2632_v28 = vpop.eup %2631  ;;  %v1286_v10 = vmul.f32 %v2630_v23, %v1284_v33  ;;  %vm1291_vm8 = vweird.f32 %v2630_v23 }
 0x397   :  { %v6161_v45 = vadd.f32 1.0, %v2632_v28  ;;  %vm1292_vm10 = vmor %vm1290_vm9, %vm1291_vm8  ;;  %v1405_v28 = vand.u32 2147483647, %v1395_v24 }
 0x398   :  { %v2634_v26 = vpop.eup %2633  ;;  %v1287_v58 = vsub.f32 1.0, %v1286_v10  ;;  %v1419_v10 = vmul.f32 %v6157_v53, %v1418_v8  ;;  %v1408_v8 = vor.u32 1.1754944e-38, %v1407_v51 }
 0x399   :  { %2635 = vrcp.f32 %v6161_v45  ;;  %v1397_v36 = vmul.f32 %v2634_v26, %v1395_v24  ;;  %vm1402_vm11 = vweird.f32 %v2634_v26  ;;  %vm1406_vm1 = vcmp.eq.f32.partialorder %v1405_v28, 8.507059e+37 }
 0x39a   :  { %v1288_v3 = vmul.f32 %v2630_v23, %v1287_v58  ;;  %v8273_v58 = vld [vmem:[#allocation66_spill] sm:$0xff]  ;;  %vm1403_vm15 = vmor %vm1401_vm13, %vm1402_vm11  ;;  %v1316_v24 = vand.u32 2147483648, %v6161_v45  ;;  %vm1310_vm4 = vweird.f32 %v6161_v45 }
 0x39b   :  { %v1398_v7 = vsub.f32 1.0, %v1397_v36  ;;  %v1218_v1 = vadd.f32 %v6140_v55, %v8273_v58 }
 0x39c   :  { %v1289_v40 = vadd.f32 %v2630_v23, %v1288_v3 }
 0x39d   :  { %v1399_v22 = vmul.f32 %v2634_v26, %v1398_v7 }
 0x39e   :  { %v1293_v4 = vsel %vm1292_vm10, %v2630_v23, %v1289_v40 }
 0x39f   :  { %v2636_v18 = vpop.eup %2635  ;;  %v1298_v50 = vsel %vm1295_vm12, %v1297_v29, %v1293_v4  ;;  %v1400_v36 = vadd.f32 %v2634_v26, %v1399_v22  ;;  %v2523_v4 = vld [vmem:[%s7544_s0 + $0x70] sm:$0xff]  ;;  %v1420_v29 = vadd.f32 %v6157_v53, %v1419_v10 }
 0x3a0   :  { %v1306_v33 = vmul.f32 %v2636_v18, %v6161_v45  ;;  %v1320_v7 = vmul.f32 %v1298_v50, %v1278_v60  ;;  %v1388_v15 = vpop.f32.mrf.mxu2  ;;  %v1427_v50 = vand.u32 2147483648, %v6152_v19  ;;  %v1425_v60 = vand.u32 2147483647, %v6152_v19 }
 0x3a1   :  { %v1389_v40 = vadd.f32 %v1388_v15, %v4054_v49  ;;  %v1404_v61 = vsel %vm1403_vm15, %v2634_v26, %v1400_v36  ;;  %vm1311_vm2 = vweird.f32 %v2636_v18  ;;  %v1314_v26 = vand.u32 2147483647, %v6161_v45 }
 0x3a2   :  { %v1307_v23 = vsub.f32 1.0, %v1306_v33  ;;  %v1321_v55 = vadd.f32 %v1320_v7, %v1218_v1  ;;  %v1409_v22 = vsel %vm1406_vm1, %v1408_v8, %v1404_v61  ;;  %v1424_v38 = vsel %vm1423_vm3, %v6157_v53, %v1420_v29  ;;  %vm1312_vm5 = vmor %vm1310_vm4, %vm1311_vm2  ;;  %v6364_v29 = vld [vmem:[%s7542_s6 + $0x178] sm:$0xff] }
 0x3a3   :  { %v1431_v51 = vmul.f32 %v1409_v22, %v1389_v40  ;;  %v1428_v10 = vor.u32 1.1754944e-38, %v1427_v50  ;;  %v1317_v36 = vor.u32 1.1754944e-38, %v1316_v24  ;;  %vm1426_vm6 = vcmp.eq.f32.partialorder %v1425_v60, 8.507059e+37  ;;  %v8292_v50 = vld [vmem:[#allocation58_spill] sm:$0xff]  ;;  %v8293_v60 = vld [vmem:[#allocation36_spill] sm:$0xff]  ;;  %v6373_v24 = vld [vmem:[%s7542_s6 + $0x160] sm:$0xff] }
 0x3a4   :  { %2637 = vtanh.f32 %v1321_v55  ;;  %v1308_v3 = vmul.f32 %v2636_v18, %v1307_v23  ;;  %vm1315_vm7 = vcmp.eq.f32.partialorder %v1314_v26, 8.507059e+37  ;;  %v8296_v26 = vld [vmem:[#allocation61_spill] sm:$0xff] }
 0x3a5   :  { %v1432_v1 = vadd.f32 %v2523_v4, %v1431_v51  ;;  %v1429_v7 = vsel %vm1426_vm6, %v1428_v10, %v1424_v38  ;;  %v8294_v51 = vld [vmem:[#allocation59_spill] sm:$0xff]  ;;  %v6382_v38 = vld [vmem:[%s7542_s6 + $0x148] sm:$0xff] }
 0x3a6   :  { %v1309_v28 = vadd.f32 %v2636_v18, %v1308_v3  ;;  %v1434_v61 = vsub.f32 1.0, %v1429_v7  ;;  %v1436_v4 = vmul.f32 %v1429_v7, %v5522_v9  ;;  %v6243_v9 = vld [vmem:[%s7540_s4 + $0x110] sm:$0xff]  ;;  %v8295_v3 = vld [vmem:[#allocation28_spill] sm:$0xff]  ;;  %v8301_v7 = vld [vmem:[#allocation30_spill] sm:$0xff] }
 0x3a7   :  { %2639 = vtanh.f32 %v1432_v1  ;;  %v8297_v1 = vld [vmem:[#allocation38_spill] sm:$0xff]  ;;  %v8299_v10 = vld [vmem:[#allocation40_spill] sm:$0xff] }
 0x3a8   :  { %v1313_v33 = vsel %vm1312_vm5, %v2636_v18, %v1309_v28  ;;  %v8291_v18 = vld [vmem:[#allocation22_spill] sm:$0xff]  ;;  %v8298_v28 = vld [vmem:[#allocation37_spill] sm:$0xff] }
 0x3a9   :  { %v1318_v15 = vsel %vm1315_vm7, %v1317_v36, %v1313_v33  ;;  %v8300_v36 = vld [vmem:[#allocation65_spill] sm:$0xff] }
 0x3aa   :  { %v2638_v8 = vpop.eup %2637  ;;  %v1323_v40 = vsub.f32 1.0, %v1318_v15  ;;  %v1325_v23 = vmul.f32 %v1318_v15, %v5483_v62  ;;  %v6203_v62 = vld [vmem:[%s7540_s4 + $0x170] sm:$0xff]  ;;  %v8302_v15 = vld [vmem:[#allocation67_spill] sm:$0xff] }
 0x3ab   :  { %v6391_v33 = vld [vmem:[%s7542_s6 + $0x130] sm:$0xff] }
 0x3ac   :  { %v1324_v19 = vmul.f32 %v2638_v8, %v1323_v40  ;;  %v8303_v8 = vld [vmem:[#allocation44_spill] sm:$0xff]  ;;  %v6400_v40 = vld [vmem:[%s7542_s6 + $0x118] sm:$0xff] }
 0x3ad   :  { %v2640_v55 = vpop.eup %2639 }
 0x3ae   :  { %v1435_v53 = vmul.f32 %v2640_v55, %v1434_v61  ;;  %v6189_v45 = vadd.f32 %v1325_v23, %v1324_v19  ;;  %v8304_v61 = vld [vmem:[#allocation31_spill] sm:$0xff]  ;;  %v8305_v19 = vld [vmem:[#allocation46_spill] sm:$0xff] }
 0x3af   :  { %v8306_v23 = vld [vmem:[#allocation71_spill] sm:$0xff] }
 0x3b0   :  { %v6191_v22 = vadd.f32 %v1436_v4, %v1435_v53  ;;  %1514 = vmatmul.f32.vlgmr.msra.gmra.mxu2 %v6189_v45  ;;  %v6409_v55 = vld [vmem:[%s7542_s6 + $0x100] sm:$0xff]  ;;  %v8307_v53 = vld [vmem:[#allocation70_spill] sm:$0xff]  ;;  %v8308_v4 = vld [vmem:[#allocation72_spill] sm:$0xff] }
 0x3b1   :  { %1756 = vmatpush.msra.mxu2 %v5492_v16  ;;  %v6212_v16 = vld [vmem:[%s7540_s4 + $0x158] sm:$0xff] }
 0x3b2   :  { %1454 = vmatmul.f32.vlgmr.msrb.gmra.mxu3 %v6191_v22  ;;  %1474 = vmatmul.f32.vlgmr.msra.gmra.mxu0 %v6191_v22 }
 0x3b3   :  { %1494 = vmatmul.f32.vlgmr.msra.gmra.mxu1 %v6191_v22  ;;  %1649 = vmatpush.msrb.mxu3 %v5532_v46  ;;  %v6252_v46 = vld [vmem:[%s7540_s4 + $0xf8] sm:$0xff] }
 0x3b4   :  { %1716 = vmatpush.msra.mxu0 %v5538_v6  ;;  %1736 = vmatpush.msra.mxu1 %v6203_v62  ;;  %v6273_v6 = vld [vmem:[%s7540_s4 + $0xe8] sm:$0xff] }
 0x3b5   :  { %1650 = vmatpush.msrb.mxu3 %v5551_v41  ;;  %1757 = vmatpush.msra.mxu2 %v5499_v25  ;;  %v6223_v25 = vld [vmem:[%s7540_s4 + $0x140] sm:$0xff]  ;;  %v6280_v41 = vld [vmem:[%s7540_s4 + $0xc8] sm:$0xff] }
 0x3b6   :  { %1717 = vmatpush.msra.mxu0 %v5557_v34  ;;  %1737 = vmatpush.msra.mxu1 %v6212_v16  ;;  %v6289_v34 = vld [vmem:[%s7540_s4 + $0xb0] sm:$0xff] }
 0x3b7   :  { %1651 = vmatpush.msrb.mxu3 %v5570_v43  ;;  %1758 = vmatpush.msra.mxu2 %v5505_v5  ;;  %v6234_v5 = vld [vmem:[%s7540_s4 + $0x128] sm:$0xff]  ;;  %v6298_v43 = vld [vmem:[%s7540_s4 + $0x98] sm:$0xff] }
 0x3b8   :  { %1645 = vmatmul.f32.vlgmr.msrb.gmra.mxu2 %v6191_v22  ;;  %1718 = vmatpush.msra.mxu0 %v5576_v59  ;;  %v6316_v59 = vld [vmem:[%s7540_s4 + $0x68] sm:$0xff] }
 0x3b9   :  { %1652 = vmatpush.msrb.mxu3 %v5589_v13  ;;  %1738 = vmatpush.msra.mxu1 %v6223_v25  ;;  %v8276_v13 = vld [vmem:[#allocation24_spill] sm:$0xff] }
 0x3ba   :  { %1534 = vmatmul.f32.vlgmr.msra.gmra.mxu3 %v6189_v45  ;;  %1554 = vmatmul.f32.vlgmr.msrb.gmra.mxu0 %v6189_v45 }
 0x3bb   :  { %1625 = vmatmul.f32.vlgmr.msrb.gmra.mxu1 %v6191_v22  ;;  %1653 = vmatpush.msrb.mxu3 %v5598_v20  ;;  %v8277_v20 = vld [vmem:[#allocation45_spill] sm:$0xff] }
 0x3bc   :  { %1719 = vmatpush.msra.mxu0 %v5604_v39  ;;  %1739 = vmatpush.msra.mxu1 %v6234_v5  ;;  %v6325_v39 = vld [vmem:[%s7540_s4 + $0x50] sm:$0xff] }
 0x3bd   :  { %1654 = vmatpush.msrb.mxu3 %v5617_v57  ;;  %1759 = vmatpush.msra.mxu2 %v5511_v0  ;;  %v6259_v0 = vld [vmem:[%s7540_s4 + $0x100] sm:$0xff] }
 0x3be   :  { %1720 = vmatpush.msra.mxu0 %v5623_v44  ;;  %1740 = vmatpush.msra.mxu1 %v6243_v9  ;;  %v8279_v57 = vld [vmem:[#allocation39_spill] sm:$0xff]  ;;  %v8280_v44 = vld [vmem:[#allocation49_spill] sm:$0xff] }
 0x3bf   :  { %1655 = vmatpush.msrb.mxu3 %v5636_v52  ;;  %1760 = vmatpush.msra.mxu2 %v5517_v37  ;;  %v6266_v37 = vld [vmem:[%s7540_s4 + $0xe0] sm:$0xff]  ;;  %v6334_v52 = vld [vmem:[%s7540_s4 + $0x38] sm:$0xff] }
 0x3c0   :  { %1721 = vmatpush.msra.mxu0 %v5642_v56  ;;  %1741 = vmatpush.msra.mxu1 %v6252_v46  ;;  %v8281_v56 = vld [vmem:[#allocation33_spill] sm:$0xff] }
 0x3c1   :  { %1656 = vmatpush.msrb.mxu3 %v5655_v11  ;;  %1761 = vmatpush.msra.mxu2 %v6259_v0  ;;  %v8282_v11 = vld [vmem:[#allocation57_spill] sm:$0xff] }
 0x3c2   :  { %1722 = vmatpush.msra.mxu0 %v5661_v17  ;;  %1742 = vmatpush.msra.mxu1 %v6266_v37  ;;  %v8283_v17 = vld [vmem:[#allocation63_spill] sm:$0xff] }
 0x3c3   :  { %1657 = vmatpush.msrb.mxu3 %v5674_v30  ;;  %1762 = vmatpush.msra.mxu2 %v6273_v6  ;;  %v8284_v30 = vld [vmem:[#allocation51_spill] sm:$0xff] }
 0x3c4   :  { %1723 = vmatpush.msra.mxu0 %v5680_v2  ;;  %1743 = vmatpush.msra.mxu1 %v6280_v41  ;;  %v6345_v2 = vld [vmem:[%s7540_s4 + $0x20] sm:$0xff] }
 0x3c5   :  { %1658 = vmatpush.msrb.mxu3 %v5693_v14  ;;  %1763 = vmatpush.msra.mxu2 %v5545_v42  ;;  %v6307_v42 = vld [vmem:[%s7540_s4 + $0x80] sm:$0xff] }
 0x3c6   :  { %1724 = vmatpush.msra.mxu0 %v5699_v35  ;;  %1744 = vmatpush.msra.mxu1 %v6289_v34  ;;  %v8286_v14 = vld [vmem:[#allocation27_spill] sm:$0xff]  ;;  %v8287_v35 = vld [vmem:[#allocation34_spill] sm:$0xff] }
 0x3c7   :  { %1659 = vmatpush.msrb.mxu3 %v5712_v48  ;;  %1764 = vmatpush.msra.mxu2 %v5564_v63  ;;  %v8274_v63 = vld [vmem:[#allocation43_spill] sm:$0xff]  ;;  %v6355_v48 = vld [vmem:[%s7540_s4 + $0x8] sm:$0xff] }
 0x3c8   :  { %1725 = vmatpush.msra.mxu0 %v5718_v12  ;;  %1745 = vmatpush.msra.mxu1 %v6298_v43  ;;  %v8289_v12 = vld [vmem:[#allocation41_spill] sm:$0xff] }
 0x3c9   :  { %1660 = vmatpush.msrb.mxu3 %v5731_v32  ;;  %1765 = vmatpush.msra.mxu2 %v5583_v31  ;;  %v8275_v31 = vld [vmem:[#allocation29_spill] sm:$0xff]  ;;  %v8288_v32 = vld [vmem:[#allocation42_spill] sm:$0xff] }
 0x3ca   :  { %1726 = vmatpush.msra.mxu0 %v5737_v47  ;;  %1746 = vmatpush.msra.mxu1 %v6307_v42  ;;  %v8285_v47 = vld [vmem:[#allocation55_spill] sm:$0xff] }
 0x3cb   :  { %1661 = vmatpush.msrb.mxu3 %v5750_v21  ;;  %1766 = vmatpush.msra.mxu2 %v5611_v54  ;;  %v8278_v54 = vld [vmem:[#allocation47_spill] sm:$0xff] }
 0x3cc   :  { %1727 = vmatpush.msra.mxu0 %v8274_v63  ;;  %1747 = vmatpush.msra.mxu1 %v6316_v59  ;;  %v8290_v21 = vld [vmem:[#allocation35_spill] sm:$0xff]  ;;  %v8309_v63 = vld [vmem:[#allocation50_spill] sm:$0xff] }
 0x3cd   :  { %1662 = vmatpush.msrb.mxu3 %v8275_v31  ;;  %1767 = vmatpush.msra.mxu2 %v8276_v13  ;;  %v6418_v31 = vld [vmem:[%s7542_s6 + $0xe8] sm:$0xff] }
 0x3ce   :  { %1728 = vmatpush.msra.mxu0 %v8277_v20  ;;  %1748 = vmatpush.msra.mxu1 %v6325_v39  ;;  %v8310_v13 = vld [vmem:[#allocation48_spill] sm:$0xff] }
 0x3cf   :  { %1663 = vmatpush.msrb.mxu3 %v8278_v54  ;;  %1768 = vmatpush.msra.mxu2 %v8279_v57  ;;  %v8311_v20 = vld [vmem:[#allocation52_spill] sm:$0xff]  ;;  %v8312_v54 = vld [vmem:[#allocation74_spill] sm:$0xff]  ;;  %v6427_v57 = vld [vmem:[%s7542_s6 + $0xd0] sm:$0xff] }
 0x3d0   :  { %1729 = vmatpush.msra.mxu0 %v8280_v44  ;;  %1749 = vmatpush.msra.mxu1 %v6334_v52  ;;  %v8313_v44 = vld [vmem:[#allocation73_spill] sm:$0xff] }
 0x3d1   :  { %1664 = vmatpush.msrb.mxu3 %v8281_v56  ;;  %1769 = vmatpush.msra.mxu2 %v8282_v11  ;;  %v8314_v56 = vld [vmem:[#allocation13_spill] sm:$0xff]  ;;  %v8315_v11 = vld [vmem:[#allocation10_spill] sm:$0xff] }
 0x3d2   :  { %1665 = vmatmul.f32.vlgmr.msrb.gmra.mxu3 %v6191_v22  ;;  %1730 = vmatpush.msra.mxu0 %v8283_v17  ;;  %v6436_v17 = vld [vmem:[%s7542_s6 + $0xb8] sm:$0xff] }
 0x3d3   :  { %1776 = vmatpush.msra.mxu3 %v8284_v30  ;;  %1750 = vmatpush.msra.mxu1 %v6345_v2  ;;  %v8316_v30 = vld [vmem:[#allocation54_spill] sm:$0xff] }
 0x3d4   :  { %1731 = vmatpush.msra.mxu0 %v8285_v47  ;;  %1770 = vmatpush.msra.mxu2 %v8286_v14  ;;  %v8317_v47 = vld [vmem:[#allocation5_spill] sm:$0xff]  ;;  %v8318_v14 = vld [vmem:[#allocation76_spill] sm:$0xff] }
 0x3d5   :  { %1777 = vmatpush.msra.mxu3 %v8287_v35  ;;  %1751 = vmatpush.msra.mxu1 %v6355_v48  ;;  %v6445_v35 = vld [vmem:[%s7542_s6 + $0xa0] sm:$0xff] }
 0x3d6   :  { %1796 = vmatpush.msrb.mxu0 %v8288_v32  ;;  %1771 = vmatpush.msra.mxu2 %v8289_v12  ;;  %v8319_v32 = vld [vmem:[#allocation56_spill] sm:$0xff]  ;;  %v8320_v12 = vld [vmem:[#allocation19_spill] sm:$0xff] }
 0x3d7   :  { %1778 = vmatpush.msra.mxu3 %v8290_v21  ;;  %1816 = vmatpush.msrb.mxu1 %v6364_v29  ;;  %v6453_v21 = vld [vmem:[%s7542_s6 + $0x68] sm:$0xff] }
 0x3d8   :  { %1797 = vmatpush.msrb.mxu0 %v8291_v18  ;;  %1887 = vmatpush.msrb.mxu2 %v8292_v50  ;;  %v6459_v18 = vld [vmem:[%s7542_s6 + $0x88] sm:$0xff]  ;;  %v8321_v50 = vld [vmem:[#allocation77_spill] sm:$0xff] }
 0x3d9   :  { %1779 = vmatpush.msra.mxu3 %v8293_v60  ;;  %1817 = vmatpush.msrb.mxu1 %v6373_v24  ;;  %v8322_v60 = vld [vmem:[#allocation23_spill] sm:$0xff] }
 0x3da   :  { %1798 = vmatpush.msrb.mxu0 %v8294_v51  ;;  %1888 = vmatpush.msrb.mxu2 %v8295_v3  ;;  %v6467_v51 = vld [vmem:[%s7542_s6 + $0x50] sm:$0xff] }
 0x3db   :  { %1780 = vmatpush.msra.mxu3 %v8296_v26  ;;  %1818 = vmatpush.msrb.mxu1 %v6382_v38  ;;  %v6473_v3 = vld [vmem:[%s7542_s6 + $0x70] sm:$0xff]  ;;  %v8323_v26 = vld [vmem:[#allocation6_spill] sm:$0xff] }
 0x3dc   :  { %1799 = vmatpush.msrb.mxu0 %v8297_v1  ;;  %1889 = vmatpush.msrb.mxu2 %v8298_v28  ;;  %v8324_v1 = vld [vmem:[#allocation26_spill] sm:$0xff] }
 0x3dd   :  { %1781 = vmatpush.msra.mxu3 %v8299_v10  ;;  %1819 = vmatpush.msrb.mxu1 %v6391_v33  ;;  %v6481_v28 = vld [vmem:[%s7542_s6 + $0x38] sm:$0xff] }
 0x3de   :  { %1800 = vmatpush.msrb.mxu0 %v8300_v36  ;;  %1890 = vmatpush.msrb.mxu2 %v8301_v7  ;;  %v6487_v10 = vld [vmem:[%s7542_s6 + $0x58] sm:$0xff]  ;;  %v8326_v36 = vld [vmem:[#allocation8_spill] sm:$0xff] }
 0x3df   :  { %1782 = vmatpush.msra.mxu3 %v8302_v15  ;;  %1820 = vmatpush.msrb.mxu1 %v6400_v40  ;;  %8325 = vst [vmem:[#allocation21_spill] sm:$0xff] %v6487_v10  ;;  %v8327_v7 = vld [vmem:[#allocation60_spill] sm:$0xff]  ;;  %v6495_v15 = vld [vmem:[%s7542_s6 + $0x20] sm:$0xff] }
 0x3e0   :  { %1801 = vmatpush.msrb.mxu0 %v8303_v8  ;;  %1891 = vmatpush.msrb.mxu2 %v8304_v61  ;;  %8328 = vst [vmem:[#allocation32_spill] sm:$0xff] %v6495_v15  ;;  %v6501_v8 = vld [vmem:[%s7539_s2 + $0x170] sm:$0xff]  ;;  %v6507_v61 = vld [vmem:[%s7542_s6 + $0x40] sm:$0xff] }
 0x3e1   :  { %1783 = vmatpush.msra.mxu3 %v8305_v19  ;;  %1821 = vmatpush.msrb.mxu1 %v6409_v55  ;;  %8329 = vst [vmem:[#allocation20_spill] sm:$0xff] %v6501_v8  ;;  %v6513_v19 = vld [vmem:[%s7542_s6 + $0x8] sm:$0xff] }
 0x3e2   :  { %1802 = vmatpush.msrb.mxu0 %v8306_v23  ;;  %1892 = vmatpush.msrb.mxu2 %v8307_v53  ;;  %8330 = vst [vmem:[#allocation25_spill] sm:$0xff] %v6507_v61  ;;  %v8332_v23 = vld [vmem:[#allocation75_spill] sm:$0xff]  ;;  %v6520_v53 = vld [vmem:[%s7539_s2 + $0x158] sm:$0xff] }
 0x3e3   :  { %1784 = vmatpush.msra.mxu3 %v8308_v4  ;;  %1822 = vmatpush.msrb.mxu1 %v6418_v31  ;;  %8331 = vst [vmem:[#allocation53_spill] sm:$0xff] %v6513_v19  ;;  %v6526_v4 = vld [vmem:[%s7542_s6 + $0x28] sm:$0xff] }
 0x3e4   :  { %1803 = vmatpush.msrb.mxu0 %v8309_v63  ;;  %1893 = vmatpush.msrb.mxu2 %v8310_v13  ;;  %8333 = vst [vmem:[#allocation43_spill] sm:$0xff] %v6520_v53  ;;  %v8335_v63 = vld [vmem:[#allocation16_spill] sm:$0xff]  ;;  %v6533_v13 = vld [vmem:[%s7539_s2 + $0x140] sm:$0xff] }
 0x3e5   :  { %1785 = vmatpush.msra.mxu3 %v8311_v20  ;;  %1823 = vmatpush.msrb.mxu1 %v6427_v57  ;;  %8334 = vst [vmem:[#allocation29_spill] sm:$0xff] %v6526_v4  ;;  %v6539_v20 = vld [vmem:[%s7542_s6 + $0x10] sm:$0xff] }
 0x3e6   :  { %1804 = vmatpush.msrb.mxu0 %v8312_v54  ;;  %1894 = vmatpush.msrb.mxu2 %v8313_v44  ;;  %8336 = vst [vmem:[#allocation24_spill] sm:$0xff] %v6533_v13  ;;  %v8338_v54 = vld [vmem:[#allocation7_spill] sm:$0xff]  ;;  %v6546_v44 = vld [vmem:[%s7539_s2 + $0x128] sm:$0xff] }
 0x3e7   :  { %1786 = vmatpush.msra.mxu3 %v8314_v56  ;;  %1824 = vmatpush.msrb.mxu1 %v6436_v17  ;;  %8337 = vst [vmem:[#allocation45_spill] sm:$0xff] %v6539_v20  ;;  %v6552_v56 = vld [vmem:[%s7539_s2 + $0x110] sm:$0xff] }
 0x3e8   :  { %1805 = vmatpush.msrb.mxu0 %v8315_v11  ;;  %1895 = vmatpush.msrb.mxu2 %v8316_v30  ;;  %8339 = vst [vmem:[#allocation47_spill] sm:$0xff] %v6546_v44  ;;  %v6558_v11 = vld [vmem:[%s7539_s2 + $0xf8] sm:$0xff] }
 0x3e9   :  { %1787 = vmatpush.msra.mxu3 %v8317_v47  ;;  %1825 = vmatpush.msrb.mxu1 %v6445_v35  ;;  %8340 = vst [vmem:[#allocation39_spill] sm:$0xff] %v6552_v56  ;;  %v8342_v30 = vld [vmem:[#allocation78_spill] sm:$0xff]  ;;  %v8343_v47 = vld [vmem:[#allocation79_spill] sm:$0xff] }
 0x3ea   :  { %1806 = vmatpush.msrb.mxu0 %v8318_v14  ;;  %1896 = vmatpush.msrb.mxu2 %v8319_v32  ;;  %8341 = vst [vmem:[#allocation49_spill] sm:$0xff] %v6558_v11  ;;  %v8344_v14 = vld [vmem:[#allocation3_spill] sm:$0xff]  ;;  %v8345_v32 = vld [vmem:[#allocation80_spill] sm:$0xff] }
 0x3eb   :  { %1788 = vmatpush.msra.mxu3 %v8320_v12  ;;  %1826 = vmatpush.msrb.mxu1 %v6459_v18  ;;  %v8346_v12 = vld [vmem:[#allocation9_spill] sm:$0xff] }
 0x3ec   :  { %1807 = vmatpush.msrb.mxu0 %v6453_v21  ;;  %1897 = vmatpush.msrb.mxu2 %v8321_v50  ;;  %v8347_v50 = vld [vmem:[#allocation81_spill] sm:$0xff] }
 0x3ed   :  { %1789 = vmatpush.msra.mxu3 %v8322_v60  ;;  %1827 = vmatpush.msrb.mxu1 %v6473_v3  ;;  %v8348_v60 = vld [vmem:[#allocation12_spill] sm:$0xff] }
 0x3ee   :  { %1808 = vmatpush.msrb.mxu0 %v6467_v51  ;;  %1898 = vmatpush.msrb.mxu2 %v8323_v26  ;;  %v8349_v26 = vld [vmem:[#allocation62_spill] sm:$0xff] }
 0x3ef   :  { %1790 = vmatpush.msra.mxu3 %v8324_v1  ;;  %1828 = vmatpush.msrb.mxu1 %v6487_v10  ;;  %v8350_v1 = vld [vmem:[#allocation4_spill] sm:$0xff] }
 0x3f0   :  { %1809 = vmatpush.msrb.mxu0 %v6481_v28  ;;  %1899 = vmatpush.msrb.mxu2 %v8326_v36  ;;  %v8351_v36 = vld [vmem:[#allocation17_spill] sm:$0xff] }
 0x3f1   :  { %1791 = vmatpush.msra.mxu3 %v8327_v7  ;;  %1829 = vmatpush.msrb.mxu1 %v6507_v61 }
 0x3f2   :  { %1810 = vmatpush.msrb.mxu0 %v6495_v15  ;;  %1900 = vmatpush.msrb.mxu2 %v8332_v23 }
 0x3f3   :  { %1907 = vmatpush.msrb.mxu3 %v6501_v8  ;;  %1830 = vmatpush.msrb.mxu1 %v6526_v4 }
 0x3f4   :  { %1811 = vmatpush.msrb.mxu0 %v6513_v19  ;;  %1901 = vmatpush.msrb.mxu2 %v8335_v63 }
 0x3f5   :  { %1908 = vmatpush.msrb.mxu3 %v6520_v53  ;;  %1831 = vmatpush.msrb.mxu1 %v6539_v20 }
 0x3f6   :  { %1902 = vmatpush.msrb.mxu2 %v8338_v54  ;;  %v8352_v54 = vld [vmem:[#allocation11_spill] sm:$0xff] }
 0x3f7   :  { %1909 = vmatpush.msrb.mxu3 %v6533_v13  ;;  %v8357_v13 = vld [vmem:[#allocation14_spill] sm:$0xff] }
 0x3f9   :  { %1910 = vmatpush.msrb.mxu3 %v6546_v44 }
 0x3fb   :  { %1911 = vmatpush.msrb.mxu3 %v6552_v56 }
 0x3fd   :  { %1912 = vmatpush.msrb.mxu3 %v6558_v11 }
 0x3ff   :  { %1913 = vmatpush.msrb.mxu3 %v8342_v30 }
 0x401   :  { %1914 = vmatpush.msrb.mxu3 %v8343_v47  ;;  %v8353_v47 = vld [vmem:[#allocation15_spill] sm:$0xff] }
 0x403   :  { %1915 = vmatpush.msrb.mxu3 %v8344_v14 }
 0x405   :  { %1916 = vmatpush.msrb.mxu3 %v8345_v32 }
 0x407   :  { %1917 = vmatpush.msrb.mxu3 %v8346_v12  ;;  %v2528_v12 = vld [vmem:[%s7544_s0 + $0x78] sm:$0xff] }
 0x409   :  { %1918 = vmatpush.msrb.mxu3 %v8347_v50 }
 0x40b   :  { %1919 = vmatpush.msrb.mxu3 %v8348_v60  ;;  %v8354_v60 = vld [vmem:[#allocation68_spill] sm:$0xff] }
 0x40d   :  { %1920 = vmatpush.msrb.mxu3 %v8349_v26 }
 0x40f   :  { %1921 = vmatpush.msrb.mxu3 %v8350_v1 }
 0x411   :  { %1922 = vmatpush.msrb.mxu3 %v8351_v36  ;;  %v2529_v36 = vld [vmem:[%s7544_s0 + $0x80] sm:$0xff] }
 0x42f   :  { %v1475_v56 = vpop.f32.mrf.mxu0 }
 0x430   :  { %v1495_v7 = vpop.f32.mrf.mxu1 }
 0x433   :  { %v1515_v23 = vpop.f32.mrf.mxu2 }
 0x434   :  { %v1516_v30 = vadd.f32 %v1515_v23, %v8352_v54  ;;  %v8355_v23 = vld [vmem:[#allocation69_spill] sm:$0xff] }
 0x435   :  { %v1455_v63 = vpop.f32.mrf.mxu3 }
 0x436   :  { %v1456_v14 = vadd.f32 %v1455_v63, %v8353_v47 }
 0x438   :  { %v1558_v32 = vadd.f32 %v1516_v30, %v1456_v14  ;;  %v1626_v50 = vpop.f32.mrf.mxu1  ;;  %v8356_v14 = vld [vmem:[#allocation64_spill] sm:$0xff] }
 0x439   :  { %v1627_v11 = vadd.f32 %v1626_v50, %v8354_v60  ;;  %v1476_v47 = vadd.f32 %v1475_v56, %v8356_v14 }
 0x43a   :  { %v2526_v26 = vmul.f32 -1.442695, %v1558_v32 }
 0x43b   :  { %v1669_v1 = vadd.f32 %v2528_v12, %v1627_v11  ;;  %v1646_v44 = vpop.f32.mrf.mxu2 }
 0x43c   :  { %2641 = vpow2.f32 %v2526_v26  ;;  %v1647_v54 = vadd.f32 %v1646_v44, %v8355_v23 }
 0x43d   :  { %v2531_v63 = vmul.f32 -1.442695, %v1669_v1  ;;  %v1535_v30 = vpop.f32.mrf.mxu3 }
 0x43e   :  { %v1689_v20 = vadd.f32 %v2529_v36, %v1647_v54  ;;  %v1536_v4 = vadd.f32 %v1535_v30, %v8357_v13 }
 0x43f   :  { %2643 = vpow2.f32 %v2531_v63 }
 0x440   :  { %v2532_v50 = vmul.f32 -1.442695, %v1689_v20  ;;  %v1578_v32 = vadd.f32 %v1536_v4, %v1476_v47  ;;  %v1555_v47 = vpop.f32.mrf.mxu0 }
 0x442   :  { %v2642_v60 = vpop.eup %2641  ;;  %2645 = vpow2.f32 %v2532_v50  ;;  %v2527_v11 = vmul.f32 -1.442695, %v1578_v32  ;;  %v1496_v32 = vadd.f32 %v1495_v7, %v8273_v58 }
 0x443   :  { %v1562_v12 = vadd.f32 1.0, %v2642_v60 }
 0x444   :  { %2647 = vpow2.f32 %v2527_v11  ;;  %v1556_v11 = vadd.f32 %v1555_v47, %v8272_v27 }
 0x445   :  { %v2644_v53 = vpop.eup %2643  ;;  %2649 = vrcp.f32 %v1562_v12  ;;  %v1572_v36 = vand.u32 2147483647, %v1562_v12  ;;  %v1574_v63 = vand.u32 2147483648, %v1562_v12  ;;  %vm1568_vm9 = vweird.f32 %v1562_v12 }
 0x446   :  { %v1673_v26 = vadd.f32 1.0, %v2644_v53 }
 0x447   :  { %vm1573_vm10 = vcmp.eq.f32.partialorder %v1572_v36, 8.507059e+37 }
 0x448   :  { %v2646_v19 = vpop.eup %2645  ;;  %2651 = vrcp.f32 %v1673_v26  ;;  %v1683_v50 = vand.u32 2147483647, %v1673_v26  ;;  %vm1679_vm12 = vweird.f32 %v1673_v26 }
 0x449   :  { %v6583_v44 = vadd.f32 1.0, %v2646_v19 }
 0x44a   :  { %v2648_v1 = vpop.eup %2647  ;;  %vm6593_vm14 = vcmp.eq.f32.partialorder %v1683_v50, 8.507059e+37 }
 0x44b   :  { %v2650_v56 = vpop.eup %2649  ;;  %2653 = vrcp.f32 %v6583_v44  ;;  %v6586_v54 = vadd.f32 1.0, %v2648_v1  ;;  %v1685_v1 = vand.u32 2147483648, %v1673_v26  ;;  %vm1699_vm2 = vweird.f32 %v6583_v44 }
 0x44c   :  { %v1564_v20 = vmul.f32 %v2650_v56, %v1562_v12  ;;  %vm1569_vm8 = vweird.f32 %v2650_v56 }
 0x44d   :  { %2655 = vrcp.f32 %v6586_v54  ;;  %vm1570_vm11 = vmor %vm1568_vm9, %vm1569_vm8  ;;  %v1686_v36 = vor.u32 1.1754944e-38, %v1685_v1  ;;  %vm1588_vm4 = vweird.f32 %v6586_v54 }
 0x44e   :  { %v2652_v4 = vpop.eup %2651  ;;  %v1565_v60 = vsub.f32 1.0, %v1564_v20  ;;  %v1575_v20 = vor.u32 1.1754944e-38, %v1574_v63 }
 0x44f   :  { %v1675_v30 = vmul.f32 %v2652_v4, %v1673_v26  ;;  %vm1680_vm13 = vweird.f32 %v2652_v4 }
 0x450   :  { %v1566_v53 = vmul.f32 %v2650_v56, %v1565_v60  ;;  %vm1681_vm15 = vmor %vm1679_vm12, %vm1680_vm13 }
 0x451   :  { %v2654_v19 = vpop.eup %2653  ;;  %v1676_v23 = vsub.f32 1.0, %v1675_v30 }
 0x452   :  { %v1567_v13 = vadd.f32 %v2650_v56, %v1566_v53  ;;  %v1695_v14 = vmul.f32 %v2654_v19, %v6583_v44  ;;  %v1592_v53 = vand.u32 2147483647, %v6586_v54  ;;  %vm1700_vm0 = vweird.f32 %v2654_v19 }
 0x453   :  { %v2656_v61 = vpop.eup %2655  ;;  %v1677_v8 = vmul.f32 %v2652_v4, %v1676_v23  ;;  %vm6608_vm3 = vmor %vm1699_vm2, %vm1700_vm0 }
 0x454   :  { %v1571_v60 = vsel %vm1570_vm11, %v2650_v56, %v1567_v13  ;;  %v1696_v15 = vsub.f32 1.0, %v1695_v14  ;;  %v1584_v10 = vmul.f32 %v2656_v61, %v6586_v54  ;;  %vm1589_vm1 = vweird.f32 %v2656_v61 }
 0x455   :  { %v1576_v47 = vsel %vm1573_vm10, %v1575_v20, %v1571_v60  ;;  %v1666_v30 = vpop.f32.mrf.mxu3  ;;  %v1678_v12 = vadd.f32 %v2652_v4, %v1677_v8  ;;  %v1594_v14 = vand.u32 2147483648, %v6586_v54  ;;  %v2530_v8 = vld [vmem:[%s7544_s0 + $0x88] sm:$0xff]  ;;  %vm1590_vm5 = vmor %vm1588_vm4, %vm1589_vm1  ;;  %vm1593_vm6 = vcmp.eq.f32.partialorder %v1592_v53, 8.507059e+37  ;;  %v6649_v53 = vld [vmem:[%s7539_s2 + $0x160] sm:$0xff] }
 0x456   :  { %v1598_v58 = vmul.f32 %v1576_v47, %v1556_v11  ;;  %v1697_v27 = vmul.f32 %v2654_v19, %v1696_v15  ;;  %v1585_v63 = vsub.f32 1.0, %v1584_v10  ;;  %v1667_v23 = vadd.f32 %v1666_v30, %v4054_v49 }
 0x457   :  { %v1682_v13 = vsel %vm1681_vm15, %v2652_v4, %v1678_v12  ;;  %v1705_v10 = vand.u32 2147483648, %v6583_v44  ;;  %v6716_v4 = vld [vmem:[%s7540_s4 + $0x130] sm:$0xff] }
 0x458   :  { %v1599_v56 = vadd.f32 %v1598_v58, %v1496_v32  ;;  %v1687_v50 = vsel %vm6593_vm14, %v1686_v36, %v1682_v13  ;;  %v1698_v11 = vadd.f32 %v2654_v19, %v1697_v27  ;;  %v1586_v15 = vmul.f32 %v2656_v61, %v1585_v63 }
 0x459   :  { %v1709_v26 = vmul.f32 %v1687_v50, %v1667_v23  ;;  %v1703_v58 = vand.u32 2147483647, %v6583_v44  ;;  %v1595_v27 = vor.u32 1.1754944e-38, %v1594_v14  ;;  %v1706_v7 = vor.u32 1.1754944e-38, %v1705_v10  ;;  %v6661_v50 = vld [vmem:[%s7540_s4 + $0x150] sm:$0xff]  ;;  %v6703_v10 = vld [vmem:[%s7540_s4 + $0x120] sm:$0xff] }
 0x45a   :  { %2657 = vtanh.f32 %v1599_v56  ;;  %v1587_v32 = vadd.f32 %v2656_v61, %v1586_v15  ;;  %v1702_v20 = vsel %vm6608_vm3, %v2654_v19, %v1698_v11  ;;  %v6627_v19 = vld [vmem:[%s7540_s4 + $0x178] sm:$0xff]  ;;  %v6688_v15 = vld [vmem:[%s7540_s4 + $0x148] sm:$0xff] }
 0x45b   :  { %v1710_v1 = vadd.f32 %v2530_v8, %v1709_v26  ;;  %vm1704_vm7 = vcmp.eq.f32.partialorder %v1703_v58, 8.507059e+37  ;;  %v6655_v8 = vld [vmem:[%s7540_s4 + $0x160] sm:$0xff]  ;;  %v6675_v11 = vld [vmem:[%s7540_s4 + $0x138] sm:$0xff]  ;;  %v6722_v58 = vld [vmem:[%s7540_s4 + $0x108] sm:$0xff] }
 0x45c   :  { %v1591_v60 = vsel %vm1590_vm5, %v2656_v61, %v1587_v32  ;;  %v1707_v12 = vsel %vm1704_vm7, %v1706_v7, %v1702_v20  ;;  %v6710_v26 = vld [vmem:[%s7539_s2 + $0x100] sm:$0xff]  ;;  %v6735_v32 = vld [vmem:[%s7540_s4 + $0x118] sm:$0xff]  ;;  %v6788_v20 = vld [vmem:[%s7540_s4 + $0xa8] sm:$0xff] }
 0x45d   :  { %2659 = vtanh.f32 %v1710_v1  ;;  %v1596_v47 = vsel %vm1593_vm6, %v1595_v27, %v1591_v60  ;;  %v1712_v54 = vsub.f32 1.0, %v1707_v12  ;;  %v1714_v56 = vmul.f32 %v1707_v12, %v6191_v22  ;;  %v6642_v22 = vld [vmem:[%s7540_s4 + $0x168] sm:$0xff]  ;;  %v6741_v1 = vld [vmem:[%s7540_s4 + $0xf0] sm:$0xff]  ;;  %v6755_v27 = vld [vmem:[%s7540_s4 + $0xd8] sm:$0xff] }
 0x45e   :  { %v1601_v30 = vsub.f32 1.0, %v1596_v47  ;;  %v1603_v63 = vmul.f32 %v1596_v47, %v6189_v45  ;;  %v6636_v45 = vld [vmem:[%s7539_s2 + $0x178] sm:$0xff]  ;;  %v6807_v7 = vld [vmem:[%s7540_s4 + $0x90] sm:$0xff]  ;;  %v6820_v47 = vld [vmem:[%s7540_s4 + $0xa0] sm:$0xff] }
 0x45f   :  { %v6801_v60 = vld [vmem:[%s7540_s4 + $0xb8] sm:$0xff]  ;;  %v6839_v12 = vld [vmem:[%s7540_s4 + $0x88] sm:$0xff] }
 0x460   :  { %v2658_v36 = vpop.eup %2657 }
 0x461   :  { %v1602_v44 = vmul.f32 %v2658_v36, %v1601_v30  ;;  %v6826_v30 = vld [vmem:[%s7540_s4 + $0x78] sm:$0xff]  ;;  %v6845_v36 = vld [vmem:[%s7540_s4 + $0x60] sm:$0xff] }
 0x462   :  { %8363 = vst [vmem:[#allocation57_spill] sm:$0xff] %v6826_v30 }
 0x463   :  { %v2660_v23 = vpop.eup %2659  ;;  %v6618_v13 = vadd.f32 %v1603_v63, %v1602_v44  ;;  %8365 = vst [vmem:[#allocation51_spill] sm:$0xff] %v6845_v36  ;;  %v6858_v44 = vld [vmem:[%s7540_s4 + $0x70] sm:$0xff]  ;;  %v6864_v63 = vld [vmem:[%s7540_s4 + $0x48] sm:$0xff] }
 0x464   :  { %v1713_v14 = vmul.f32 %v2660_v23, %v1712_v54  ;;  %8367 = vst [vmem:[#allocation27_spill] sm:$0xff] %v6864_v63  ;;  %v6877_v54 = vld [vmem:[%s7540_s4 + $0x58] sm:$0xff]  ;;  %v6883_v23 = vld [vmem:[%s7540_s4 + $0x30] sm:$0xff] }
 0x465   :  { %1792 = vmatmul.f32.vlgmr.msra.gmra.mxu3 %v6618_v13  ;;  %8369 = vst [vmem:[#allocation42_spill] sm:$0xff] %v6883_v23 }
 0x466   :  { %v6622_v61 = vadd.f32 %v1714_v56, %v1713_v14  ;;  %2034 = vmatpush.msra.mxu3 %v6627_v19  ;;  %v6896_v14 = vld [vmem:[%s7540_s4 + $0x40] sm:$0xff]  ;;  %v6909_v56 = vld [vmem:[%s7542_s6 + $0x168] sm:$0xff] }
 0x467   :  { %8372 = vst [vmem:[#allocation22_spill] sm:$0xff] %v6909_v56 }
 0x468   :  { %1732 = vmatmul.f32.vlgmr.msra.gmra.mxu0 %v6622_v61  ;;  %1752 = vmatmul.f32.vlgmr.msra.gmra.mxu1 %v6622_v61 }
 0x469   :  { %1772 = vmatmul.f32.vlgmr.msra.gmra.mxu2 %v6622_v61  ;;  %1927 = vmatpush.msra.mxu0 %v6636_v45 }
 0x46a   :  { %1994 = vmatpush.msra.mxu1 %v6642_v22  ;;  %2014 = vmatpush.msra.mxu2 %v6203_v62  ;;  %v6668_v62 = vld [vmem:[%s7539_s2 + $0x148] sm:$0xff] }
 0x46b   :  { %1928 = vmatpush.msra.mxu0 %v6649_v53  ;;  %2035 = vmatpush.msra.mxu3 %v6655_v8 }
 0x46c   :  { %1995 = vmatpush.msra.mxu1 %v6661_v50  ;;  %2015 = vmatpush.msra.mxu2 %v6212_v16  ;;  %v6682_v16 = vld [vmem:[%s7539_s2 + $0x130] sm:$0xff] }
 0x46d   :  { %1929 = vmatpush.msra.mxu0 %v6668_v62  ;;  %1923 = vmatmul.f32.vlgmr.msrb.gmra.mxu3 %v6622_v61 }
 0x46e   :  { %1996 = vmatpush.msra.mxu1 %v6675_v11  ;;  %2016 = vmatpush.msra.mxu2 %v6223_v25  ;;  %v6697_v25 = vld [vmem:[%s7539_s2 + $0x118] sm:$0xff] }
 0x46f   :  { %1930 = vmatpush.msra.mxu0 %v6682_v16  ;;  %2036 = vmatpush.msra.mxu3 %v6688_v15 }
 0x470   :  { %1812 = vmatmul.f32.vlgmr.msrb.gmra.mxu0 %v6618_v13  ;;  %1832 = vmatmul.f32.vlgmr.msrb.gmra.mxu1 %v6618_v13 }
 0x471   :  { %1903 = vmatmul.f32.vlgmr.msrb.gmra.mxu2 %v6622_v61  ;;  %1931 = vmatpush.msra.mxu0 %v6697_v25 }
 0x472   :  { %1997 = vmatpush.msra.mxu1 %v6703_v10  ;;  %2017 = vmatpush.msra.mxu2 %v6234_v5  ;;  %v6729_v5 = vld [vmem:[%s7539_s2 + $0xe8] sm:$0xff] }
 0x473   :  { %1932 = vmatpush.msra.mxu0 %v6710_v26  ;;  %2037 = vmatpush.msra.mxu3 %v6716_v4 }
 0x474   :  { %1998 = vmatpush.msra.mxu1 %v6722_v58  ;;  %2018 = vmatpush.msra.mxu2 %v6243_v9  ;;  %v6748_v9 = vld [vmem:[%s7539_s2 + $0xd0] sm:$0xff] }
 0x475   :  { %1933 = vmatpush.msra.mxu0 %v6729_v5  ;;  %2038 = vmatpush.msra.mxu3 %v6735_v32 }
 0x476   :  { %1999 = vmatpush.msra.mxu1 %v6741_v1  ;;  %2019 = vmatpush.msra.mxu2 %v6252_v46  ;;  %v6762_v46 = vld [vmem:[%s7539_s2 + $0xb8] sm:$0xff] }
 0x477   :  { %1934 = vmatpush.msra.mxu0 %v6748_v9  ;;  %2039 = vmatpush.msra.mxu3 %v6259_v0  ;;  %v6769_v0 = vld [vmem:[%s7540_s4 + $0xc0] sm:$0xff] }
 0x478   :  { %2000 = vmatpush.msra.mxu1 %v6755_v27  ;;  %2020 = vmatpush.msra.mxu2 %v6266_v37  ;;  %v6776_v37 = vld [vmem:[%s7539_s2 + $0xa0] sm:$0xff] }
 0x479   :  { %1935 = vmatpush.msra.mxu0 %v6762_v46  ;;  %2040 = vmatpush.msra.mxu3 %v6273_v6  ;;  %v6782_v6 = vld [vmem:[%s7540_s4 + $0xd0] sm:$0xff] }
 0x47a   :  { %2001 = vmatpush.msra.mxu1 %v6769_v0  ;;  %2021 = vmatpush.msra.mxu2 %v6280_v41  ;;  %v6795_v41 = vld [vmem:[%s7539_s2 + $0x88] sm:$0xff] }
 0x47b   :  { %1936 = vmatpush.msra.mxu0 %v6776_v37  ;;  %2041 = vmatpush.msra.mxu3 %v6782_v6 }
 0x47c   :  { %2002 = vmatpush.msra.mxu1 %v6788_v20  ;;  %2022 = vmatpush.msra.mxu2 %v6289_v34  ;;  %v6814_v34 = vld [vmem:[%s7539_s2 + $0x70] sm:$0xff] }
 0x47d   :  { %1937 = vmatpush.msra.mxu0 %v6795_v41  ;;  %2042 = vmatpush.msra.mxu3 %v6801_v60  ;;  %8362 = vst [vmem:[#allocation33_spill] sm:$0xff] %v6814_v34 }
 0x47e   :  { %2003 = vmatpush.msra.mxu1 %v6807_v7  ;;  %2023 = vmatpush.msra.mxu2 %v6298_v43  ;;  %v6833_v43 = vld [vmem:[%s7539_s2 + $0x58] sm:$0xff] }
 0x47f   :  { %1938 = vmatpush.msra.mxu0 %v6814_v34  ;;  %2043 = vmatpush.msra.mxu3 %v6820_v47  ;;  %8364 = vst [vmem:[#allocation63_spill] sm:$0xff] %v6833_v43 }
 0x480   :  { %2004 = vmatpush.msra.mxu1 %v6826_v30  ;;  %2024 = vmatpush.msra.mxu2 %v6307_v42  ;;  %v6852_v42 = vld [vmem:[%s7539_s2 + $0x40] sm:$0xff] }
 0x481   :  { %1939 = vmatpush.msra.mxu0 %v6833_v43  ;;  %2044 = vmatpush.msra.mxu3 %v6839_v12  ;;  %8366 = vst [vmem:[#allocation55_spill] sm:$0xff] %v6852_v42 }
 0x482   :  { %2005 = vmatpush.msra.mxu1 %v6845_v36  ;;  %2025 = vmatpush.msra.mxu2 %v6316_v59  ;;  %v6871_v59 = vld [vmem:[%s7539_s2 + $0x28] sm:$0xff]  ;;  %v8420_v36 = vld [vmem:[#allocation66_spill] sm:$0xff] }
 0x483   :  { %1940 = vmatpush.msra.mxu0 %v6852_v42  ;;  %2045 = vmatpush.msra.mxu3 %v6858_v44  ;;  %8368 = vst [vmem:[#allocation34_spill] sm:$0xff] %v6871_v59 }
 0x484   :  { %2006 = vmatpush.msra.mxu1 %v6864_v63  ;;  %2026 = vmatpush.msra.mxu2 %v6325_v39  ;;  %v6890_v39 = vld [vmem:[%s7539_s2 + $0x10] sm:$0xff] }
 0x485   :  { %1941 = vmatpush.msra.mxu0 %v6871_v59  ;;  %2046 = vmatpush.msra.mxu3 %v6877_v54  ;;  %8370 = vst [vmem:[#allocation41_spill] sm:$0xff] %v6890_v39  ;;  %v8419_v59 = vld [vmem:[#allocation18_spill] sm:$0xff] }
 0x486   :  { %2007 = vmatpush.msra.mxu1 %v6883_v23  ;;  %2027 = vmatpush.msra.mxu2 %v6334_v52  ;;  %v6903_v52 = vld [vmem:[%s7540_s4 + $0x18] sm:$0xff]  ;;  %v6963_v23 = vld [vmem:[%s7542_s6 + $0x120] sm:$0xff] }
 0x487   :  { %1942 = vmatpush.msra.mxu0 %v6890_v39  ;;  %2047 = vmatpush.msra.mxu3 %v6896_v14  ;;  %8371 = vst [vmem:[#allocation35_spill] sm:$0xff] %v6903_v52  ;;  %v6916_v39 = vld [vmem:[%s7540_s4] sm:$0xff] }
 0x488   :  { %1943 = vmatmul.f32.vlgmr.msra.gmra.mxu0 %v6622_v61  ;;  %2008 = vmatpush.msra.mxu1 %v6903_v52  ;;  %8373 = vst [vmem:[#allocation58_spill] sm:$0xff] %v6916_v39  ;;  %v6922_v52 = vld [vmem:[%s7540_s4 + $0x28] sm:$0xff] }
 0x489   :  { %2054 = vmatpush.msrb.mxu0 %v6909_v56  ;;  %2028 = vmatpush.msra.mxu2 %v6345_v2  ;;  %v6928_v56 = vld [vmem:[%s7542_s6 + $0x150] sm:$0xff]  ;;  %8379 = vst [vmem:[#allocation37_spill] sm:$0xff] %v6963_v23 }
 0x48a   :  { %2009 = vmatpush.msra.mxu1 %v6916_v39  ;;  %2048 = vmatpush.msra.mxu3 %v6922_v52  ;;  %8374 = vst [vmem:[#allocation36_spill] sm:$0xff] %v6928_v56  ;;  %v6934_v2 = vld [vmem:[%s7542_s6 + $0x170] sm:$0xff] }
 0x48b   :  { %2055 = vmatpush.msrb.mxu0 %v6928_v56  ;;  %8375 = vst [vmem:[#allocation59_spill] sm:$0xff] %v6934_v2  ;;  %2029 = vmatpush.msra.mxu2 %v6355_v48  ;;  %v6941_v39 = vld [vmem:[%s7540_s4 + $0x10] sm:$0xff]  ;;  %v6947_v56 = vld [vmem:[%s7542_s6 + $0x138] sm:$0xff]  ;;  %v3056_v48 = vld [vmem:[%s7539_s2 + $0x168] sm:$0xff] }
 0x48c   :  { %2074 = vmatpush.msrb.mxu1 %v6934_v2  ;;  %8376 = vst [vmem:[#allocation28_spill] sm:$0xff] %v6941_v39  ;;  %2049 = vmatpush.msra.mxu3 %v6941_v39  ;;  %v6953_v2 = vld [vmem:[%s7542_s6 + $0x158] sm:$0xff] }
 0x48d   :  { %8377 = vst [vmem:[#allocation61_spill] sm:$0xff] %v6947_v56  ;;  %2056 = vmatpush.msrb.mxu0 %v6947_v56  ;;  %2094 = vmatpush.msrb.mxu2 %v6364_v29  ;;  %v6969_v56 = vld [vmem:[%s7542_s6 + $0x140] sm:$0xff]  ;;  %v3059_v29 = vld [vmem:[%s7539_s2 + $0x150] sm:$0xff] }
 0x48e   :  { %8378 = vst [vmem:[#allocation38_spill] sm:$0xff] %v6953_v2  ;;  %2075 = vmatpush.msrb.mxu1 %v6953_v2  ;;  %2165 = vmatpush.msrb.mxu3 %v3056_v48  ;;  %v6979_v48 = vld [vmem:[%s7542_s6 + $0x108] sm:$0xff]  ;;  %v8417_v2 = vld [vmem:[#allocation69_spill] sm:$0xff] }
 0x48f   :  { %2057 = vmatpush.msrb.mxu0 %v6963_v23  ;;  %8380 = vst [vmem:[#allocation40_spill] sm:$0xff] %v6969_v56  ;;  %2095 = vmatpush.msrb.mxu2 %v6373_v24  ;;  %v6985_v23 = vld [vmem:[%s7542_s6 + $0x128] sm:$0xff]  ;;  %v3062_v24 = vld [vmem:[%s7539_s2 + $0x138] sm:$0xff] }
 0x490   :  { %2076 = vmatpush.msrb.mxu1 %v6969_v56  ;;  %2166 = vmatpush.msrb.mxu3 %v3059_v29  ;;  %8381 = vst [vmem:[#allocation65_spill] sm:$0xff] %v6979_v48  ;;  %v6995_v29 = vld [vmem:[%s7542_s6 + $0xf0] sm:$0xff] }
 0x491   :  { %2058 = vmatpush.msrb.mxu0 %v6979_v48  ;;  %8382 = vst [vmem:[#allocation30_spill] sm:$0xff] %v6985_v23  ;;  %2096 = vmatpush.msrb.mxu2 %v6382_v38  ;;  %v7001_v48 = vld [vmem:[%s7542_s6 + $0x110] sm:$0xff]  ;;  %v3065_v38 = vld [vmem:[%s7539_s2 + $0x120] sm:$0xff] }
 0x492   :  { %2077 = vmatpush.msrb.mxu1 %v6985_v23  ;;  %2167 = vmatpush.msrb.mxu3 %v3062_v24  ;;  %8383 = vst [vmem:[#allocation67_spill] sm:$0xff] %v6995_v29  ;;  %v7011_v24 = vld [vmem:[%s7542_s6 + $0xd8] sm:$0xff] }
 0x493   :  { %2059 = vmatpush.msrb.mxu0 %v6995_v29  ;;  %8384 = vst [vmem:[#allocation44_spill] sm:$0xff] %v7001_v48  ;;  %2097 = vmatpush.msrb.mxu2 %v6391_v33  ;;  %v7017_v29 = vld [vmem:[%s7542_s6 + $0xf8] sm:$0xff]  ;;  %v3068_v33 = vld [vmem:[%s7539_s2 + $0x108] sm:$0xff] }
 0x494   :  { %2078 = vmatpush.msrb.mxu1 %v7001_v48  ;;  %2168 = vmatpush.msrb.mxu3 %v3065_v38  ;;  %8385 = vst [vmem:[#allocation31_spill] sm:$0xff] %v7011_v24  ;;  %v7027_v38 = vld [vmem:[%s7542_s6 + $0xc0] sm:$0xff]  ;;  %v8416_v48 = vld [vmem:[#allocation14_spill] sm:$0xff] }
 0x495   :  { %2060 = vmatpush.msrb.mxu0 %v7011_v24  ;;  %8386 = vst [vmem:[#allocation46_spill] sm:$0xff] %v7017_v29  ;;  %2098 = vmatpush.msrb.mxu2 %v6400_v40  ;;  %v7033_v24 = vld [vmem:[%s7542_s6 + $0xe0] sm:$0xff]  ;;  %v3071_v40 = vld [vmem:[%s7539_s2 + $0xf0] sm:$0xff] }
 0x496   :  { %2079 = vmatpush.msrb.mxu1 %v7017_v29  ;;  %2169 = vmatpush.msrb.mxu3 %v3068_v33  ;;  %8387 = vst [vmem:[#allocation71_spill] sm:$0xff] %v7027_v38  ;;  %v7043_v33 = vld [vmem:[%s7542_s6 + $0xa8] sm:$0xff] }
 0x497   :  { %2061 = vmatpush.msrb.mxu0 %v7027_v38  ;;  %8388 = vst [vmem:[#allocation70_spill] sm:$0xff] %v7033_v24  ;;  %2099 = vmatpush.msrb.mxu2 %v6409_v55  ;;  %v7049_v38 = vld [vmem:[%s7542_s6 + $0xc8] sm:$0xff]  ;;  %v3074_v55 = vld [vmem:[%s7539_s2 + $0xd8] sm:$0xff] }
 0x498   :  { %2080 = vmatpush.msrb.mxu1 %v7033_v24  ;;  %2170 = vmatpush.msrb.mxu3 %v3071_v40  ;;  %8389 = vst [vmem:[#allocation72_spill] sm:$0xff] %v7043_v33  ;;  %v7059_v40 = vld [vmem:[%s7542_s6 + $0x90] sm:$0xff]  ;;  %v8415_v24 = vld [vmem:[#allocation64_spill] sm:$0xff] }
 0x499   :  { %2062 = vmatpush.msrb.mxu0 %v7043_v33  ;;  %8390 = vst [vmem:[#allocation50_spill] sm:$0xff] %v7049_v38  ;;  %2100 = vmatpush.msrb.mxu2 %v6418_v31  ;;  %v7065_v33 = vld [vmem:[%s7542_s6 + $0xb0] sm:$0xff]  ;;  %v3077_v31 = vld [vmem:[%s7539_s2 + $0xc0] sm:$0xff] }
 0x49a   :  { %2081 = vmatpush.msrb.mxu1 %v7049_v38  ;;  %2171 = vmatpush.msrb.mxu3 %v3074_v55  ;;  %8391 = vst [vmem:[#allocation48_spill] sm:$0xff] %v7059_v40  ;;  %v7075_v55 = vld [vmem:[%s7542_s6 + $0x78] sm:$0xff] }
 0x49b   :  { %2063 = vmatpush.msrb.mxu0 %v7059_v40  ;;  %8392 = vst [vmem:[#allocation52_spill] sm:$0xff] %v7065_v33  ;;  %2101 = vmatpush.msrb.mxu2 %v6427_v57  ;;  %v7081_v40 = vld [vmem:[%s7542_s6 + $0x98] sm:$0xff]  ;;  %v3080_v57 = vld [vmem:[%s7539_s2 + $0xa8] sm:$0xff] }
 0x49c   :  { %2082 = vmatpush.msrb.mxu1 %v7065_v33  ;;  %2172 = vmatpush.msrb.mxu3 %v3077_v31  ;;  %8393 = vst [vmem:[#allocation74_spill] sm:$0xff] %v7075_v55  ;;  %v7091_v31 = vld [vmem:[%s7542_s6 + $0x60] sm:$0xff] }
 0x49d   :  { %2064 = vmatpush.msrb.mxu0 %v7075_v55  ;;  %8394 = vst [vmem:[#allocation73_spill] sm:$0xff] %v7081_v40  ;;  %2102 = vmatpush.msrb.mxu2 %v6436_v17  ;;  %v7097_v55 = vld [vmem:[%s7542_s6 + $0x80] sm:$0xff]  ;;  %v3083_v17 = vld [vmem:[%s7539_s2 + $0x90] sm:$0xff] }
 0x49e   :  { %2083 = vmatpush.msrb.mxu1 %v7081_v40  ;;  %2173 = vmatpush.msrb.mxu3 %v3080_v57  ;;  %8395 = vst [vmem:[#allocation13_spill] sm:$0xff] %v7091_v31  ;;  %v7107_v57 = vld [vmem:[%s7542_s6 + $0x48] sm:$0xff] }
 0x49f   :  { %2065 = vmatpush.msrb.mxu0 %v7091_v31  ;;  %8396 = vst [vmem:[#allocation10_spill] sm:$0xff] %v7097_v55  ;;  %2103 = vmatpush.msrb.mxu2 %v6445_v35  ;;  %v3085_v35 = vld [vmem:[%s7539_s2 + $0x78] sm:$0xff] }
 0x4a0   :  { %2084 = vmatpush.msrb.mxu1 %v7097_v55  ;;  %2174 = vmatpush.msrb.mxu3 %v3083_v17  ;;  %8397 = vst [vmem:[#allocation54_spill] sm:$0xff] %v7107_v57  ;;  %v7118_v17 = vld [vmem:[%s7542_s6 + $0x30] sm:$0xff] }
 0x4a1   :  { %2066 = vmatpush.msrb.mxu0 %v7107_v57  ;;  %2104 = vmatpush.msrb.mxu2 %v6459_v18  ;;  %8398 = vst [vmem:[#allocation5_spill] sm:$0xff] %v7118_v17  ;;  %v7129_v18 = vld [vmem:[%s7542_s6 + $0x18] sm:$0xff]  ;;  %v8407_v57 = vld [vmem:[#allocation29_spill] sm:$0xff] }
 0x4a2   :  { %2085 = vmatpush.msrb.mxu1 %v6453_v21  ;;  %2175 = vmatpush.msrb.mxu3 %v3085_v35  ;;  %v3087_v21 = vld [vmem:[%s7539_s2 + $0x60] sm:$0xff]  ;;  %8399 = vst [vmem:[#allocation76_spill] sm:$0xff] %v7129_v18  ;;  %v8400_v35 = vld [vmem:[#allocation21_spill] sm:$0xff] }
 0x4a3   :  { %2067 = vmatpush.msrb.mxu0 %v7118_v17  ;;  %2105 = vmatpush.msrb.mxu2 %v6473_v3  ;;  %v7140_v3 = vld [vmem:[%s7542_s6] sm:$0xff]  ;;  %v8403_v17 = vld [vmem:[#allocation20_spill] sm:$0xff] }
 0x4a4   :  { %2086 = vmatpush.msrb.mxu1 %v6467_v51  ;;  %2176 = vmatpush.msrb.mxu3 %v3087_v21  ;;  %v3089_v51 = vld [vmem:[%s7539_s2 + $0x48] sm:$0xff]  ;;  %8401 = vst [vmem:[#allocation56_spill] sm:$0xff] %v7140_v3 }
 0x4a5   :  { %2068 = vmatpush.msrb.mxu0 %v7129_v18  ;;  %2106 = vmatpush.msrb.mxu2 %v8400_v35  ;;  %v8402_v21 = vld [vmem:[#allocation32_spill] sm:$0xff]  ;;  %v8404_v18 = vld [vmem:[#allocation25_spill] sm:$0xff] }
 0x4a6   :  { %2087 = vmatpush.msrb.mxu1 %v6481_v28  ;;  %2177 = vmatpush.msrb.mxu3 %v3089_v51  ;;  %v8405_v28 = vld [vmem:[#allocation53_spill] sm:$0xff]  ;;  %v8406_v51 = vld [vmem:[#allocation43_spill] sm:$0xff] }
 0x4a7   :  { %2069 = vmatpush.msrb.mxu0 %v7140_v3  ;;  %2107 = vmatpush.msrb.mxu2 %v8404_v18  ;;  %v3091_v35 = vld [vmem:[%s7539_s2 + $0x30] sm:$0xff]  ;;  %v3092_v3 = vld [vmem:[%s7539_s2 + $0x18] sm:$0xff]  ;;  %v3093_v18 = vld [vmem:[%s7539_s2] sm:$0xff] }
 0x4a8   :  { %2088 = vmatpush.msrb.mxu1 %v8402_v21  ;;  %2178 = vmatpush.msrb.mxu3 %v3091_v35  ;;  %v8408_v21 = vld [vmem:[#allocation24_spill] sm:$0xff]  ;;  %v8411_v35 = vld [vmem:[#allocation39_spill] sm:$0xff] }
 0x4a9   :  { %2185 = vmatpush.msra.mxu0 %v8403_v17  ;;  %2108 = vmatpush.msrb.mxu2 %v8407_v57  ;;  %v8409_v17 = vld [vmem:[#allocation45_spill] sm:$0xff]  ;;  %v3094_v57 = vld [vmem:[%s7539_s2 + $0xe0] sm:$0xff] }
 0x4aa   :  { %2089 = vmatpush.msrb.mxu1 %v8405_v28  ;;  %2179 = vmatpush.msrb.mxu3 %v3092_v3  ;;  %v8410_v28 = vld [vmem:[#allocation47_spill] sm:$0xff]  ;;  %v3095_v3 = vld [vmem:[%s7539_s2 + $0xc8] sm:$0xff] }
 0x4ab   :  { %2186 = vmatpush.msra.mxu0 %v8406_v51  ;;  %2109 = vmatpush.msrb.mxu2 %v8409_v17  ;;  %v8412_v51 = vld [vmem:[#allocation49_spill] sm:$0xff]  ;;  %v3097_v17 = vld [vmem:[%s7539_s2 + $0x98] sm:$0xff] }
 0x4ac   :  { %2180 = vmatpush.msrb.mxu3 %v3093_v18  ;;  %v3098_v18 = vld [vmem:[%s7539_s2 + $0x80] sm:$0xff] }
 0x4ad   :  { %2187 = vmatpush.msra.mxu0 %v8408_v21  ;;  %v3096_v21 = vld [vmem:[%s7539_s2 + $0xb0] sm:$0xff] }
 0x4af   :  { %2188 = vmatpush.msra.mxu0 %v8410_v28  ;;  %v3099_v28 = vld [vmem:[%s7539_s2 + $0x68] sm:$0xff] }
 0x4b1   :  { %2189 = vmatpush.msra.mxu0 %v8411_v35  ;;  %v3100_v35 = vld [vmem:[%s7539_s2 + $0x50] sm:$0xff] }
 0x4b3   :  { %2190 = vmatpush.msra.mxu0 %v8412_v51  ;;  %v3101_v51 = vld [vmem:[%s7539_s2 + $0x38] sm:$0xff] }
 0x4b5   :  { %2191 = vmatpush.msra.mxu0 %v3094_v57  ;;  %v3102_v57 = vld [vmem:[%s7539_s2 + $0x20] sm:$0xff] }
 0x4b7   :  { %2192 = vmatpush.msra.mxu0 %v3095_v3  ;;  %v3103_v3 = vld [vmem:[%s7539_s2 + $0x8] sm:$0xff] }
 0x4b9   :  { %2193 = vmatpush.msra.mxu0 %v3096_v21 }
 0x4bb   :  { %2194 = vmatpush.msra.mxu0 %v3097_v17 }
 0x4bd   :  { %2195 = vmatpush.msra.mxu0 %v3098_v18  ;;  %v8413_v18 = vld [vmem:[#allocation15_spill] sm:$0xff] }
 0x4bf   :  { %2196 = vmatpush.msra.mxu0 %v3099_v28 }
 0x4c1   :  { %2197 = vmatpush.msra.mxu0 %v3100_v35  ;;  %v8414_v35 = vld [vmem:[#allocation11_spill] sm:$0xff] }
 0x4c3   :  { %2198 = vmatpush.msra.mxu0 %v3101_v51 }
 0x4c5   :  { %2199 = vmatpush.msra.mxu0 %v3102_v57 }
 0x4c7   :  { %2200 = vmatpush.msra.mxu0 %v3103_v3  ;;  %v2536_v3 = vld [vmem:[%s7544_s0 + $0x98] sm:$0xff] }
 0x4e5   :  { %v1733_v21 = vpop.f32.mrf.mxu0  ;;  %v1753_v55 = vpop.f32.mrf.mxu1 }
 0x4e6   :  { %v1734_v28 = vadd.f32 %v1733_v21, %v8413_v18  ;;  %v1754_v29 = vadd.f32 %v1753_v55, %v8415_v24 }
 0x4e8   :  { %v1793_v17 = vpop.f32.mrf.mxu3 }
 0x4e9   :  { %v1794_v31 = vadd.f32 %v1793_v17, %v8414_v35 }
 0x4eb   :  { %v1836_v40 = vadd.f32 %v1794_v31, %v1734_v28 }
 0x4ec   :  { %v1773_v33 = vpop.f32.mrf.mxu2 }
 0x4ed   :  { %v2533_v51 = vmul.f32 -1.442695, %v1836_v40  ;;  %v1813_v38 = vpop.f32.mrf.mxu0  ;;  %v2535_v40 = vld [vmem:[%s7544_s0 + $0x90] sm:$0xff]  ;;  %v1774_v43 = vadd.f32 %v1773_v33, %v8420_v36 }
 0x4ee   :  { %v1814_v57 = vadd.f32 %v1813_v38, %v8416_v48  ;;  %v8418_v38 = vld [vmem:[#allocation68_spill] sm:$0xff] }
 0x4ef   :  { %2661 = vpow2.f32 %v2533_v51 }
 0x4f0   :  { %v1856_v23 = vadd.f32 %v1814_v57, %v1754_v29  ;;  %v1924_v56 = vpop.f32.mrf.mxu3 }
 0x4f1   :  { %v1925_v21 = vadd.f32 %v1924_v56, %v8417_v2 }
 0x4f2   :  { %v2534_v18 = vmul.f32 -1.442695, %v1856_v23 }
 0x4f3   :  { %v1967_v17 = vadd.f32 %v2536_v3, %v1925_v21 }
 0x4f4   :  { %2663 = vpow2.f32 %v2534_v18  ;;  %v1904_v31 = vpop.f32.mrf.mxu2 }
 0x4f5   :  { %v2662_v55 = vpop.eup %2661  ;;  %v2539_v28 = vmul.f32 -1.442695, %v1967_v17  ;;  %v1905_v51 = vadd.f32 %v1904_v31, %v8418_v38 }
 0x4f6   :  { %v1840_v29 = vadd.f32 1.0, %v2662_v55 }
 0x4f7   :  { %2665 = vpow2.f32 %v2539_v28  ;;  %v1947_v57 = vadd.f32 %v2535_v40, %v1905_v51 }
 0x4f8   :  { %2667 = vrcp.f32 %v1840_v29  ;;  %v1852_v2 = vand.u32 2147483648, %v1840_v29  ;;  %v1850_v40 = vand.u32 2147483647, %v1840_v29  ;;  %vm1846_vm9 = vweird.f32 %v1840_v29 }
 0x4f9   :  { %v2538_v48 = vmul.f32 -1.442695, %v1947_v57  ;;  %v1833_v57 = vpop.f32.mrf.mxu1 }
 0x4fa   :  { %v2664_v24 = vpop.eup %2663  ;;  %v1853_v38 = vor.u32 1.1754944e-38, %v1852_v2  ;;  %v1834_v63 = vadd.f32 %v1833_v57, %v8419_v59  ;;  %vm1851_vm11 = vcmp.eq.f32.partialorder %v1850_v40, 8.507059e+37 }
 0x4fb   :  { %v1860_v35 = vadd.f32 1.0, %v2664_v24  ;;  %2669 = vpow2.f32 %v2538_v48 }
 0x4fd   :  { %v2666_v23 = vpop.eup %2665  ;;  %2671 = vrcp.f32 %v1860_v35  ;;  %vm1866_vm13 = vweird.f32 %v1860_v35 }
 0x4fe   :  { %v2668_v56 = vpop.eup %2667  ;;  %v7205_v18 = vadd.f32 1.0, %v2666_v23 }
 0x4ff   :  { %v1842_v3 = vmul.f32 %v2668_v56, %v1840_v29  ;;  %vm1847_vm8 = vweird.f32 %v2668_v56 }
 0x500   :  { %2673 = vrcp.f32 %v7205_v18  ;;  %vm1848_vm10 = vmor %vm1846_vm9, %vm1847_vm8  ;;  %vm1977_vm5 = vweird.f32 %v7205_v18 }
 0x501   :  { %v2670_v21 = vpop.eup %2669  ;;  %v1843_v17 = vsub.f32 1.0, %v1842_v3 }
 0x502   :  { %v1951_v31 = vadd.f32 1.0, %v2670_v21 }
 0x503   :  { %v2672_v55 = vpop.eup %2671  ;;  %v1844_v28 = vmul.f32 %v2668_v56, %v1843_v17 }
 0x504   :  { %v1862_v51 = vmul.f32 %v2672_v55, %v1860_v35  ;;  %2675 = vrcp.f32 %v1951_v31  ;;  %vm1867_vm12 = vweird.f32 %v2672_v55  ;;  %v1963_v40 = vand.u32 2147483648, %v1951_v31 }
 0x505   :  { %v1845_v48 = vadd.f32 %v2668_v56, %v1844_v28  ;;  %v1872_v28 = vand.u32 2147483648, %v1860_v35  ;;  %vm1868_vm14 = vmor %vm1866_vm13, %vm1867_vm12  ;;  %vm1957_vm1 = vweird.f32 %v1951_v31 }
 0x506   :  { %v7208_v24 = vpop.eup %2673  ;;  %v1863_v23 = vsub.f32 1.0, %v1862_v51  ;;  %v1870_v51 = vand.u32 2147483647, %v1860_v35 }
 0x507   :  { %v1849_v42 = vsel %vm1848_vm10, %v2668_v56, %v1845_v48  ;;  %v1973_v21 = vmul.f32 %v7208_v24, %v7205_v18  ;;  %vm1978_vm3 = vweird.f32 %v7208_v24 }
 0x508   :  { %v1854_v3 = vsel %vm1851_vm11, %v1853_v38, %v1849_v42  ;;  %v1864_v17 = vmul.f32 %v2672_v55, %v1863_v23  ;;  %v1873_v38 = vor.u32 1.1754944e-38, %v1872_v28  ;;  %vm1871_vm15 = vcmp.eq.f32.partialorder %v1870_v51, 8.507059e+37  ;;  %vm1979_vm6 = vmor %vm1977_vm5, %vm1978_vm3 }
 0x509   :  { %v1876_v30 = vmul.f32 %v1854_v3, %v1834_v63  ;;  %v1974_v57 = vsub.f32 1.0, %v1973_v21  ;;  %v1961_v23 = vand.u32 2147483647, %v1951_v31  ;;  %v1944_v3 = vpop.f32.mrf.mxu0 }
 0x50a   :  { %v2676_v29 = vpop.eup %2675  ;;  %v1865_v34 = vadd.f32 %v2672_v55, %v1864_v17 }
 0x50b   :  { %v1877_v39 = vadd.f32 %v1876_v30, %v1774_v43  ;;  %v1953_v2 = vmul.f32 %v2676_v29, %v1951_v31  ;;  %vm1958_vm0 = vweird.f32 %v2676_v29  ;;  %v1975_v63 = vmul.f32 %v7208_v24, %v1974_v57 }
 0x50c   :  { %v1869_v56 = vsel %vm1868_vm14, %v2672_v55, %v1865_v34  ;;  %vm1959_vm2 = vmor %vm1957_vm1, %vm1958_vm0  ;;  %v1964_v30 = vor.u32 1.1754944e-38, %v1963_v40  ;;  %v1945_v34 = vadd.f32 %v1944_v3, %v4054_v49  ;;  %vm1962_vm4 = vcmp.eq.f32.partialorder %v1961_v23, 8.507059e+37  ;;  %v2537_v55 = vld [vmem:[%s7544_s0 + $0xa0] sm:$0xff] }
 0x50d   :  { %2677 = vtanh.f32 %v1877_v39  ;;  %v1954_v42 = vsub.f32 1.0, %v1953_v2  ;;  %v1874_v33 = vsel %vm1871_vm15, %v1873_v38, %v1869_v56  ;;  %v1976_v28 = vadd.f32 %v7208_v24, %v1975_v63  ;;  %v8437_v63 = vld [vmem:[#allocation61_spill] sm:$0xff]  ;;  %v3123_v3 = vld [vmem:[%s7542_s6 + $0x160] sm:$0xff] }
 0x50e   :  { %v1879_v43 = vsub.f32 1.0, %v1874_v33  ;;  %v1881_v31 = vmul.f32 %v1874_v33, %v6618_v13  ;;  %v1983_v2 = vand.u32 2147483648, %v7205_v18  ;;  %v1981_v56 = vand.u32 2147483647, %v7205_v18 }
 0x50f   :  { %v1955_v48 = vmul.f32 %v2676_v29, %v1954_v42  ;;  %v1980_v38 = vsel %vm1979_vm6, %v7208_v24, %v1976_v28  ;;  %v3126_v28 = vld [vmem:[%s7542_s6 + $0x118] sm:$0xff] }
 0x510   :  { %v1984_v40 = vor.u32 1.1754944e-38, %v1983_v2  ;;  %vm1982_vm7 = vcmp.eq.f32.partialorder %v1981_v56, 8.507059e+37  ;;  %v3127_v2 = vld [vmem:[%s7542_s6 + $0x100] sm:$0xff] }
 0x511   :  { %v1956_v17 = vadd.f32 %v2676_v29, %v1955_v48  ;;  %v8447_v56 = vld [vmem:[#allocation71_spill] sm:$0xff] }
 0x512   :  { %v1985_v13 = vsel %vm1982_vm7, %v1984_v40, %v1980_v38  ;;  %v8448_v38 = vld [vmem:[#allocation50_spill] sm:$0xff]  ;;  %v8449_v40 = vld [vmem:[#allocation72_spill] sm:$0xff] }
 0x513   :  { %v2678_v35 = vpop.eup %2677  ;;  %v1960_v39 = vsel %vm1959_vm2, %v2676_v29, %v1956_v17  ;;  %v1990_v48 = vsub.f32 1.0, %v1985_v13  ;;  %v1992_v33 = vmul.f32 %v1985_v13, %v6622_v61  ;;  %v3105_v61 = vld [vmem:[%s7540_s4 + $0x170] sm:$0xff]  ;;  %v8438_v17 = vld [vmem:[#allocation40_spill] sm:$0xff] }
 0x514   :  { %v1965_v21 = vsel %vm1962_vm4, %v1964_v30, %v1960_v39  ;;  %v1880_v51 = vmul.f32 %v2678_v35, %v1879_v43  ;;  %v8439_v30 = vld [vmem:[#allocation37_spill] sm:$0xff]  ;;  %v3124_v43 = vld [vmem:[%s7542_s6 + $0x148] sm:$0xff]  ;;  %v8440_v35 = vld [vmem:[#allocation30_spill] sm:$0xff] }
 0x515   :  { %v1987_v57 = vmul.f32 %v1965_v21, %v1945_v34  ;;  %v8441_v34 = vld [vmem:[#allocation65_spill] sm:$0xff]  ;;  %v8443_v21 = vld [vmem:[#allocation67_spill] sm:$0xff] }
 0x516   :  { %v7225_v42 = vadd.f32 %v1881_v31, %v1880_v51  ;;  %v3125_v39 = vld [vmem:[%s7542_s6 + $0x130] sm:$0xff]  ;;  %v8444_v51 = vld [vmem:[#allocation46_spill] sm:$0xff]  ;;  %v8445_v31 = vld [vmem:[#allocation31_spill] sm:$0xff] }
 0x517   :  { %v1988_v29 = vadd.f32 %v2537_v55, %v1987_v57  ;;  %v8442_v55 = vld [vmem:[#allocation44_spill] sm:$0xff]  ;;  %v8446_v57 = vld [vmem:[#allocation70_spill] sm:$0xff]  ;;  %v3129_v13 = vld [vmem:[%s7542_s6 + $0xd0] sm:$0xff] }
 0x518   :  { %2070 = vmatmul.f32.vlgmr.msrb.gmra.mxu0 %v7225_v42 }
 0x519   :  { %2679 = vtanh.f32 %v1988_v29  ;;  %2312 = vmatpush.msrb.mxu0 %v6627_v19  ;;  %v3104_v19 = vld [vmem:[%s7540_s4 + $0x100] sm:$0xff]  ;;  %v3128_v29 = vld [vmem:[%s7542_s6 + $0xe8] sm:$0xff] }
 0x51b   :  { %2313 = vmatpush.msrb.mxu0 %v6655_v8  ;;  %v3106_v8 = vld [vmem:[%s7540_s4 + $0xe8] sm:$0xff] }
 0x51d   :  { %2314 = vmatpush.msrb.mxu0 %v6688_v15  ;;  %v3114_v15 = vld [vmem:[%s7540_s4 + $0xb0] sm:$0xff] }
 0x51f   :  { %v2680_v18 = vpop.eup %2679  ;;  %2315 = vmatpush.msrb.mxu0 %v6716_v4  ;;  %v8423_v4 = vld [vmem:[#allocation57_spill] sm:$0xff] }
 0x520   :  { %v1991_v23 = vmul.f32 %v2680_v18, %v1990_v48  ;;  %v8450_v48 = vld [vmem:[#allocation52_spill] sm:$0xff] }
 0x521   :  { %2316 = vmatpush.msrb.mxu0 %v6735_v32  ;;  %v8425_v32 = vld [vmem:[#allocation51_spill] sm:$0xff]  ;;  %v8451_v18 = vld [vmem:[#allocation48_spill] sm:$0xff] }
 0x522   :  { %v7235_v24 = vadd.f32 %v1992_v33, %v1991_v23  ;;  %v3130_v23 = vld [vmem:[%s7542_s6 + $0xb8] sm:$0xff]  ;;  %v8452_v33 = vld [vmem:[#allocation73_spill] sm:$0xff] }
 0x523   :  { %2317 = vmatpush.msrb.mxu0 %v3104_v19  ;;  %v8453_v19 = vld [vmem:[#allocation74_spill] sm:$0xff] }
 0x524   :  { %2010 = vmatmul.f32.vlgmr.msra.gmra.mxu1 %v7235_v24  ;;  %2030 = vmatmul.f32.vlgmr.msra.gmra.mxu2 %v7235_v24 }
 0x525   :  { %2050 = vmatmul.f32.vlgmr.msra.gmra.mxu3 %v7235_v24  ;;  %2201 = vmatmul.f32.vlgmr.msra.gmra.mxu0 %v7235_v24 }
 0x526   :  { %2205 = vmatpush.msra.mxu1 %v6636_v45  ;;  %2272 = vmatpush.msra.mxu2 %v6642_v22  ;;  %v3107_v45 = vld [vmem:[%s7540_s4 + $0x158] sm:$0xff]  ;;  %v3108_v22 = vld [vmem:[%s7540_s4 + $0x140] sm:$0xff] }
 0x527   :  { %2292 = vmatpush.msra.mxu3 %v3105_v61  ;;  %2318 = vmatpush.msrb.mxu0 %v3106_v8  ;;  %v3131_v61 = vld [vmem:[%s7542_s6 + $0xa0] sm:$0xff]  ;;  %v8454_v8 = vld [vmem:[#allocation10_spill] sm:$0xff] }
 0x528   :  { %2206 = vmatpush.msra.mxu1 %v6649_v53  ;;  %2273 = vmatpush.msra.mxu2 %v6661_v50  ;;  %v3109_v53 = vld [vmem:[%s7540_s4 + $0x128] sm:$0xff]  ;;  %v3110_v50 = vld [vmem:[%s7540_s4 + $0x110] sm:$0xff] }
 0x529   :  { %2293 = vmatpush.msra.mxu3 %v3107_v45  ;;  %2319 = vmatpush.msrb.mxu0 %v6782_v6  ;;  %v3119_v6 = vld [vmem:[%s7540_s4 + $0x38] sm:$0xff]  ;;  %v8455_v45 = vld [vmem:[#allocation13_spill] sm:$0xff] }
 0x52a   :  { %2207 = vmatpush.msra.mxu1 %v6668_v62  ;;  %2274 = vmatpush.msra.mxu2 %v6675_v11  ;;  %v3111_v62 = vld [vmem:[%s7540_s4 + $0xf8] sm:$0xff]  ;;  %v3112_v11 = vld [vmem:[%s7540_s4 + $0xe0] sm:$0xff] }
 0x52b   :  { %2294 = vmatpush.msra.mxu3 %v3108_v22  ;;  %2320 = vmatpush.msrb.mxu0 %v6801_v60  ;;  %v3120_v60 = vld [vmem:[%s7540_s4 + $0x20] sm:$0xff]  ;;  %v3132_v22 = vld [vmem:[%s7542_s6 + $0x88] sm:$0xff] }
 0x52c   :  { %2208 = vmatpush.msra.mxu1 %v6682_v16  ;;  %2110 = vmatmul.f32.vlgmr.msrb.gmra.mxu2 %v7225_v42  ;;  %v3113_v16 = vld [vmem:[%s7540_s4 + $0xc8] sm:$0xff] }
 0x52d   :  { %2090 = vmatmul.f32.vlgmr.msrb.gmra.mxu1 %v7225_v42  ;;  %2181 = vmatmul.f32.vlgmr.msrb.gmra.mxu3 %v7235_v24 }
 0x52e   :  { %2209 = vmatpush.msra.mxu1 %v6697_v25  ;;  %2275 = vmatpush.msra.mxu2 %v6703_v10  ;;  %v3115_v25 = vld [vmem:[%s7540_s4 + $0x98] sm:$0xff]  ;;  %v8421_v10 = vld [vmem:[#allocation28_spill] sm:$0xff] }
 0x52f   :  { %2295 = vmatpush.msra.mxu3 %v3109_v53  ;;  %2321 = vmatpush.msrb.mxu0 %v6820_v47  ;;  %v8433_v47 = vld [vmem:[#allocation58_spill] sm:$0xff]  ;;  %v3133_v53 = vld [vmem:[%s7542_s6 + $0x68] sm:$0xff] }
 0x530   :  { %2210 = vmatpush.msra.mxu1 %v6710_v26  ;;  %2276 = vmatpush.msra.mxu2 %v6722_v58  ;;  %v8422_v26 = vld [vmem:[#allocation33_spill] sm:$0xff]  ;;  %v3116_v58 = vld [vmem:[%s7540_s4 + $0x80] sm:$0xff] }
 0x531   :  { %2296 = vmatpush.msra.mxu3 %v3110_v50  ;;  %2322 = vmatpush.msrb.mxu0 %v6839_v12  ;;  %v3121_v12 = vld [vmem:[%s7540_s4 + $0x8] sm:$0xff]  ;;  %v8456_v50 = vld [vmem:[#allocation54_spill] sm:$0xff] }
 0x532   :  { %2211 = vmatpush.msra.mxu1 %v6729_v5  ;;  %2277 = vmatpush.msra.mxu2 %v6741_v1  ;;  %v8424_v5 = vld [vmem:[#allocation63_spill] sm:$0xff]  ;;  %v3117_v1 = vld [vmem:[%s7540_s4 + $0x68] sm:$0xff] }
 0x533   :  { %2297 = vmatpush.msra.mxu3 %v3111_v62  ;;  %2323 = vmatpush.msrb.mxu0 %v6858_v44  ;;  %v8434_v44 = vld [vmem:[#allocation59_spill] sm:$0xff]  ;;  %v3134_v62 = vld [vmem:[%s7542_s6 + $0x70] sm:$0xff] }
 0x534   :  { %2212 = vmatpush.msra.mxu1 %v6748_v9  ;;  %2278 = vmatpush.msra.mxu2 %v6755_v27  ;;  %v8426_v9 = vld [vmem:[#allocation55_spill] sm:$0xff] }
 0x535   :  { %2298 = vmatpush.msra.mxu3 %v3112_v11  ;;  %2324 = vmatpush.msrb.mxu0 %v6877_v54  ;;  %v8427_v27 = vld [vmem:[#allocation27_spill] sm:$0xff]  ;;  %v8435_v54 = vld [vmem:[#allocation36_spill] sm:$0xff]  ;;  %v3135_v11 = vld [vmem:[%s7542_s6 + $0x50] sm:$0xff] }
 0x536   :  { %2213 = vmatpush.msra.mxu1 %v6762_v46  ;;  %2279 = vmatpush.msra.mxu2 %v6769_v0  ;;  %v3118_v46 = vld [vmem:[%s7540_s4 + $0x50] sm:$0xff]  ;;  %v8428_v0 = vld [vmem:[#allocation34_spill] sm:$0xff] }
 0x537   :  { %2299 = vmatpush.msra.mxu3 %v3113_v16  ;;  %2325 = vmatpush.msrb.mxu0 %v6896_v14  ;;  %v3122_v14 = vld [vmem:[%s7542_s6 + $0x178] sm:$0xff]  ;;  %v8457_v16 = vld [vmem:[#allocation5_spill] sm:$0xff] }
 0x538   :  { %2214 = vmatpush.msra.mxu1 %v6776_v37  ;;  %2280 = vmatpush.msra.mxu2 %v6788_v20  ;;  %v8429_v37 = vld [vmem:[#allocation42_spill] sm:$0xff]  ;;  %v8430_v20 = vld [vmem:[#allocation41_spill] sm:$0xff] }
 0x539   :  { %2300 = vmatpush.msra.mxu3 %v3114_v15  ;;  %2326 = vmatpush.msrb.mxu0 %v6922_v52  ;;  %v8436_v52 = vld [vmem:[#allocation38_spill] sm:$0xff] }
 0x53a   :  { %2215 = vmatpush.msra.mxu1 %v6795_v41  ;;  %2281 = vmatpush.msra.mxu2 %v6807_v7  ;;  %v8431_v41 = vld [vmem:[#allocation35_spill] sm:$0xff]  ;;  %v8432_v7 = vld [vmem:[#allocation22_spill] sm:$0xff] }
 0x53b   :  { %2301 = vmatpush.msra.mxu3 %v3115_v25  ;;  %2327 = vmatpush.msrb.mxu0 %v8421_v10  ;;  %v3136_v15 = vld [vmem:[%s7542_s6 + $0x58] sm:$0xff]  ;;  %v8458_v10 = vld [vmem:[#allocation76_spill] sm:$0xff] }
 0x53c   :  { %2216 = vmatpush.msra.mxu1 %v8422_v26  ;;  %2282 = vmatpush.msra.mxu2 %v8423_v4  ;;  %v3137_v25 = vld [vmem:[%s7542_s6 + $0x38] sm:$0xff]  ;;  %v3138_v26 = vld [vmem:[%s7542_s6 + $0x40] sm:$0xff] }
 0x53d   :  { %2302 = vmatpush.msra.mxu3 %v3116_v58  ;;  %v3139_v4 = vld [vmem:[%s7542_s6 + $0x20] sm:$0xff]  ;;  %v8459_v58 = vld [vmem:[#allocation56_spill] sm:$0xff] }
 0x53e   :  { %2217 = vmatpush.msra.mxu1 %v8424_v5  ;;  %2283 = vmatpush.msra.mxu2 %v8425_v32  ;;  %v3140_v5 = vld [vmem:[%s7542_s6 + $0x28] sm:$0xff] }
 0x53f   :  { %2303 = vmatpush.msra.mxu3 %v3117_v1  ;;  %v3141_v32 = vld [vmem:[%s7542_s6 + $0x8] sm:$0xff]  ;;  %v3142_v1 = vld [vmem:[%s7542_s6 + $0x10] sm:$0xff] }
 0x540   :  { %2218 = vmatpush.msra.mxu1 %v8426_v9  ;;  %2284 = vmatpush.msra.mxu2 %v8427_v27 }
 0x541   :  { %2304 = vmatpush.msra.mxu3 %v3118_v46  ;;  %v8460_v46 = vld [vmem:[#allocation11_spill] sm:$0xff] }
 0x542   :  { %2219 = vmatpush.msra.mxu1 %v8428_v0  ;;  %2285 = vmatpush.msra.mxu2 %v8429_v37  ;;  %v8461_v37 = vld [vmem:[#allocation15_spill] sm:$0xff] }
 0x543   :  { %2305 = vmatpush.msra.mxu3 %v3119_v6 }
 0x544   :  { %2220 = vmatpush.msra.mxu1 %v8430_v20  ;;  %2286 = vmatpush.msra.mxu2 %v8431_v41  ;;  %v2543_v41 = vld [vmem:[%s7544_s0 + $0xb0] sm:$0xff] }
 0x545   :  { %2221 = vmatmul.f32.vlgmr.msra.gmra.mxu1 %v7235_v24  ;;  %2306 = vmatpush.msra.mxu3 %v3120_v60  ;;  %v8462_v60 = vld [vmem:[#allocation69_spill] sm:$0xff] }
 0x546   :  { %2332 = vmatpush.msrb.mxu1 %v8432_v7  ;;  %2287 = vmatpush.msra.mxu2 %v8433_v47 }
 0x547   :  { %2307 = vmatpush.msra.mxu3 %v3121_v12 }
 0x548   :  { %2352 = vmatpush.msrb.mxu2 %v8434_v44  ;;  %2333 = vmatpush.msrb.mxu1 %v8435_v54 }
 0x549   :  { %2372 = vmatpush.msrb.mxu3 %v3122_v14 }
 0x54a   :  { %2353 = vmatpush.msrb.mxu2 %v8436_v52  ;;  %2334 = vmatpush.msrb.mxu1 %v8437_v63 }
 0x54b   :  { %2373 = vmatpush.msrb.mxu3 %v3123_v3  ;;  %v2462_v3 = vld [vmem:[%s7547_s8 + $0x78] sm:$0xff] }
 0x54c   :  { %2354 = vmatpush.msrb.mxu2 %v8438_v17  ;;  %2335 = vmatpush.msrb.mxu1 %v8439_v30  ;;  %v8463_v17 = vld [vmem:[#allocation64_spill] sm:$0xff] }
 0x54d   :  { %2374 = vmatpush.msrb.mxu3 %v3124_v43  ;;  %v8464_v43 = vld [vmem:[#allocation14_spill] sm:$0xff]  ;;  %2467 = vmatpush.msra.mxu0 %v2462_v3 }
 0x54e   :  { %2355 = vmatpush.msrb.mxu2 %v8440_v35  ;;  %2336 = vmatpush.msrb.mxu1 %v8441_v34  ;;  %v2461_v34 = vld [vmem:[%s7547_s8 + $0x70] sm:$0xff] }
 0x54f   :  { %2375 = vmatpush.msrb.mxu3 %v3125_v39  ;;  %2468 = vmatpush.msra.mxu0 %v2461_v34 }
 0x550   :  { %2356 = vmatpush.msrb.mxu2 %v8442_v55  ;;  %2337 = vmatpush.msrb.mxu1 %v8443_v21  ;;  %v2460_v21 = vld [vmem:[%s7547_s8 + $0x68] sm:$0xff] }
 0x551   :  { %2376 = vmatpush.msrb.mxu3 %v3126_v28  ;;  %2469 = vmatpush.msra.mxu0 %v2460_v21 }
 0x552   :  { %2357 = vmatpush.msrb.mxu2 %v8444_v51  ;;  %2338 = vmatpush.msrb.mxu1 %v8445_v31 }
 0x553   :  { %2377 = vmatpush.msrb.mxu3 %v3127_v2  ;;  %v2459_v2 = vld [vmem:[%s7547_s8 + $0x60] sm:$0xff] }
 0x554   :  { %2358 = vmatpush.msrb.mxu2 %v8446_v57  ;;  %2339 = vmatpush.msrb.mxu1 %v8447_v56  ;;  %v2542_v57 = vld [vmem:[%s7544_s0 + $0xa8] sm:$0xff] }
 0x555   :  { %2378 = vmatpush.msrb.mxu3 %v3128_v29  ;;  %2470 = vmatpush.msra.mxu0 %v2459_v2  ;;  %v8465_v56 = vld [vmem:[#allocation68_spill] sm:$0xff] }
 0x556   :  { %2359 = vmatpush.msrb.mxu2 %v8448_v38  ;;  %2340 = vmatpush.msrb.mxu1 %v8449_v40  ;;  %v2458_v38 = vld [vmem:[%s7547_s8 + $0x58] sm:$0xff] }
 0x557   :  { %2379 = vmatpush.msrb.mxu3 %v3129_v13  ;;  %2471 = vmatpush.msra.mxu0 %v2458_v38 }
 0x558   :  { %2360 = vmatpush.msrb.mxu2 %v8450_v48  ;;  %2341 = vmatpush.msrb.mxu1 %v8451_v18  ;;  %v2457_v48 = vld [vmem:[%s7547_s8 + $0x50] sm:$0xff] }
 0x559   :  { %2380 = vmatpush.msrb.mxu3 %v3130_v23  ;;  %2472 = vmatpush.msra.mxu0 %v2457_v48 }
 0x55a   :  { %2361 = vmatpush.msrb.mxu2 %v8452_v33  ;;  %2342 = vmatpush.msrb.mxu1 %v8453_v19  ;;  %v2456_v19 = vld [vmem:[%s7547_s8 + $0x48] sm:$0xff] }
 0x55b   :  { %2381 = vmatpush.msrb.mxu3 %v3131_v61  ;;  %2473 = vmatpush.msra.mxu0 %v2456_v19 }
 0x55c   :  { %2362 = vmatpush.msrb.mxu2 %v8454_v8  ;;  %2343 = vmatpush.msrb.mxu1 %v8455_v45  ;;  %v2455_v45 = vld [vmem:[%s7547_s8 + $0x40] sm:$0xff] }
 0x55d   :  { %2382 = vmatpush.msrb.mxu3 %v3132_v22  ;;  %2474 = vmatpush.msra.mxu0 %v2455_v45  ;;  %v2544_v45 = vld [vmem:[%s7544_s0 + $0xb8] sm:$0xff] }
 0x55e   :  { %2363 = vmatpush.msrb.mxu2 %v3133_v53  ;;  %2344 = vmatpush.msrb.mxu1 %v8456_v50 }
 0x55f   :  { %2383 = vmatpush.msrb.mxu3 %v3134_v62  ;;  %v2454_v62 = vld [vmem:[%s7547_s8 + $0x38] sm:$0xff] }
 0x560   :  { %2364 = vmatpush.msrb.mxu2 %v3135_v11  ;;  %2345 = vmatpush.msrb.mxu1 %v8457_v16 }
 0x561   :  { %2384 = vmatpush.msrb.mxu3 %v3136_v15  ;;  %2475 = vmatpush.msra.mxu0 %v2454_v62 }
 0x562   :  { %2365 = vmatpush.msrb.mxu2 %v3137_v25  ;;  %2346 = vmatpush.msrb.mxu1 %v8458_v10  ;;  %v2453_v25 = vld [vmem:[%s7547_s8 + $0x30] sm:$0xff]  ;;  %v2452_v10 = vld [vmem:[%s7547_s8 + $0x28] sm:$0xff] }
 0x563   :  { %2385 = vmatpush.msrb.mxu3 %v3138_v26  ;;  %2476 = vmatpush.msra.mxu0 %v2453_v25 }
 0x564   :  { %2366 = vmatpush.msrb.mxu2 %v3139_v4  ;;  %2347 = vmatpush.msrb.mxu1 %v8459_v58 }
 0x565   :  { %2386 = vmatpush.msrb.mxu3 %v3140_v5  ;;  %2477 = vmatpush.msra.mxu0 %v2452_v10 }
 0x566   :  { %2367 = vmatpush.msrb.mxu2 %v3141_v32  ;;  %v2451_v32 = vld [vmem:[%s7547_s8 + $0x20] sm:$0xff] }
 0x567   :  { %2387 = vmatpush.msrb.mxu3 %v3142_v1  ;;  %2478 = vmatpush.msra.mxu0 %v2451_v32 }
 0x595   :  { %v2071_v9 = vpop.f32.mrf.mxu0 }
 0x596   :  { %v2072_v0 = vadd.f32 %v2071_v9, %v8460_v46 }
 0x5a1   :  { %v2011_v27 = vpop.f32.mrf.mxu1 }
 0x5a2   :  { %v2012_v6 = vadd.f32 %v2011_v27, %v8461_v37  ;;  %v2202_v20 = vpop.f32.mrf.mxu0 }
 0x5a3   :  { %v2203_v7 = vadd.f32 %v2202_v20, %v8462_v60  ;;  %v2450_v60 = vld [vmem:[%s7547_s8 + $0x18] sm:$0xff] }
 0x5a4   :  { %v2114_v47 = vadd.f32 %v2072_v0, %v2012_v6  ;;  %2479 = vmatpush.msra.mxu0 %v2450_v60 }
 0x5a5   :  { %v2245_v44 = vadd.f32 %v2543_v41, %v2203_v7 }
 0x5a6   :  { %v2540_v12 = vmul.f32 -1.442695, %v2114_v47  ;;  %v2449_v47 = vld [vmem:[%s7547_s8 + $0x10] sm:$0xff] }
 0x5a7   :  { %v2031_v54 = vpop.f32.mrf.mxu2  ;;  %v2546_v52 = vmul.f32 -1.442695, %v2245_v44  ;;  %2480 = vmatpush.msra.mxu0 %v2449_v47 }
 0x5a8   :  { %2681 = vpow2.f32 %v2540_v12  ;;  %v7436_v14 = vpop.f32.mrf.mxu3  ;;  %v2032_v30 = vadd.f32 %v2031_v54, %v8463_v17 }
 0x5a9   :  { %2683 = vpow2.f32 %v2546_v52  ;;  %v2052_v20 = vadd.f32 %v7436_v14, %v8420_v36  ;;  %v2448_v14 = vld [vmem:[%s7547_s8 + $0x8] sm:$0xff] }
 0x5aa   :  { %v2091_v63 = vpop.f32.mrf.mxu1  ;;  %2481 = vmatpush.msra.mxu0 %v2448_v14 }
 0x5ab   :  { %v2092_v35 = vadd.f32 %v2091_v63, %v8464_v43 }
 0x5ad   :  { %v2134_v39 = vadd.f32 %v2092_v35, %v2032_v30  ;;  %v2447_v35 = vld [vmem:[%s7547_s8] sm:$0xff] }
 0x5ae   :  { %v2682_v55 = vpop.eup %2681  ;;  %2482 = vmatpush.msra.mxu0 %v2447_v35 }
 0x5af   :  { %v2118_v28 = vadd.f32 1.0, %v2682_v55  ;;  %v2541_v51 = vmul.f32 -1.442695, %v2134_v39  ;;  %v2684_v40 = vpop.eup %2683  ;;  %v2111_v15 = vpop.f32.mrf.mxu2 }
 0x5b0   :  { %v2182_v31 = vpop.f32.mrf.mxu3  ;;  %v7462_v33 = vadd.f32 1.0, %v2684_v40  ;;  %v2112_v1 = vadd.f32 %v2111_v15, %v8419_v59 }
 0x5b1   :  { %2685 = vrcp.f32 %v2118_v28  ;;  %v2183_v29 = vadd.f32 %v2182_v31, %v8465_v56  ;;  %v2130_v50 = vand.u32 2147483648, %v2118_v28  ;;  %v2128_v16 = vand.u32 2147483647, %v2118_v28 }
 0x5b2   :  { %2687 = vpow2.f32 %v2541_v51  ;;  %vm2124_vm9 = vweird.f32 %v2118_v28  ;;  %v2261_v62 = vand.u32 2147483648, %v7462_v33  ;;  %vm2255_vm5 = vweird.f32 %v7462_v33 }
 0x5b3   :  { %v2225_v13 = vadd.f32 %v2542_v57, %v2183_v29  ;;  %v2131_v58 = vor.u32 1.1754944e-38, %v2130_v50  ;;  %vm2129_vm11 = vcmp.eq.f32.partialorder %v2128_v16, 8.507059e+37 }
 0x5b4   :  { %v2262_v15 = vor.u32 1.1754944e-38, %v2261_v62 }
 0x5b5   :  { %v2545_v18 = vmul.f32 -1.442695, %v2225_v13 }
 0x5b7   :  { %v2686_v23 = vpop.eup %2685  ;;  %2689 = vpow2.f32 %v2545_v18 }
 0x5b8   :  { %v2120_v61 = vmul.f32 %v2686_v23, %v2118_v28  ;;  %v2688_v8 = vpop.eup %2687  ;;  %2691 = vrcp.f32 %v7462_v33  ;;  %vm2125_vm8 = vweird.f32 %v2686_v23 }
 0x5b9   :  { %v2138_v22 = vadd.f32 1.0, %v2688_v8  ;;  %vm2126_vm10 = vmor %vm2124_vm9, %vm2125_vm8 }
 0x5ba   :  { %v2121_v53 = vsub.f32 1.0, %v2120_v61 }
 0x5bb   :  { %2693 = vrcp.f32 %v2138_v22  ;;  %v2150_v52 = vand.u32 2147483648, %v2138_v22  ;;  %v2148_v30 = vand.u32 2147483647, %v2138_v22  ;;  %vm2144_vm13 = vweird.f32 %v2138_v22 }
 0x5bc   :  { %v2122_v11 = vmul.f32 %v2686_v23, %v2121_v53 }
 0x5bd   :  { %v2690_v26 = vpop.eup %2689  ;;  %v2151_v28 = vor.u32 1.1754944e-38, %v2150_v52  ;;  %vm2149_vm15 = vcmp.eq.f32.partialorder %v2148_v30, 8.507059e+37 }
 0x5be   :  { %v2123_v4 = vadd.f32 %v2686_v23, %v2122_v11  ;;  %v2229_v5 = vadd.f32 1.0, %v2690_v26  ;;  %v7484_v27 = vpop.eup %2691 }
 0x5bf   :  { %v2251_v44 = vmul.f32 %v7484_v27, %v7462_v33  ;;  %vm2256_vm4 = vweird.f32 %v7484_v27 }
 0x5c0   :  { %v2127_v9 = vsel %vm2126_vm10, %v2686_v23, %v2123_v4  ;;  %2695 = vrcp.f32 %v2229_v5  ;;  %v2241_v51 = vand.u32 2147483648, %v2229_v5  ;;  %v2239_v56 = vand.u32 2147483647, %v2229_v5  ;;  %vm2257_vm6 = vmor %vm2255_vm5, %vm2256_vm4 }
 0x5c1   :  { %v2132_v0 = vsel %vm2129_vm11, %v2131_v58, %v2127_v9  ;;  %v2694_v6 = vpop.eup %2693  ;;  %v2252_v39 = vsub.f32 1.0, %v2251_v44  ;;  %vm2235_vm1 = vweird.f32 %v2229_v5 }
 0x5c2   :  { %v2154_v41 = vmul.f32 %v2132_v0, %v2112_v1  ;;  %v2140_v7 = vmul.f32 %v2694_v6, %v2138_v22  ;;  %vm2145_vm12 = vweird.f32 %v2694_v6  ;;  %v2222_v40 = vpop.f32.mrf.mxu1  ;;  %v2242_v18 = vor.u32 1.1754944e-38, %v2241_v51 }
 0x5c3   :  { %vm2146_vm14 = vmor %vm2144_vm13, %vm2145_vm12  ;;  %v2253_v38 = vmul.f32 %v7484_v27, %v2252_v39  ;;  %v2223_v61 = vadd.f32 %v2222_v40, %v4054_v49  ;;  %vm2240_vm3 = vcmp.eq.f32.partialorder %v2239_v56, 8.507059e+37  ;;  %v2259_v49 = vand.u32 2147483647, %v7462_v33 }
 0x5c4   :  { %v2155_v12 = vadd.f32 %v2154_v41, %v2052_v20  ;;  %v2141_v54 = vsub.f32 1.0, %v2140_v7 }
 0x5c5   :  { %v2254_v53 = vadd.f32 %v7484_v27, %v2253_v38  ;;  %vm2260_vm7 = vcmp.eq.f32.partialorder %v2259_v49, 8.507059e+37 }
 0x5c6   :  { %2697 = vtanh.f32 %v2155_v12  ;;  %v2696_v63 = vpop.eup %2695  ;;  %v2142_v3 = vmul.f32 %v2694_v6, %v2141_v54 }
 0x5c7   :  { %v2231_v34 = vmul.f32 %v2696_v63, %v2229_v5  ;;  %vm2236_vm0 = vweird.f32 %v2696_v63  ;;  %v2258_v16 = vsel %vm2257_vm6, %v7484_v27, %v2254_v53 }
 0x5c8   :  { %v2143_v55 = vadd.f32 %v2694_v6, %v2142_v3  ;;  %vm2237_vm2 = vmor %vm2235_vm1, %vm2236_vm0  ;;  %v2263_v25 = vsel %vm2260_vm7, %v2262_v15, %v2258_v16 }
 0x5c9   :  { %v2232_v21 = vsub.f32 1.0, %v2231_v34  ;;  %v2268_v10 = vsub.f32 1.0, %v2263_v25  ;;  %v2270_v58 = vmul.f32 %v2263_v25, %v7235_v24  ;;  %v2550_v24 = vld [vmem:[%s7549_s9] ss:$0 sm:$0xff] }
 0x5ca   :  { %v2147_v31 = vsel %vm2146_vm14, %v2694_v6, %v2143_v55 }
 0x5cb   :  { %v2233_v57 = vmul.f32 %v2696_v63, %v2232_v21  ;;  %v2152_v29 = vsel %vm2149_vm15, %v2151_v28, %v2147_v31 }
 0x5cc   :  { %v2698_v2 = vpop.eup %2697  ;;  %v2157_v13 = vsub.f32 1.0, %v2152_v29  ;;  %v2159_v19 = vmul.f32 %v2152_v29, %v7225_v42 }
 0x5cd   :  { %v2234_v48 = vadd.f32 %v2696_v63, %v2233_v57 }
 0x5ce   :  { %v2158_v23 = vmul.f32 %v2698_v2, %v2157_v13 }
 0x5cf   :  { %v2238_v8 = vsel %vm2237_vm2, %v2696_v63, %v2234_v48 }
 0x5d0   :  { %v2243_v22 = vsel %vm2240_vm3, %v2242_v18, %v2238_v8  ;;  %v7510_v50 = vadd.f32 %v2159_v19, %v2158_v23 }
 0x5d1   :  { %v2265_v11 = vmul.f32 %v2243_v22, %v2223_v61 }
 0x5d2   :  { %2348 = vmatmul.f32.vlgmr.msrb.gmra.mxu1 %v7510_v50 }
 0x5d3   :  { %v2266_v42 = vadd.f32 %v2544_v45, %v2265_v11 }
 0x5d5   :  { %2699 = vtanh.f32 %v2266_v42 }
 0x5db   :  { %v2700_v26 = vpop.eup %2699 }
 0x5dc   :  { %v2269_v4 = vmul.f32 %v2700_v26, %v2268_v10 }
 0x5de   :  { %v2271_v5 = vadd.f32 %v2270_v58, %v2269_v4 }
 0x5e0   :  { %2288 = vmatmul.f32.vlgmr.msra.gmra.mxu2 %v2271_v5  ;;  %2308 = vmatmul.f32.vlgmr.msra.gmra.mxu3 %v2271_v5  ;;  %2444 = vst [vmem:[%s7548_s11] sm:$0xff] %v2271_v5 }
 0x5e1   :  { %2328 = vmatmul.f32.vlgmr.msrb.gmra.mxu0 %v2271_v5 }
 0x5e8   :  { %2368 = vmatmul.f32.vlgmr.msrb.gmra.mxu2 %v7510_v50  ;;  %2388 = vmatmul.f32.vlgmr.msrb.gmra.mxu3 %v7510_v50 }
 0x5e9   :  { %2483 = vmatmul.f32.vlgmr.msra.gmra.mxu0 %v2271_v5 }
 0x64f   :  { %v2349_v32 = vpop.f32.mrf.mxu1 }
 0x650   :  { %v2350_v9 = vadd.f32 %v2349_v32, %v8460_v46 }
 0x65e   :  { %v2329_v33 = vpop.f32.mrf.mxu0 }
 0x65f   :  { %v2330_v57 = vadd.f32 %v2329_v33, %v8420_v36 }
 0x663   :  { %v2289_v1 = vpop.f32.mrf.mxu2  ;;  %v2309_v60 = vpop.f32.mrf.mxu3 }
 0x664   :  { %v2290_v27 = vadd.f32 %v2289_v1, %v8461_v37  ;;  %v2310_v47 = vadd.f32 %v2309_v60, %v8463_v17 }
 0x666   :  { %v2392_v0 = vadd.f32 %v2350_v9, %v2290_v27  ;;  %v2484_v6 = vpop.f32.mrf.mxu0 }
 0x667   :  { %v2485_v20 = vadd.f32 %v2550_v24, %v2484_v6 }
 0x668   :  { %v2547_v41 = vmul.f32 -1.442695, %v2392_v0 }
 0x669   :  { %2487 = vst [vmem:[%s7550_s10] sm:$0xff] %v2485_v20 }
 0x66a   :  { %2701 = vpow2.f32 %v2547_v41 }
 0x66b   :  { %v2369_v7 = vpop.f32.mrf.mxu2  ;;  %v2389_v55 = vpop.f32.mrf.mxu3 }
 0x66c   :  { %v2370_v12 = vadd.f32 %v2369_v7, %v8464_v43  ;;  %v2390_v51 = vadd.f32 %v2389_v55, %v8419_v59 }
 0x66e   :  { %v2412_v44 = vadd.f32 %v2370_v12, %v2310_v47 }
 0x670   :  { %v2702_v54 = vpop.eup %2701  ;;  %v2548_v46 = vmul.f32 -1.442695, %v2412_v44 }
 0x671   :  { %v2396_v14 = vadd.f32 1.0, %v2702_v54 }
 0x672   :  { %2703 = vpow2.f32 %v2548_v46 }
 0x673   :  { %2705 = vrcp.f32 %v2396_v14  ;;  %v2408_v35 = vand.u32 2147483648, %v2396_v14  ;;  %v2406_v39 = vand.u32 2147483647, %v2396_v14  ;;  %vm2402_vm9 = vweird.f32 %v2396_v14 }
 0x675   :  { %v2409_v21 = vor.u32 1.1754944e-38, %v2408_v35  ;;  %vm2407_vm11 = vcmp.eq.f32.partialorder %v2406_v39, 8.507059e+37 }
 0x678   :  { %v2704_v37 = vpop.eup %2703 }
 0x679   :  { %v2706_v52 = vpop.eup %2705  ;;  %v2416_v63 = vadd.f32 1.0, %v2704_v37 }
 0x67a   :  { %v2398_v3 = vmul.f32 %v2706_v52, %v2396_v14  ;;  %vm2403_vm8 = vweird.f32 %v2706_v52 }
 0x67b   :  { %2707 = vrcp.f32 %v2416_v63  ;;  %vm2404_vm10 = vmor %vm2402_vm9, %vm2403_vm8  ;;  %v2428_v38 = vand.u32 2147483648, %v2416_v63  ;;  %v2426_v13 = vand.u32 2147483647, %v2416_v63  ;;  %vm2422_vm13 = vweird.f32 %v2416_v63 }
 0x67c   :  { %v2399_v30 = vsub.f32 1.0, %v2398_v3 }
 0x67d   :  { %v2429_v23 = vor.u32 1.1754944e-38, %v2428_v38  ;;  %vm2427_vm15 = vcmp.eq.f32.partialorder %v2426_v13, 8.507059e+37 }
 0x67e   :  { %v2400_v34 = vmul.f32 %v2706_v52, %v2399_v30 }
 0x680   :  { %v2401_v17 = vadd.f32 %v2706_v52, %v2400_v34 }
 0x681   :  { %v2708_v43 = vpop.eup %2707 }
 0x682   :  { %v2418_v28 = vmul.f32 %v2708_v43, %v2416_v63  ;;  %v2405_v31 = vsel %vm2404_vm10, %v2706_v52, %v2401_v17  ;;  %vm2423_vm12 = vweird.f32 %v2708_v43 }
 0x683   :  { %v2410_v2 = vsel %vm2407_vm11, %v2409_v21, %v2405_v31  ;;  %vm2424_vm14 = vmor %vm2422_vm13, %vm2423_vm12 }
 0x684   :  { %v2419_v56 = vsub.f32 1.0, %v2418_v28  ;;  %v2432_v29 = vmul.f32 %v2410_v2, %v2390_v51 }
 0x686   :  { %v2420_v40 = vmul.f32 %v2708_v43, %v2419_v56  ;;  %v2433_v48 = vadd.f32 %v2432_v29, %v2330_v57 }
 0x688   :  { %v2421_v18 = vadd.f32 %v2708_v43, %v2420_v40  ;;  %2709 = vtanh.f32 %v2433_v48 }
 0x68a   :  { %v2425_v19 = vsel %vm2424_vm14, %v2708_v43, %v2421_v18 }
 0x68b   :  { %v2430_v59 = vsel %vm2427_vm15, %v2429_v23, %v2425_v19 }
 0x68c   :  { %v2435_v61 = vsub.f32 1.0, %v2430_v59  ;;  %v2437_v36 = vmul.f32 %v2430_v59, %v7510_v50 }
 0x68e   :  { %v2710_v8 = vpop.eup %2709 }
 0x68f   :  { %v2436_v45 = vmul.f32 %v2710_v8, %v2435_v61 }
 0x691   :  { %v2438_v22 = vadd.f32 %v2437_v36, %v2436_v45 }
 0x693   :  { %2549 = vst [vmem:[%s7548_s11 + $0x8] sm:$0xff] %v2438_v22 }

</bundles_post_ra>
